<compile_context>
chip_gen: v7x
topology: tpu7x:2x2x1
jax: 0.10.0
libtpu: 0.0.40
codegen_flags: <defaults>
</compile_context>

<pallas_src>
import functools
import math

import jax
import jax.numpy as jnp
from jax import lax
from jax.experimental import pallas as pl
from jax.experimental.pallas import tpu as pltpu

MXU_DTYPE = jnp.bfloat16   # MXU operand dtype; accumulation is always f32.
LN_EPS = 1e-5

# Stacked-weight key orders (leading axis = layer index).
ENC_KEYS = ("wqkv", "bqkv", "wo", "bo", "ln1_g", "ln1_b",
            "ff_w1", "ff_b1", "ff_w2", "ff_b2", "ln2_g", "ln2_b")
DEC_KEYS = ("s_wqkv", "s_bqkv", "s_wo", "s_bo", "ln1_g", "ln1_b",
            "c_wq", "c_bq", "c_wkv", "c_bkv", "c_wo", "c_bo", "ln2_g", "ln2_b",
            "ff_w1", "ff_b1", "ff_w2", "ff_b2", "ln3_g", "ln3_b")


# ------------------------------ spec helpers ------------------------------

def _full_spec(a):
    """Whole-array block, identical block index every grid step (no re-DMA)."""
    return pl.BlockSpec(a.shape, lambda b, _nd=a.ndim: (0,) * _nd)


def _batch_spec(shape):
    """Per-batch (1, ...) block of a batch-leading array."""
    rest = shape[1:]
    return pl.BlockSpec((1,) + rest, lambda b, _n=len(rest): (b,) + (0,) * _n)


# ----------------------------- in-kernel math -----------------------------

def _layer_norm(y, g, b, eps):
    mu = jnp.mean(y, axis=-1, keepdims=True)
    var = jnp.mean((y - mu) ** 2, axis=-1, keepdims=True)
    return (y - mu) * lax.rsqrt(var + eps) * g + b


def _attention(q, k, v, n_heads):
    """q: (Tq, D), k/v: (Tk, D) f32. 1/sqrt(dh) already folded into q. Returns (Tq, D)."""
    D = q.shape[-1]
    dh = D // n_heads
    outs = []
    for h in range(n_heads):                       # static unroll; lane slices of width dh
        sl = slice(h * dh, (h + 1) * dh)
        qh = q[:, sl].astype(MXU_DTYPE)
        kh = k[:, sl].astype(MXU_DTYPE)
        vh = v[:, sl].astype(MXU_DTYPE)
        s = lax.dot_general(qh, kh, (((1,), (1,)), ((), ())),
                            preferred_element_type=jnp.float32)       # (Tq, Tk)
        m = jnp.max(s, axis=-1, keepdims=True)
        p = jnp.exp(s - m)
        l = jnp.sum(p, axis=-1, keepdims=True)
        oh = jnp.dot(p.astype(MXU_DTYPE), vh, preferred_element_type=jnp.float32)
        # normalize the (Tq, dh) output, not the (Tq, Tk) probs; reciprocal -> EUP slot
        outs.append(oh * pl.reciprocal(l, approx=True))
    return jnp.concatenate(outs, axis=-1)          # (Tq, D)


def _enc_layer_body(x, p, n_heads, eps):
    D = x.shape[-1]
    qkv = jnp.dot(x.astype(MXU_DTYPE), p["wqkv"],
                  preferred_element_type=jnp.float32) + p["bqkv"]
    a = _attention(qkv[:, :D], qkv[:, D:2 * D], qkv[:, 2 * D:], n_heads)
    a = jnp.dot(a.astype(MXU_DTYPE), p["wo"],
                preferred_element_type=jnp.float32) + p["bo"]
    y = _layer_norm(x + a, p["ln1_g"], p["ln1_b"], eps)
    h = jnp.dot(y.astype(MXU_DTYPE), p["ff_w1"],
                preferred_element_type=jnp.float32) + p["ff_b1"]
    h = jnp.maximum(h, 0.0)
    h = jnp.dot(h.astype(MXU_DTYPE), p["ff_w2"],
                preferred_element_type=jnp.float32) + p["ff_b2"]
    return _layer_norm(y + h, p["ln2_g"], p["ln2_b"], eps)


def _dec_layer_body(y, mem, p, n_heads, eps):
    D = y.shape[-1]
    # self-attention
    qkv = jnp.dot(y.astype(MXU_DTYPE), p["s_wqkv"],
                  preferred_element_type=jnp.float32) + p["s_bqkv"]
    a = _attention(qkv[:, :D], qkv[:, D:2 * D], qkv[:, 2 * D:], n_heads)
    a = jnp.dot(a.astype(MXU_DTYPE), p["s_wo"],
                preferred_element_type=jnp.float32) + p["s_bo"]
    y1 = _layer_norm(y + a, p["ln1_g"], p["ln1_b"], eps)
    # cross-attention (K/V fused into one (D, 2D) matmul on the encoder memory)
    q = jnp.dot(y1.astype(MXU_DTYPE), p["c_wq"],
                preferred_element_type=jnp.float32) + p["c_bq"]
    kv = jnp.dot(mem.astype(MXU_DTYPE), p["c_wkv"],
                 preferred_element_type=jnp.float32) + p["c_bkv"]
    c = _attention(q, kv[:, :D], kv[:, D:], n_heads)
    c = jnp.dot(c.astype(MXU_DTYPE), p["c_wo"],
                preferred_element_type=jnp.float32) + p["c_bo"]
    y2 = _layer_norm(y1 + c, p["ln2_g"], p["ln2_b"], eps)
    # feed-forward
    h = jnp.dot(y2.astype(MXU_DTYPE), p["ff_w1"],
                preferred_element_type=jnp.float32) + p["ff_b1"]
    h = jnp.maximum(h, 0.0)
    h = jnp.dot(h.astype(MXU_DTYPE), p["ff_w2"],
                preferred_element_type=jnp.float32) + p["ff_b2"]
    return _layer_norm(y2 + h, p["ln3_g"], p["ln3_b"], eps)


# ------------------------------- fused kernel -------------------------------

def _fused_kernel(*refs, n_enc, n_dec, n_heads, eps):
    (src_ref, tgt_ref, pe_ref,
     enc_in_w_ref, enc_in_b_ref, dec_in_w_ref, dec_in_b_ref,
     out_w_ref, out_b_ref) = refs[:9]
    n_e, n_d = len(ENC_KEYS), len(DEC_KEYS)
    enc_stack = dict(zip(ENC_KEYS, refs[9:9 + n_e]))
    dec_stack = dict(zip(DEC_KEYS, refs[9 + n_e:9 + n_e + n_d]))
    o_ref = refs[-1]

    # encoder: input projection + positional encoding (per-batch (S, Din) slab)
    x = jnp.dot(src_ref[0], enc_in_w_ref[...],
                preferred_element_type=jnp.float32) + enc_in_b_ref[...]
    x = x + pe_ref[...]                                               # (S, D) f32
    for l in range(n_enc):                                            # static unroll
        x = _enc_layer_body(x, {k: enc_stack[k][l] for k in ENC_KEYS}, n_heads, eps)
    mem = x                                                           # encoder memory (S, D)

    # decoder (no positional encoding on decoder input, matching the reference)
    y = jnp.dot(tgt_ref[0], dec_in_w_ref[...],
                preferred_element_type=jnp.float32) + dec_in_b_ref[...]
    for l in range(n_dec):                                            # static unroll
        y = _dec_layer_body(y, mem, {k: dec_stack[k][l] for k in DEC_KEYS},
                            n_heads, eps)

    # final linear mapping (tiny, f32)
    out = jnp.dot(y, out_w_ref[...],
                  preferred_element_type=jnp.float32) + out_b_ref[...]
    o_ref[0] = out.astype(o_ref.dtype)


# ------------------------------- model forward -------------------------------

def time_transformer_forward(params, src, tgt, n_heads):
    # src: (S, B, input_size), tgt: (T, B, num_pred) — seq-first, like PyTorch.
    S, B, _ = src.shape
    T = tgt.shape[0]
    P = params["out_w"].shape[1]
    n_enc = params["enc_stack"]["wqkv"].shape[0]
    n_dec = params["dec_stack"]["s_wqkv"].shape[0]

    # one transpose in / one out of batch-first internal layout (tiny glue)
    src_bf = jnp.transpose(src, (1, 0, 2))                 # (B, S, Din)
    tgt_bf = jnp.transpose(tgt, (1, 0, 2))                 # (B, T, P)

    simple = [params["pe"][:S],
              params["enc_in_w"], params["enc_in_b"],
              params["dec_in_w"], params["dec_in_b"],
              params["out_w"], params["out_b"]]
    enc_ws = [params["enc_stack"][k] for k in ENC_KEYS]
    dec_ws = [params["dec_stack"][k] for k in DEC_KEYS]

    in_specs = ([_batch_spec(src_bf.shape), _batch_spec(tgt_bf.shape)]
                + [_full_spec(a) for a in simple + enc_ws + dec_ws])

    out_bf = pl.pallas_call(
        functools.partial(_fused_kernel, n_enc=n_enc, n_dec=n_dec,
                          n_heads=n_heads, eps=LN_EPS),
        out_shape=jax.ShapeDtypeStruct((B, T, P), jnp.float32),
        grid=(B,),
        in_specs=in_specs,
        out_specs=pl.BlockSpec((1, T, P), lambda b: (b, 0, 0)),
        compiler_params=pltpu.CompilerParams(dimension_semantics=("parallel",)),
    )(src_bf, tgt_bf, *simple, *enc_ws, *dec_ws)

    return jnp.transpose(out_bf, (1, 0, 2))                # (T, B, P)


# --------------------------------- param init ---------------------------------

def init_params(key, input_size, num_pred, dim_val, ff_enc, ff_dec,
                n_enc_layers, n_dec_layers, n_heads, max_seq_len=5000):
    keys = iter(jax.random.split(key, 4096))
    scale = 1.0 / math.sqrt(dim_val // n_heads)   # folded into Q projection

    def lin(din, dout):
        bound = 1.0 / math.sqrt(din)
        w = jax.random.uniform(next(keys), (din, dout), jnp.float32, -bound, bound)
        b = jax.random.uniform(next(keys), (dout,), jnp.float32, -bound, bound)
        return w, b

    def fused_qkv(d):
        wq, bq = lin(d, d); wk, bk = lin(d, d); wv, bv = lin(d, d)
        wqkv = jnp.concatenate([wq * scale, wk, wv], axis=1).astype(MXU_DTYPE)
        bqkv = jnp.concatenate([bq * scale, bk, bv]).reshape(1, 3 * d)
        return wqkv, bqkv

    def ln(d):
        return jnp.ones((1, d), jnp.float32), jnp.zeros((1, d), jnp.float32)

    def enc_layer(d, ff):
        lyr = {}
        lyr["wqkv"], lyr["bqkv"] = fused_qkv(d)
        wo, bo = lin(d, d)
        lyr["wo"], lyr["bo"] = wo.astype(MXU_DTYPE), bo.reshape(1, d)
        lyr["ln1_g"], lyr["ln1_b"] = ln(d)
        w1, b1 = lin(d, ff); w2, b2 = lin(ff, d)
        lyr["ff_w1"], lyr["ff_b1"] = w1.astype(MXU_DTYPE), b1.reshape(1, ff)
        lyr["ff_w2"], lyr["ff_b2"] = w2.astype(MXU_DTYPE), b2.reshape(1, d)
        lyr["ln2_g"], lyr["ln2_b"] = ln(d)
        return lyr

    def dec_layer(d, ff):
        lyr = {}
        lyr["s_wqkv"], lyr["s_bqkv"] = fused_qkv(d)
        wo, bo = lin(d, d)
        lyr["s_wo"], lyr["s_bo"] = wo.astype(MXU_DTYPE), bo.reshape(1, d)
        lyr["ln1_g"], lyr["ln1_b"] = ln(d)
        wq, bq = lin(d, d)
        lyr["c_wq"] = (wq * scale).astype(MXU_DTYPE)
        lyr["c_bq"] = (bq * scale).reshape(1, d)
        wk, bk = lin(d, d); wv, bv = lin(d, d)
        lyr["c_wkv"] = jnp.concatenate([wk, wv], axis=1).astype(MXU_DTYPE)
        lyr["c_bkv"] = jnp.concatenate([bk, bv]).reshape(1, 2 * d)
        wo2, bo2 = lin(d, d)
        lyr["c_wo"], lyr["c_bo"] = wo2.astype(MXU_DTYPE), bo2.reshape(1, d)
        lyr["ln2_g"], lyr["ln2_b"] = ln(d)
        w1, b1 = lin(d, ff); w2, b2 = lin(ff, d)
        lyr["ff_w1"], lyr["ff_b1"] = w1.astype(MXU_DTYPE), b1.reshape(1, ff)
        lyr["ff_w2"], lyr["ff_b2"] = w2.astype(MXU_DTYPE), b2.reshape(1, d)
        lyr["ln3_g"], lyr["ln3_b"] = ln(d)
        return lyr

    params = {}
    w, b = lin(input_size, dim_val)
    params["enc_in_w"], params["enc_in_b"] = w, b.reshape(1, dim_val)
    w, b = lin(num_pred, dim_val)
    params["dec_in_w"], params["dec_in_b"] = w, b.reshape(1, dim_val)
    w, b = lin(dim_val, num_pred)
    params["out_w"], params["out_b"] = w, b.reshape(1, num_pred)

    enc_layers = [enc_layer(dim_val, ff_enc) for _ in range(n_enc_layers)]
    dec_layers = [dec_layer(dim_val, ff_dec) for _ in range(n_dec_layers)]
    # stack per-layer weights along a leading layer axis (one slab per key)
    params["enc_stack"] = {k: jnp.stack([l[k] for l in enc_layers]) for k in ENC_KEYS}
    params["dec_stack"] = {k: jnp.stack([l[k] for l in dec_layers]) for k in DEC_KEYS}

    # sinusoidal positional encoding, same formula as PositionalEncoder
    position = jnp.arange(max_seq_len, dtype=jnp.float32)[:, None]
    div_term = jnp.exp(jnp.arange(0, dim_val, 2, dtype=jnp.float32)
                       * (-math.log(10000.0) / dim_val))
    pe = jnp.zeros((max_seq_len, dim_val), jnp.float32)
    pe = pe.at[:, 0::2].set(jnp.sin(position * div_term))
    pe = pe.at[:, 1::2].set(jnp.cos(position * div_term))
    params["pe"] = pe
    return params


# ------------------------------------ main ------------------------------------

if __name__ == "__main__":
    INPUT_SIZE = 4
    NUM_PRED = 1
    DIM_VAL = 32
    N_HEADS = 4          # constructor default of 0 is unusable; pick 4
    FF = 64
    N_ENC = 2
    N_DEC = 2
    S = 8                # encoder sequence length
    T = 8                # dec_seq_len
    B = 2                # batch

    key = jax.random.PRNGKey(0)
    k_param, k_src, k_tgt = jax.random.split(key, 3)

    params = init_params(k_param, INPUT_SIZE, NUM_PRED, DIM_VAL, FF, FF,
                         N_ENC, N_DEC, N_HEADS, max_seq_len=128)

    src = jax.random.normal(k_src, (S, B, INPUT_SIZE), jnp.float32)
    tgt = jax.random.normal(k_tgt, (T, B, NUM_PRED), jnp.float32)

    fwd = jax.jit(functools.partial(time_transformer_forward, n_heads=N_HEADS))
    out = jax.block_until_ready(fwd(params, src, tgt))

    assert out.shape == (T, B, NUM_PRED), out.shape
    assert bool(jnp.all(jnp.isfinite(out)))
    print("KERNEL_OK")
</pallas_src>

<mosaic_0001>
module attributes {stable_mosaic.version = 11 : i64} {
  func.func @_fused_kernel(%arg0: i32, %arg1: memref<1x8x4xf32, #tpu.memory_space<vmem>>, %arg2: memref<1x8x1xf32, #tpu.memory_space<vmem>>, %arg3: memref<8x32xf32, #tpu.memory_space<vmem>>, %arg4: memref<4x32xf32, #tpu.memory_space<vmem>>, %arg5: memref<1x32xf32, #tpu.memory_space<vmem>>, %arg6: memref<1x32xf32, #tpu.memory_space<vmem>>, %arg7: memref<1x32xf32, #tpu.memory_space<vmem>>, %arg8: memref<32x1xf32, #tpu.memory_space<vmem>>, %arg9: memref<1x1xf32, #tpu.memory_space<vmem>>, %arg10: memref<2x32x96xbf16, #tpu.memory_space<vmem>>, %arg11: memref<2x1x96xf32, #tpu.memory_space<vmem>>, %arg12: memref<2x32x32xbf16, #tpu.memory_space<vmem>>, %arg13: memref<2x1x32xf32, #tpu.memory_space<vmem>>, %arg14: memref<2x1x32xf32, #tpu.memory_space<vmem>>, %arg15: memref<2x1x32xf32, #tpu.memory_space<vmem>>, %arg16: memref<2x32x64xbf16, #tpu.memory_space<vmem>>, %arg17: memref<2x1x64xf32, #tpu.memory_space<vmem>>, %arg18: memref<2x64x32xbf16, #tpu.memory_space<vmem>>, %arg19: memref<2x1x32xf32, #tpu.memory_space<vmem>>, %arg20: memref<2x1x32xf32, #tpu.memory_space<vmem>>, %arg21: memref<2x1x32xf32, #tpu.memory_space<vmem>>, %arg22: memref<2x32x96xbf16, #tpu.memory_space<vmem>>, %arg23: memref<2x1x96xf32, #tpu.memory_space<vmem>>, %arg24: memref<2x32x32xbf16, #tpu.memory_space<vmem>>, %arg25: memref<2x1x32xf32, #tpu.memory_space<vmem>>, %arg26: memref<2x1x32xf32, #tpu.memory_space<vmem>>, %arg27: memref<2x1x32xf32, #tpu.memory_space<vmem>>, %arg28: memref<2x32x32xbf16, #tpu.memory_space<vmem>>, %arg29: memref<2x1x32xf32, #tpu.memory_space<vmem>>, %arg30: memref<2x32x64xbf16, #tpu.memory_space<vmem>>, %arg31: memref<2x1x64xf32, #tpu.memory_space<vmem>>, %arg32: memref<2x32x32xbf16, #tpu.memory_space<vmem>>, %arg33: memref<2x1x32xf32, #tpu.memory_space<vmem>>, %arg34: memref<2x1x32xf32, #tpu.memory_space<vmem>>, %arg35: memref<2x1x32xf32, #tpu.memory_space<vmem>>, %arg36: memref<2x32x64xbf16, #tpu.memory_space<vmem>>, %arg37: memref<2x1x64xf32, #tpu.memory_space<vmem>>, %arg38: memref<2x64x32xbf16, #tpu.memory_space<vmem>>, %arg39: memref<2x1x32xf32, #tpu.memory_space<vmem>>, %arg40: memref<2x1x32xf32, #tpu.memory_space<vmem>>, %arg41: memref<2x1x32xf32, #tpu.memory_space<vmem>>, %arg42: memref<1x8x1xf32, #tpu.memory_space<vmem>>) attributes {dimension_semantics = [#tpu.dimension_semantics<parallel>], iteration_bounds = array<i64: 2>, scalar_prefetch = 0 : i64, scratch_operands = 0 : i64, tpu.core_type = #tpu.core_type<tc>, window_params = [{transform_indices = @transform_0, window_bounds = array<i64: 1, 8, 4>}, {transform_indices = @transform_1, window_bounds = array<i64: 1, 8, 1>}, {pipeline_mode = #tpu.pipeline_mode<synchronous>, transform_indices = @transform_2, window_bounds = array<i64: 8, 32>}, {pipeline_mode = #tpu.pipeline_mode<synchronous>, transform_indices = @transform_3, window_bounds = array<i64: 4, 32>}, {pipeline_mode = #tpu.pipeline_mode<synchronous>, transform_indices = @transform_4, window_bounds = array<i64: 1, 32>}, {pipeline_mode = #tpu.pipeline_mode<synchronous>, transform_indices = @transform_5, window_bounds = array<i64: 1, 32>}, {pipeline_mode = #tpu.pipeline_mode<synchronous>, transform_indices = @transform_6, window_bounds = array<i64: 1, 32>}, {pipeline_mode = #tpu.pipeline_mode<synchronous>, transform_indices = @transform_7, window_bounds = array<i64: 32, 1>}, {pipeline_mode = #tpu.pipeline_mode<synchronous>, transform_indices = @transform_8, window_bounds = array<i64: 1, 1>}, {pipeline_mode = #tpu.pipeline_mode<synchronous>, transform_indices = @transform_9, window_bounds = array<i64: 2, 32, 96>}, {pipeline_mode = #tpu.pipeline_mode<synchronous>, transform_indices = @transform_10, window_bounds = array<i64: 2, 1, 96>}, {pipeline_mode = #tpu.pipeline_mode<synchronous>, transform_indices = @transform_11, window_bounds = array<i64: 2, 32, 32>}, {pipeline_mode = #tpu.pipeline_mode<synchronous>, transform_indices = @transform_12, window_bounds = array<i64: 2, 1, 32>}, {pipeline_mode = #tpu.pipeline_mode<synchronous>, transform_indices = @transform_13, window_bounds = array<i64: 2, 1, 32>}, {pipeline_mode = #tpu.pipeline_mode<synchronous>, transform_indices = @transform_14, window_bounds = array<i64: 2, 1, 32>}, {pipeline_mode = #tpu.pipeline_mode<synchronous>, transform_indices = @transform_15, window_bounds = array<i64: 2, 32, 64>}, {pipeline_mode = #tpu.pipeline_mode<synchronous>, transform_indices = @transform_16, window_bounds = array<i64: 2, 1, 64>}, {pipeline_mode = #tpu.pipeline_mode<synchronous>, transform_indices = @transform_17, window_bounds = array<i64: 2, 64, 32>}, {pipeline_mode = #tpu.pipeline_mode<synchronous>, transform_indices = @transform_18, window_bounds = array<i64: 2, 1, 32>}, {pipeline_mode = #tpu.pipeline_mode<synchronous>, transform_indices = @transform_19, window_bounds = array<i64: 2, 1, 32>}, {pipeline_mode = #tpu.pipeline_mode<synchronous>, transform_indices = @transform_20, window_bounds = array<i64: 2, 1, 32>}, {pipeline_mode = #tpu.pipeline_mode<synchronous>, transform_indices = @transform_21, window_bounds = array<i64: 2, 32, 96>}, {pipeline_mode = #tpu.pipeline_mode<synchronous>, transform_indices = @transform_22, window_bounds = array<i64: 2, 1, 96>}, {pipeline_mode = #tpu.pipeline_mode<synchronous>, transform_indices = @transform_23, window_bounds = array<i64: 2, 32, 32>}, {pipeline_mode = #tpu.pipeline_mode<synchronous>, transform_indices = @transform_24, window_bounds = array<i64: 2, 1, 32>}, {pipeline_mode = #tpu.pipeline_mode<synchronous>, transform_indices = @transform_25, window_bounds = array<i64: 2, 1, 32>}, {pipeline_mode = #tpu.pipeline_mode<synchronous>, transform_indices = @transform_26, window_bounds = array<i64: 2, 1, 32>}, {pipeline_mode = #tpu.pipeline_mode<synchronous>, transform_indices = @transform_27, window_bounds = array<i64: 2, 32, 32>}, {pipeline_mode = #tpu.pipeline_mode<synchronous>, transform_indices = @transform_28, window_bounds = array<i64: 2, 1, 32>}, {pipeline_mode = #tpu.pipeline_mode<synchronous>, transform_indices = @transform_29, window_bounds = array<i64: 2, 32, 64>}, {pipeline_mode = #tpu.pipeline_mode<synchronous>, transform_indices = @transform_30, window_bounds = array<i64: 2, 1, 64>}, {pipeline_mode = #tpu.pipeline_mode<synchronous>, transform_indices = @transform_31, window_bounds = array<i64: 2, 32, 32>}, {pipeline_mode = #tpu.pipeline_mode<synchronous>, transform_indices = @transform_32, window_bounds = array<i64: 2, 1, 32>}, {pipeline_mode = #tpu.pipeline_mode<synchronous>, transform_indices = @transform_33, window_bounds = array<i64: 2, 1, 32>}, {pipeline_mode = #tpu.pipeline_mode<synchronous>, transform_indices = @transform_34, window_bounds = array<i64: 2, 1, 32>}, {pipeline_mode = #tpu.pipeline_mode<synchronous>, transform_indices = @transform_35, window_bounds = array<i64: 2, 32, 64>}, {pipeline_mode = #tpu.pipeline_mode<synchronous>, transform_indices = @transform_36, window_bounds = array<i64: 2, 1, 64>}, {pipeline_mode = #tpu.pipeline_mode<synchronous>, transform_indices = @transform_37, window_bounds = array<i64: 2, 64, 32>}, {pipeline_mode = #tpu.pipeline_mode<synchronous>, transform_indices = @transform_38, window_bounds = array<i64: 2, 1, 32>}, {pipeline_mode = #tpu.pipeline_mode<synchronous>, transform_indices = @transform_39, window_bounds = array<i64: 2, 1, 32>}, {pipeline_mode = #tpu.pipeline_mode<synchronous>, transform_indices = @transform_40, window_bounds = array<i64: 2, 1, 32>}, {transform_indices = @transform_41, window_bounds = array<i64: 1, 8, 1>}]} {
    %c0 = arith.constant 0 : index
    %c0_0 = arith.constant 0 : index
    %c0_1 = arith.constant 0 : index
    %0 = vector.load %arg1[%c0, %c0_0, %c0_1] : memref<1x8x4xf32, #tpu.memory_space<vmem>>, vector<1x8x4xf32>
    %1 = vector.shape_cast %0 : vector<1x8x4xf32> to vector<8x4xf32>
    %c0_2 = arith.constant 0 : index
    %c0_3 = arith.constant 0 : index
    %2 = vector.load %arg4[%c0_2, %c0_3] : memref<4x32xf32, #tpu.memory_space<vmem>>, vector<4x32xf32>
    %cst = arith.constant dense<0.000000e+00> : vector<8x32xf32>
    %3 = tpu.matmul %1, %2, %cst {dimension_numbers = #tpu.dot_dimension_numbers<[1], [0], [0], [1], [0, 0, 1, 1], [], []>} : vector<8x4xf32>, vector<4x32xf32>, vector<8x32xf32> -> vector<8x32xf32>
    %c0_4 = arith.constant 0 : index
    %c0_5 = arith.constant 0 : index
    %4 = vector.load %arg5[%c0_4, %c0_5] : memref<1x32xf32, #tpu.memory_space<vmem>>, vector<1x32xf32>
    %5 = vector.broadcast %4 : vector<1x32xf32> to vector<8x32xf32>
    %6 = arith.addf %3, %5 : vector<8x32xf32>
    %c0_6 = arith.constant 0 : index
    %c0_7 = arith.constant 0 : index
    %7 = vector.load %arg3[%c0_6, %c0_7] : memref<8x32xf32, #tpu.memory_space<vmem>>, vector<8x32xf32>
    %8 = arith.addf %6, %7 : vector<8x32xf32>
    %c0_8 = arith.constant 0 : index
    %c0_9 = arith.constant 0 : index
    %c0_10 = arith.constant 0 : index
    %9 = vector.load %arg10[%c0_8, %c0_9, %c0_10] : memref<2x32x96xbf16, #tpu.memory_space<vmem>>, vector<1x32x96xbf16>
    %10 = vector.shape_cast %9 : vector<1x32x96xbf16> to vector<32x96xbf16>
    %c0_11 = arith.constant 0 : index
    %c0_12 = arith.constant 0 : index
    %c0_13 = arith.constant 0 : index
    %11 = vector.load %arg11[%c0_11, %c0_12, %c0_13] : memref<2x1x96xf32, #tpu.memory_space<vmem>>, vector<1x1x96xf32>
    %12 = vector.shape_cast %11 : vector<1x1x96xf32> to vector<1x96xf32>
    %c0_14 = arith.constant 0 : index
    %c0_15 = arith.constant 0 : index
    %c0_16 = arith.constant 0 : index
    %13 = vector.load %arg12[%c0_14, %c0_15, %c0_16] : memref<2x32x32xbf16, #tpu.memory_space<vmem>>, vector<1x32x32xbf16>
    %14 = vector.shape_cast %13 : vector<1x32x32xbf16> to vector<32x32xbf16>
    %c0_17 = arith.constant 0 : index
    %c0_18 = arith.constant 0 : index
    %c0_19 = arith.constant 0 : index
    %15 = vector.load %arg13[%c0_17, %c0_18, %c0_19] : memref<2x1x32xf32, #tpu.memory_space<vmem>>, vector<1x1x32xf32>
    %16 = vector.shape_cast %15 : vector<1x1x32xf32> to vector<1x32xf32>
    %c0_20 = arith.constant 0 : index
    %c0_21 = arith.constant 0 : index
    %c0_22 = arith.constant 0 : index
    %17 = vector.load %arg14[%c0_20, %c0_21, %c0_22] : memref<2x1x32xf32, #tpu.memory_space<vmem>>, vector<1x1x32xf32>
    %18 = vector.shape_cast %17 : vector<1x1x32xf32> to vector<1x32xf32>
    %c0_23 = arith.constant 0 : index
    %c0_24 = arith.constant 0 : index
    %c0_25 = arith.constant 0 : index
    %19 = vector.load %arg15[%c0_23, %c0_24, %c0_25] : memref<2x1x32xf32, #tpu.memory_space<vmem>>, vector<1x1x32xf32>
    %20 = vector.shape_cast %19 : vector<1x1x32xf32> to vector<1x32xf32>
    %c0_26 = arith.constant 0 : index
    %c0_27 = arith.constant 0 : index
    %c0_28 = arith.constant 0 : index
    %21 = vector.load %arg16[%c0_26, %c0_27, %c0_28] : memref<2x32x64xbf16, #tpu.memory_space<vmem>>, vector<1x32x64xbf16>
    %22 = vector.shape_cast %21 : vector<1x32x64xbf16> to vector<32x64xbf16>
    %c0_29 = arith.constant 0 : index
    %c0_30 = arith.constant 0 : index
    %c0_31 = arith.constant 0 : index
    %23 = vector.load %arg17[%c0_29, %c0_30, %c0_31] : memref<2x1x64xf32, #tpu.memory_space<vmem>>, vector<1x1x64xf32>
    %24 = vector.shape_cast %23 : vector<1x1x64xf32> to vector<1x64xf32>
    %c0_32 = arith.constant 0 : index
    %c0_33 = arith.constant 0 : index
    %c0_34 = arith.constant 0 : index
    %25 = vector.load %arg18[%c0_32, %c0_33, %c0_34] : memref<2x64x32xbf16, #tpu.memory_space<vmem>>, vector<1x64x32xbf16>
    %26 = vector.shape_cast %25 : vector<1x64x32xbf16> to vector<64x32xbf16>
    %c0_35 = arith.constant 0 : index
    %c0_36 = arith.constant 0 : index
    %c0_37 = arith.constant 0 : index
    %27 = vector.load %arg19[%c0_35, %c0_36, %c0_37] : memref<2x1x32xf32, #tpu.memory_space<vmem>>, vector<1x1x32xf32>
    %28 = vector.shape_cast %27 : vector<1x1x32xf32> to vector<1x32xf32>
    %c0_38 = arith.constant 0 : index
    %c0_39 = arith.constant 0 : index
    %c0_40 = arith.constant 0 : index
    %29 = vector.load %arg20[%c0_38, %c0_39, %c0_40] : memref<2x1x32xf32, #tpu.memory_space<vmem>>, vector<1x1x32xf32>
    %30 = vector.shape_cast %29 : vector<1x1x32xf32> to vector<1x32xf32>
    %c0_41 = arith.constant 0 : index
    %c0_42 = arith.constant 0 : index
    %c0_43 = arith.constant 0 : index
    %31 = vector.load %arg21[%c0_41, %c0_42, %c0_43] : memref<2x1x32xf32, #tpu.memory_space<vmem>>, vector<1x1x32xf32>
    %32 = vector.shape_cast %31 : vector<1x1x32xf32> to vector<1x32xf32>
    %33 = arith.truncf %8 : vector<8x32xf32> to vector<8x32xbf16>
    %cst_44 = arith.constant dense<0.000000e+00> : vector<8x96xf32>
    %34 = tpu.matmul %33, %10, %cst_44 {dimension_numbers = #tpu.dot_dimension_numbers<[1], [0], [0], [1], [0, 0, 1, 1], [], []>} : vector<8x32xbf16>, vector<32x96xbf16>, vector<8x96xf32> -> vector<8x96xf32>
    %35 = vector.broadcast %12 : vector<1x96xf32> to vector<8x96xf32>
    %36 = arith.addf %34, %35 : vector<8x96xf32>
    %37 = vector.extract_strided_slice %36 {offsets = [0, 0], sizes = [8, 32], strides = [1, 1]} : vector<8x96xf32> to vector<8x32xf32>
    %38 = vector.extract_strided_slice %36 {offsets = [0, 32], sizes = [8, 32], strides = [1, 1]} : vector<8x96xf32> to vector<8x32xf32>
    %39 = vector.extract_strided_slice %36 {offsets = [0, 64], sizes = [8, 32], strides = [1, 1]} : vector<8x96xf32> to vector<8x32xf32>
    %40 = vector.extract_strided_slice %37 {offsets = [0, 0], sizes = [8, 8], strides = [1, 1]} : vector<8x32xf32> to vector<8x8xf32>
    %41 = arith.truncf %40 : vector<8x8xf32> to vector<8x8xbf16>
    %42 = vector.extract_strided_slice %38 {offsets = [0, 0], sizes = [8, 8], strides = [1, 1]} : vector<8x32xf32> to vector<8x8xf32>
    %43 = arith.truncf %42 : vector<8x8xf32> to vector<8x8xbf16>
    %44 = vector.extract_strided_slice %39 {offsets = [0, 0], sizes = [8, 8], strides = [1, 1]} : vector<8x32xf32> to vector<8x8xf32>
    %45 = arith.truncf %44 : vector<8x8xf32> to vector<8x8xbf16>
    %cst_45 = arith.constant dense<0.000000e+00> : vector<8x8xf32>
    %46 = tpu.matmul %41, %43, %cst_45 {dimension_numbers = #tpu.dot_dimension_numbers<[1], [1], [0], [0], [0, 0, 1, 0], [], []>} : vector<8x8xbf16>, vector<8x8xbf16>, vector<8x8xf32> -> vector<8x8xf32>
    %cst_46 = arith.constant dense<0xFF800000> : vector<8xf32>
    %47 = vector.multi_reduction <maximumf>, %46, %cst_46 [1] : vector<8x8xf32> to vector<8xf32>
    %48 = vector.shape_cast %47 : vector<8xf32> to vector<8x1xf32>
    %49 = vector.broadcast %48 : vector<8x1xf32> to vector<8x8xf32>
    %50 = arith.subf %46, %49 : vector<8x8xf32>
    %51 = math.exp %50 : vector<8x8xf32>
    %cst_47 = arith.constant dense<0.000000e+00> : vector<8xf32>
    %52 = vector.multi_reduction <add>, %51, %cst_47 [1] : vector<8x8xf32> to vector<8xf32>
    %53 = vector.shape_cast %52 : vector<8xf32> to vector<8x1xf32>
    %54 = arith.truncf %51 : vector<8x8xf32> to vector<8x8xbf16>
    %cst_48 = arith.constant dense<0.000000e+00> : vector<8x8xf32>
    %55 = tpu.matmul %54, %45, %cst_48 {dimension_numbers = #tpu.dot_dimension_numbers<[1], [0], [0], [1], [0, 0, 1, 1], [], []>} : vector<8x8xbf16>, vector<8x8xbf16>, vector<8x8xf32> -> vector<8x8xf32>
    %56 = tpu.reciprocal %53 {approx = true} : vector<8x1xf32> -> vector<8x1xf32>
    %57 = vector.broadcast %56 : vector<8x1xf32> to vector<8x8xf32>
    %58 = arith.mulf %55, %57 : vector<8x8xf32>
    %59 = vector.extract_strided_slice %37 {offsets = [0, 8], sizes = [8, 8], strides = [1, 1]} : vector<8x32xf32> to vector<8x8xf32>
    %60 = arith.truncf %59 : vector<8x8xf32> to vector<8x8xbf16>
    %61 = vector.extract_strided_slice %38 {offsets = [0, 8], sizes = [8, 8], strides = [1, 1]} : vector<8x32xf32> to vector<8x8xf32>
    %62 = arith.truncf %61 : vector<8x8xf32> to vector<8x8xbf16>
    %63 = vector.extract_strided_slice %39 {offsets = [0, 8], sizes = [8, 8], strides = [1, 1]} : vector<8x32xf32> to vector<8x8xf32>
    %64 = arith.truncf %63 : vector<8x8xf32> to vector<8x8xbf16>
    %cst_49 = arith.constant dense<0.000000e+00> : vector<8x8xf32>
    %65 = tpu.matmul %60, %62, %cst_49 {dimension_numbers = #tpu.dot_dimension_numbers<[1], [1], [0], [0], [0, 0, 1, 0], [], []>} : vector<8x8xbf16>, vector<8x8xbf16>, vector<8x8xf32> -> vector<8x8xf32>
    %cst_50 = arith.constant dense<0xFF800000> : vector<8xf32>
    %66 = vector.multi_reduction <maximumf>, %65, %cst_50 [1] : vector<8x8xf32> to vector<8xf32>
    %67 = vector.shape_cast %66 : vector<8xf32> to vector<8x1xf32>
    %68 = vector.broadcast %67 : vector<8x1xf32> to vector<8x8xf32>
    %69 = arith.subf %65, %68 : vector<8x8xf32>
    %70 = math.exp %69 : vector<8x8xf32>
    %cst_51 = arith.constant dense<0.000000e+00> : vector<8xf32>
    %71 = vector.multi_reduction <add>, %70, %cst_51 [1] : vector<8x8xf32> to vector<8xf32>
    %72 = vector.shape_cast %71 : vector<8xf32> to vector<8x1xf32>
    %73 = arith.truncf %70 : vector<8x8xf32> to vector<8x8xbf16>
    %cst_52 = arith.constant dense<0.000000e+00> : vector<8x8xf32>
    %74 = tpu.matmul %73, %64, %cst_52 {dimension_numbers = #tpu.dot_dimension_numbers<[1], [0], [0], [1], [0, 0, 1, 1], [], []>} : vector<8x8xbf16>, vector<8x8xbf16>, vector<8x8xf32> -> vector<8x8xf32>
    %75 = tpu.reciprocal %72 {approx = true} : vector<8x1xf32> -> vector<8x1xf32>
    %76 = vector.broadcast %75 : vector<8x1xf32> to vector<8x8xf32>
    %77 = arith.mulf %74, %76 : vector<8x8xf32>
    %78 = vector.extract_strided_slice %37 {offsets = [0, 16], sizes = [8, 8], strides = [1, 1]} : vector<8x32xf32> to vector<8x8xf32>
    %79 = arith.truncf %78 : vector<8x8xf32> to vector<8x8xbf16>
    %80 = vector.extract_strided_slice %38 {offsets = [0, 16], sizes = [8, 8], strides = [1, 1]} : vector<8x32xf32> to vector<8x8xf32>
    %81 = arith.truncf %80 : vector<8x8xf32> to vector<8x8xbf16>
    %82 = vector.extract_strided_slice %39 {offsets = [0, 16], sizes = [8, 8], strides = [1, 1]} : vector<8x32xf32> to vector<8x8xf32>
    %83 = arith.truncf %82 : vector<8x8xf32> to vector<8x8xbf16>
    %cst_53 = arith.constant dense<0.000000e+00> : vector<8x8xf32>
    %84 = tpu.matmul %79, %81, %cst_53 {dimension_numbers = #tpu.dot_dimension_numbers<[1], [1], [0], [0], [0, 0, 1, 0], [], []>} : vector<8x8xbf16>, vector<8x8xbf16>, vector<8x8xf32> -> vector<8x8xf32>
    %cst_54 = arith.constant dense<0xFF800000> : vector<8xf32>
    %85 = vector.multi_reduction <maximumf>, %84, %cst_54 [1] : vector<8x8xf32> to vector<8xf32>
    %86 = vector.shape_cast %85 : vector<8xf32> to vector<8x1xf32>
    %87 = vector.broadcast %86 : vector<8x1xf32> to vector<8x8xf32>
    %88 = arith.subf %84, %87 : vector<8x8xf32>
    %89 = math.exp %88 : vector<8x8xf32>
    %cst_55 = arith.constant dense<0.000000e+00> : vector<8xf32>
    %90 = vector.multi_reduction <add>, %89, %cst_55 [1] : vector<8x8xf32> to vector<8xf32>
    %91 = vector.shape_cast %90 : vector<8xf32> to vector<8x1xf32>
    %92 = arith.truncf %89 : vector<8x8xf32> to vector<8x8xbf16>
    %cst_56 = arith.constant dense<0.000000e+00> : vector<8x8xf32>
    %93 = tpu.matmul %92, %83, %cst_56 {dimension_numbers = #tpu.dot_dimension_numbers<[1], [0], [0], [1], [0, 0, 1, 1], [], []>} : vector<8x8xbf16>, vector<8x8xbf16>, vector<8x8xf32> -> vector<8x8xf32>
    %94 = tpu.reciprocal %91 {approx = true} : vector<8x1xf32> -> vector<8x1xf32>
    %95 = vector.broadcast %94 : vector<8x1xf32> to vector<8x8xf32>
    %96 = arith.mulf %93, %95 : vector<8x8xf32>
    %97 = vector.extract_strided_slice %37 {offsets = [0, 24], sizes = [8, 8], strides = [1, 1]} : vector<8x32xf32> to vector<8x8xf32>
    %98 = arith.truncf %97 : vector<8x8xf32> to vector<8x8xbf16>
    %99 = vector.extract_strided_slice %38 {offsets = [0, 24], sizes = [8, 8], strides = [1, 1]} : vector<8x32xf32> to vector<8x8xf32>
    %100 = arith.truncf %99 : vector<8x8xf32> to vector<8x8xbf16>
    %101 = vector.extract_strided_slice %39 {offsets = [0, 24], sizes = [8, 8], strides = [1, 1]} : vector<8x32xf32> to vector<8x8xf32>
    %102 = arith.truncf %101 : vector<8x8xf32> to vector<8x8xbf16>
    %cst_57 = arith.constant dense<0.000000e+00> : vector<8x8xf32>
    %103 = tpu.matmul %98, %100, %cst_57 {dimension_numbers = #tpu.dot_dimension_numbers<[1], [1], [0], [0], [0, 0, 1, 0], [], []>} : vector<8x8xbf16>, vector<8x8xbf16>, vector<8x8xf32> -> vector<8x8xf32>
    %cst_58 = arith.constant dense<0xFF800000> : vector<8xf32>
    %104 = vector.multi_reduction <maximumf>, %103, %cst_58 [1] : vector<8x8xf32> to vector<8xf32>
    %105 = vector.shape_cast %104 : vector<8xf32> to vector<8x1xf32>
    %106 = vector.broadcast %105 : vector<8x1xf32> to vector<8x8xf32>
    %107 = arith.subf %103, %106 : vector<8x8xf32>
    %108 = math.exp %107 : vector<8x8xf32>
    %cst_59 = arith.constant dense<0.000000e+00> : vector<8xf32>
    %109 = vector.multi_reduction <add>, %108, %cst_59 [1] : vector<8x8xf32> to vector<8xf32>
    %110 = vector.shape_cast %109 : vector<8xf32> to vector<8x1xf32>
    %111 = arith.truncf %108 : vector<8x8xf32> to vector<8x8xbf16>
    %cst_60 = arith.constant dense<0.000000e+00> : vector<8x8xf32>
    %112 = tpu.matmul %111, %102, %cst_60 {dimension_numbers = #tpu.dot_dimension_numbers<[1], [0], [0], [1], [0, 0, 1, 1], [], []>} : vector<8x8xbf16>, vector<8x8xbf16>, vector<8x8xf32> -> vector<8x8xf32>
    %113 = tpu.reciprocal %110 {approx = true} : vector<8x1xf32> -> vector<8x1xf32>
    %114 = vector.broadcast %113 : vector<8x1xf32> to vector<8x8xf32>
    %115 = arith.mulf %112, %114 : vector<8x8xf32>
    %116 = tpu.concatenate %58, %77, %96, %115 in 1 : vector<8x8xf32>, vector<8x8xf32>, vector<8x8xf32>, vector<8x8xf32> -> vector<8x32xf32>
    %117 = arith.truncf %116 : vector<8x32xf32> to vector<8x32xbf16>
    %cst_61 = arith.constant dense<0.000000e+00> : vector<8x32xf32>
    %118 = tpu.matmul %117, %14, %cst_61 {dimension_numbers = #tpu.dot_dimension_numbers<[1], [0], [0], [1], [0, 0, 1, 1], [], []>} : vector<8x32xbf16>, vector<32x32xbf16>, vector<8x32xf32> -> vector<8x32xf32>
    %119 = vector.broadcast %16 : vector<1x32xf32> to vector<8x32xf32>
    %120 = arith.addf %118, %119 : vector<8x32xf32>
    %121 = arith.addf %8, %120 : vector<8x32xf32>
    %cst_62 = arith.constant dense<0.000000e+00> : vector<8xf32>
    %122 = vector.multi_reduction <add>, %121, %cst_62 [1] : vector<8x32xf32> to vector<8xf32>
    %123 = vector.shape_cast %122 : vector<8xf32> to vector<8x1xf32>
    %cst_63 = arith.constant 3.200000e+01 : f32
    %124 = vector.broadcast %cst_63 : f32 to vector<8x1xf32>
    %125 = arith.divf %123, %124 : vector<8x1xf32>
    %126 = vector.broadcast %125 : vector<8x1xf32> to vector<8x32xf32>
    %127 = arith.subf %121, %126 : vector<8x32xf32>
    %128 = arith.mulf %127, %127 : vector<8x32xf32>
    %cst_64 = arith.constant dense<0.000000e+00> : vector<8xf32>
    %129 = vector.multi_reduction <add>, %128, %cst_64 [1] : vector<8x32xf32> to vector<8xf32>
    %130 = vector.shape_cast %129 : vector<8xf32> to vector<8x1xf32>
    %cst_65 = arith.constant 3.200000e+01 : f32
    %131 = vector.broadcast %cst_65 : f32 to vector<8x1xf32>
    %132 = arith.divf %130, %131 : vector<8x1xf32>
    %133 = vector.broadcast %125 : vector<8x1xf32> to vector<8x32xf32>
    %134 = arith.subf %121, %133 : vector<8x32xf32>
    %cst_66 = arith.constant 9.99999974E-6 : f32
    %135 = vector.broadcast %cst_66 : f32 to vector<8x1xf32>
    %136 = arith.addf %132, %135 : vector<8x1xf32>
    %137 = math.rsqrt %136 : vector<8x1xf32>
    %138 = vector.broadcast %137 : vector<8x1xf32> to vector<8x32xf32>
    %139 = arith.mulf %134, %138 : vector<8x32xf32>
    %140 = vector.broadcast %18 : vector<1x32xf32> to vector<8x32xf32>
    %141 = arith.mulf %139, %140 : vector<8x32xf32>
    %142 = vector.broadcast %20 : vector<1x32xf32> to vector<8x32xf32>
    %143 = arith.addf %141, %142 : vector<8x32xf32>
    %144 = arith.truncf %143 : vector<8x32xf32> to vector<8x32xbf16>
    %cst_67 = arith.constant dense<0.000000e+00> : vector<8x64xf32>
    %145 = tpu.matmul %144, %22, %cst_67 {dimension_numbers = #tpu.dot_dimension_numbers<[1], [0], [0], [1], [0, 0, 1, 1], [], []>} : vector<8x32xbf16>, vector<32x64xbf16>, vector<8x64xf32> -> vector<8x64xf32>
    %146 = vector.broadcast %24 : vector<1x64xf32> to vector<8x64xf32>
    %147 = arith.addf %145, %146 : vector<8x64xf32>
    %cst_68 = arith.constant 0.000000e+00 : f32
    %148 = vector.broadcast %cst_68 : f32 to vector<8x64xf32>
    %149 = arith.maximumf %147, %148 : vector<8x64xf32>
    %150 = arith.truncf %149 : vector<8x64xf32> to vector<8x64xbf16>
    %cst_69 = arith.constant dense<0.000000e+00> : vector<8x32xf32>
    %151 = tpu.matmul %150, %26, %cst_69 {dimension_numbers = #tpu.dot_dimension_numbers<[1], [0], [0], [1], [0, 0, 1, 1], [], []>} : vector<8x64xbf16>, vector<64x32xbf16>, vector<8x32xf32> -> vector<8x32xf32>
    %152 = vector.broadcast %28 : vector<1x32xf32> to vector<8x32xf32>
    %153 = arith.addf %151, %152 : vector<8x32xf32>
    %154 = arith.addf %143, %153 : vector<8x32xf32>
    %cst_70 = arith.constant dense<0.000000e+00> : vector<8xf32>
    %155 = vector.multi_reduction <add>, %154, %cst_70 [1] : vector<8x32xf32> to vector<8xf32>
    %156 = vector.shape_cast %155 : vector<8xf32> to vector<8x1xf32>
    %cst_71 = arith.constant 3.200000e+01 : f32
    %157 = vector.broadcast %cst_71 : f32 to vector<8x1xf32>
    %158 = arith.divf %156, %157 : vector<8x1xf32>
    %159 = vector.broadcast %158 : vector<8x1xf32> to vector<8x32xf32>
    %160 = arith.subf %154, %159 : vector<8x32xf32>
    %161 = arith.mulf %160, %160 : vector<8x32xf32>
    %cst_72 = arith.constant dense<0.000000e+00> : vector<8xf32>
    %162 = vector.multi_reduction <add>, %161, %cst_72 [1] : vector<8x32xf32> to vector<8xf32>
    %163 = vector.shape_cast %162 : vector<8xf32> to vector<8x1xf32>
    %cst_73 = arith.constant 3.200000e+01 : f32
    %164 = vector.broadcast %cst_73 : f32 to vector<8x1xf32>
    %165 = arith.divf %163, %164 : vector<8x1xf32>
    %166 = vector.broadcast %158 : vector<8x1xf32> to vector<8x32xf32>
    %167 = arith.subf %154, %166 : vector<8x32xf32>
    %cst_74 = arith.constant 9.99999974E-6 : f32
    %168 = vector.broadcast %cst_74 : f32 to vector<8x1xf32>
    %169 = arith.addf %165, %168 : vector<8x1xf32>
    %170 = math.rsqrt %169 : vector<8x1xf32>
    %171 = vector.broadcast %170 : vector<8x1xf32> to vector<8x32xf32>
    %172 = arith.mulf %167, %171 : vector<8x32xf32>
    %173 = vector.broadcast %30 : vector<1x32xf32> to vector<8x32xf32>
    %174 = arith.mulf %172, %173 : vector<8x32xf32>
    %175 = vector.broadcast %32 : vector<1x32xf32> to vector<8x32xf32>
    %176 = arith.addf %174, %175 : vector<8x32xf32>
    %c1 = arith.constant 1 : index
    %c0_75 = arith.constant 0 : index
    %c0_76 = arith.constant 0 : index
    %177 = vector.load %arg10[%c1, %c0_75, %c0_76] : memref<2x32x96xbf16, #tpu.memory_space<vmem>>, vector<1x32x96xbf16>
    %178 = vector.shape_cast %177 : vector<1x32x96xbf16> to vector<32x96xbf16>
    %c1_77 = arith.constant 1 : index
    %c0_78 = arith.constant 0 : index
    %c0_79 = arith.constant 0 : index
    %179 = vector.load %arg11[%c1_77, %c0_78, %c0_79] : memref<2x1x96xf32, #tpu.memory_space<vmem>>, vector<1x1x96xf32>
    %180 = vector.shape_cast %179 : vector<1x1x96xf32> to vector<1x96xf32>
    %c1_80 = arith.constant 1 : index
    %c0_81 = arith.constant 0 : index
    %c0_82 = arith.constant 0 : index
    %181 = vector.load %arg12[%c1_80, %c0_81, %c0_82] : memref<2x32x32xbf16, #tpu.memory_space<vmem>>, vector<1x32x32xbf16>
    %182 = vector.shape_cast %181 : vector<1x32x32xbf16> to vector<32x32xbf16>
    %c1_83 = arith.constant 1 : index
    %c0_84 = arith.constant 0 : index
    %c0_85 = arith.constant 0 : index
    %183 = vector.load %arg13[%c1_83, %c0_84, %c0_85] : memref<2x1x32xf32, #tpu.memory_space<vmem>>, vector<1x1x32xf32>
    %184 = vector.shape_cast %183 : vector<1x1x32xf32> to vector<1x32xf32>
    %c1_86 = arith.constant 1 : index
    %c0_87 = arith.constant 0 : index
    %c0_88 = arith.constant 0 : index
    %185 = vector.load %arg14[%c1_86, %c0_87, %c0_88] : memref<2x1x32xf32, #tpu.memory_space<vmem>>, vector<1x1x32xf32>
    %186 = vector.shape_cast %185 : vector<1x1x32xf32> to vector<1x32xf32>
    %c1_89 = arith.constant 1 : index
    %c0_90 = arith.constant 0 : index
    %c0_91 = arith.constant 0 : index
    %187 = vector.load %arg15[%c1_89, %c0_90, %c0_91] : memref<2x1x32xf32, #tpu.memory_space<vmem>>, vector<1x1x32xf32>
    %188 = vector.shape_cast %187 : vector<1x1x32xf32> to vector<1x32xf32>
    %c1_92 = arith.constant 1 : index
    %c0_93 = arith.constant 0 : index
    %c0_94 = arith.constant 0 : index
    %189 = vector.load %arg16[%c1_92, %c0_93, %c0_94] : memref<2x32x64xbf16, #tpu.memory_space<vmem>>, vector<1x32x64xbf16>
    %190 = vector.shape_cast %189 : vector<1x32x64xbf16> to vector<32x64xbf16>
    %c1_95 = arith.constant 1 : index
    %c0_96 = arith.constant 0 : index
    %c0_97 = arith.constant 0 : index
    %191 = vector.load %arg17[%c1_95, %c0_96, %c0_97] : memref<2x1x64xf32, #tpu.memory_space<vmem>>, vector<1x1x64xf32>
    %192 = vector.shape_cast %191 : vector<1x1x64xf32> to vector<1x64xf32>
    %c1_98 = arith.constant 1 : index
    %c0_99 = arith.constant 0 : index
    %c0_100 = arith.constant 0 : index
    %193 = vector.load %arg18[%c1_98, %c0_99, %c0_100] : memref<2x64x32xbf16, #tpu.memory_space<vmem>>, vector<1x64x32xbf16>
    %194 = vector.shape_cast %193 : vector<1x64x32xbf16> to vector<64x32xbf16>
    %c1_101 = arith.constant 1 : index
    %c0_102 = arith.constant 0 : index
    %c0_103 = arith.constant 0 : index
    %195 = vector.load %arg19[%c1_101, %c0_102, %c0_103] : memref<2x1x32xf32, #tpu.memory_space<vmem>>, vector<1x1x32xf32>
    %196 = vector.shape_cast %195 : vector<1x1x32xf32> to vector<1x32xf32>
    %c1_104 = arith.constant 1 : index
    %c0_105 = arith.constant 0 : index
    %c0_106 = arith.constant 0 : index
    %197 = vector.load %arg20[%c1_104, %c0_105, %c0_106] : memref<2x1x32xf32, #tpu.memory_space<vmem>>, vector<1x1x32xf32>
    %198 = vector.shape_cast %197 : vector<1x1x32xf32> to vector<1x32xf32>
    %c1_107 = arith.constant 1 : index
    %c0_108 = arith.constant 0 : index
    %c0_109 = arith.constant 0 : index
    %199 = vector.load %arg21[%c1_107, %c0_108, %c0_109] : memref<2x1x32xf32, #tpu.memory_space<vmem>>, vector<1x1x32xf32>
    %200 = vector.shape_cast %199 : vector<1x1x32xf32> to vector<1x32xf32>
    %201 = arith.truncf %176 : vector<8x32xf32> to vector<8x32xbf16>
    %cst_110 = arith.constant dense<0.000000e+00> : vector<8x96xf32>
    %202 = tpu.matmul %201, %178, %cst_110 {dimension_numbers = #tpu.dot_dimension_numbers<[1], [0], [0], [1], [0, 0, 1, 1], [], []>} : vector<8x32xbf16>, vector<32x96xbf16>, vector<8x96xf32> -> vector<8x96xf32>
    %203 = vector.broadcast %180 : vector<1x96xf32> to vector<8x96xf32>
    %204 = arith.addf %202, %203 : vector<8x96xf32>
    %205 = vector.extract_strided_slice %204 {offsets = [0, 0], sizes = [8, 32], strides = [1, 1]} : vector<8x96xf32> to vector<8x32xf32>
    %206 = vector.extract_strided_slice %204 {offsets = [0, 32], sizes = [8, 32], strides = [1, 1]} : vector<8x96xf32> to vector<8x32xf32>
    %207 = vector.extract_strided_slice %204 {offsets = [0, 64], sizes = [8, 32], strides = [1, 1]} : vector<8x96xf32> to vector<8x32xf32>
    %208 = vector.extract_strided_slice %205 {offsets = [0, 0], sizes = [8, 8], strides = [1, 1]} : vector<8x32xf32> to vector<8x8xf32>
    %209 = arith.truncf %208 : vector<8x8xf32> to vector<8x8xbf16>
    %210 = vector.extract_strided_slice %206 {offsets = [0, 0], sizes = [8, 8], strides = [1, 1]} : vector<8x32xf32> to vector<8x8xf32>
    %211 = arith.truncf %210 : vector<8x8xf32> to vector<8x8xbf16>
    %212 = vector.extract_strided_slice %207 {offsets = [0, 0], sizes = [8, 8], strides = [1, 1]} : vector<8x32xf32> to vector<8x8xf32>
    %213 = arith.truncf %212 : vector<8x8xf32> to vector<8x8xbf16>
    %cst_111 = arith.constant dense<0.000000e+00> : vector<8x8xf32>
    %214 = tpu.matmul %209, %211, %cst_111 {dimension_numbers = #tpu.dot_dimension_numbers<[1], [1], [0], [0], [0, 0, 1, 0], [], []>} : vector<8x8xbf16>, vector<8x8xbf16>, vector<8x8xf32> -> vector<8x8xf32>
    %cst_112 = arith.constant dense<0xFF800000> : vector<8xf32>
    %215 = vector.multi_reduction <maximumf>, %214, %cst_112 [1] : vector<8x8xf32> to vector<8xf32>
    %216 = vector.shape_cast %215 : vector<8xf32> to vector<8x1xf32>
    %217 = vector.broadcast %216 : vector<8x1xf32> to vector<8x8xf32>
    %218 = arith.subf %214, %217 : vector<8x8xf32>
    %219 = math.exp %218 : vector<8x8xf32>
    %cst_113 = arith.constant dense<0.000000e+00> : vector<8xf32>
    %220 = vector.multi_reduction <add>, %219, %cst_113 [1] : vector<8x8xf32> to vector<8xf32>
    %221 = vector.shape_cast %220 : vector<8xf32> to vector<8x1xf32>
    %222 = arith.truncf %219 : vector<8x8xf32> to vector<8x8xbf16>
    %cst_114 = arith.constant dense<0.000000e+00> : vector<8x8xf32>
    %223 = tpu.matmul %222, %213, %cst_114 {dimension_numbers = #tpu.dot_dimension_numbers<[1], [0], [0], [1], [0, 0, 1, 1], [], []>} : vector<8x8xbf16>, vector<8x8xbf16>, vector<8x8xf32> -> vector<8x8xf32>
    %224 = tpu.reciprocal %221 {approx = true} : vector<8x1xf32> -> vector<8x1xf32>
    %225 = vector.broadcast %224 : vector<8x1xf32> to vector<8x8xf32>
    %226 = arith.mulf %223, %225 : vector<8x8xf32>
    %227 = vector.extract_strided_slice %205 {offsets = [0, 8], sizes = [8, 8], strides = [1, 1]} : vector<8x32xf32> to vector<8x8xf32>
    %228 = arith.truncf %227 : vector<8x8xf32> to vector<8x8xbf16>
    %229 = vector.extract_strided_slice %206 {offsets = [0, 8], sizes = [8, 8], strides = [1, 1]} : vector<8x32xf32> to vector<8x8xf32>
    %230 = arith.truncf %229 : vector<8x8xf32> to vector<8x8xbf16>
    %231 = vector.extract_strided_slice %207 {offsets = [0, 8], sizes = [8, 8], strides = [1, 1]} : vector<8x32xf32> to vector<8x8xf32>
    %232 = arith.truncf %231 : vector<8x8xf32> to vector<8x8xbf16>
    %cst_115 = arith.constant dense<0.000000e+00> : vector<8x8xf32>
    %233 = tpu.matmul %228, %230, %cst_115 {dimension_numbers = #tpu.dot_dimension_numbers<[1], [1], [0], [0], [0, 0, 1, 0], [], []>} : vector<8x8xbf16>, vector<8x8xbf16>, vector<8x8xf32> -> vector<8x8xf32>
    %cst_116 = arith.constant dense<0xFF800000> : vector<8xf32>
    %234 = vector.multi_reduction <maximumf>, %233, %cst_116 [1] : vector<8x8xf32> to vector<8xf32>
    %235 = vector.shape_cast %234 : vector<8xf32> to vector<8x1xf32>
    %236 = vector.broadcast %235 : vector<8x1xf32> to vector<8x8xf32>
    %237 = arith.subf %233, %236 : vector<8x8xf32>
    %238 = math.exp %237 : vector<8x8xf32>
    %cst_117 = arith.constant dense<0.000000e+00> : vector<8xf32>
    %239 = vector.multi_reduction <add>, %238, %cst_117 [1] : vector<8x8xf32> to vector<8xf32>
    %240 = vector.shape_cast %239 : vector<8xf32> to vector<8x1xf32>
    %241 = arith.truncf %238 : vector<8x8xf32> to vector<8x8xbf16>
    %cst_118 = arith.constant dense<0.000000e+00> : vector<8x8xf32>
    %242 = tpu.matmul %241, %232, %cst_118 {dimension_numbers = #tpu.dot_dimension_numbers<[1], [0], [0], [1], [0, 0, 1, 1], [], []>} : vector<8x8xbf16>, vector<8x8xbf16>, vector<8x8xf32> -> vector<8x8xf32>
    %243 = tpu.reciprocal %240 {approx = true} : vector<8x1xf32> -> vector<8x1xf32>
    %244 = vector.broadcast %243 : vector<8x1xf32> to vector<8x8xf32>
    %245 = arith.mulf %242, %244 : vector<8x8xf32>
    %246 = vector.extract_strided_slice %205 {offsets = [0, 16], sizes = [8, 8], strides = [1, 1]} : vector<8x32xf32> to vector<8x8xf32>
    %247 = arith.truncf %246 : vector<8x8xf32> to vector<8x8xbf16>
    %248 = vector.extract_strided_slice %206 {offsets = [0, 16], sizes = [8, 8], strides = [1, 1]} : vector<8x32xf32> to vector<8x8xf32>
    %249 = arith.truncf %248 : vector<8x8xf32> to vector<8x8xbf16>
    %250 = vector.extract_strided_slice %207 {offsets = [0, 16], sizes = [8, 8], strides = [1, 1]} : vector<8x32xf32> to vector<8x8xf32>
    %251 = arith.truncf %250 : vector<8x8xf32> to vector<8x8xbf16>
    %cst_119 = arith.constant dense<0.000000e+00> : vector<8x8xf32>
    %252 = tpu.matmul %247, %249, %cst_119 {dimension_numbers = #tpu.dot_dimension_numbers<[1], [1], [0], [0], [0, 0, 1, 0], [], []>} : vector<8x8xbf16>, vector<8x8xbf16>, vector<8x8xf32> -> vector<8x8xf32>
    %cst_120 = arith.constant dense<0xFF800000> : vector<8xf32>
    %253 = vector.multi_reduction <maximumf>, %252, %cst_120 [1] : vector<8x8xf32> to vector<8xf32>
    %254 = vector.shape_cast %253 : vector<8xf32> to vector<8x1xf32>
    %255 = vector.broadcast %254 : vector<8x1xf32> to vector<8x8xf32>
    %256 = arith.subf %252, %255 : vector<8x8xf32>
    %257 = math.exp %256 : vector<8x8xf32>
    %cst_121 = arith.constant dense<0.000000e+00> : vector<8xf32>
    %258 = vector.multi_reduction <add>, %257, %cst_121 [1] : vector<8x8xf32> to vector<8xf32>
    %259 = vector.shape_cast %258 : vector<8xf32> to vector<8x1xf32>
    %260 = arith.truncf %257 : vector<8x8xf32> to vector<8x8xbf16>
    %cst_122 = arith.constant dense<0.000000e+00> : vector<8x8xf32>
    %261 = tpu.matmul %260, %251, %cst_122 {dimension_numbers = #tpu.dot_dimension_numbers<[1], [0], [0], [1], [0, 0, 1, 1], [], []>} : vector<8x8xbf16>, vector<8x8xbf16>, vector<8x8xf32> -> vector<8x8xf32>
    %262 = tpu.reciprocal %259 {approx = true} : vector<8x1xf32> -> vector<8x1xf32>
    %263 = vector.broadcast %262 : vector<8x1xf32> to vector<8x8xf32>
    %264 = arith.mulf %261, %263 : vector<8x8xf32>
    %265 = vector.extract_strided_slice %205 {offsets = [0, 24], sizes = [8, 8], strides = [1, 1]} : vector<8x32xf32> to vector<8x8xf32>
    %266 = arith.truncf %265 : vector<8x8xf32> to vector<8x8xbf16>
    %267 = vector.extract_strided_slice %206 {offsets = [0, 24], sizes = [8, 8], strides = [1, 1]} : vector<8x32xf32> to vector<8x8xf32>
    %268 = arith.truncf %267 : vector<8x8xf32> to vector<8x8xbf16>
    %269 = vector.extract_strided_slice %207 {offsets = [0, 24], sizes = [8, 8], strides = [1, 1]} : vector<8x32xf32> to vector<8x8xf32>
    %270 = arith.truncf %269 : vector<8x8xf32> to vector<8x8xbf16>
    %cst_123 = arith.constant dense<0.000000e+00> : vector<8x8xf32>
    %271 = tpu.matmul %266, %268, %cst_123 {dimension_numbers = #tpu.dot_dimension_numbers<[1], [1], [0], [0], [0, 0, 1, 0], [], []>} : vector<8x8xbf16>, vector<8x8xbf16>, vector<8x8xf32> -> vector<8x8xf32>
    %cst_124 = arith.constant dense<0xFF800000> : vector<8xf32>
    %272 = vector.multi_reduction <maximumf>, %271, %cst_124 [1] : vector<8x8xf32> to vector<8xf32>
    %273 = vector.shape_cast %272 : vector<8xf32> to vector<8x1xf32>
    %274 = vector.broadcast %273 : vector<8x1xf32> to vector<8x8xf32>
    %275 = arith.subf %271, %274 : vector<8x8xf32>
    %276 = math.exp %275 : vector<8x8xf32>
    %cst_125 = arith.constant dense<0.000000e+00> : vector<8xf32>
    %277 = vector.multi_reduction <add>, %276, %cst_125 [1] : vector<8x8xf32> to vector<8xf32>
    %278 = vector.shape_cast %277 : vector<8xf32> to vector<8x1xf32>
    %279 = arith.truncf %276 : vector<8x8xf32> to vector<8x8xbf16>
    %cst_126 = arith.constant dense<0.000000e+00> : vector<8x8xf32>
    %280 = tpu.matmul %279, %270, %cst_126 {dimension_numbers = #tpu.dot_dimension_numbers<[1], [0], [0], [1], [0, 0, 1, 1], [], []>} : vector<8x8xbf16>, vector<8x8xbf16>, vector<8x8xf32> -> vector<8x8xf32>
    %281 = tpu.reciprocal %278 {approx = true} : vector<8x1xf32> -> vector<8x1xf32>
    %282 = vector.broadcast %281 : vector<8x1xf32> to vector<8x8xf32>
    %283 = arith.mulf %280, %282 : vector<8x8xf32>
    %284 = tpu.concatenate %226, %245, %264, %283 in 1 : vector<8x8xf32>, vector<8x8xf32>, vector<8x8xf32>, vector<8x8xf32> -> vector<8x32xf32>
    %285 = arith.truncf %284 : vector<8x32xf32> to vector<8x32xbf16>
    %cst_127 = arith.constant dense<0.000000e+00> : vector<8x32xf32>
    %286 = tpu.matmul %285, %182, %cst_127 {dimension_numbers = #tpu.dot_dimension_numbers<[1], [0], [0], [1], [0, 0, 1, 1], [], []>} : vector<8x32xbf16>, vector<32x32xbf16>, vector<8x32xf32> -> vector<8x32xf32>
    %287 = vector.broadcast %184 : vector<1x32xf32> to vector<8x32xf32>
    %288 = arith.addf %286, %287 : vector<8x32xf32>
    %289 = arith.addf %176, %288 : vector<8x32xf32>
    %cst_128 = arith.constant dense<0.000000e+00> : vector<8xf32>
    %290 = vector.multi_reduction <add>, %289, %cst_128 [1] : vector<8x32xf32> to vector<8xf32>
    %291 = vector.shape_cast %290 : vector<8xf32> to vector<8x1xf32>
    %cst_129 = arith.constant 3.200000e+01 : f32
    %292 = vector.broadcast %cst_129 : f32 to vector<8x1xf32>
    %293 = arith.divf %291, %292 : vector<8x1xf32>
    %294 = vector.broadcast %293 : vector<8x1xf32> to vector<8x32xf32>
    %295 = arith.subf %289, %294 : vector<8x32xf32>
    %296 = arith.mulf %295, %295 : vector<8x32xf32>
    %cst_130 = arith.constant dense<0.000000e+00> : vector<8xf32>
    %297 = vector.multi_reduction <add>, %296, %cst_130 [1] : vector<8x32xf32> to vector<8xf32>
    %298 = vector.shape_cast %297 : vector<8xf32> to vector<8x1xf32>
    %cst_131 = arith.constant 3.200000e+01 : f32
    %299 = vector.broadcast %cst_131 : f32 to vector<8x1xf32>
    %300 = arith.divf %298, %299 : vector<8x1xf32>
    %301 = vector.broadcast %293 : vector<8x1xf32> to vector<8x32xf32>
    %302 = arith.subf %289, %301 : vector<8x32xf32>
    %cst_132 = arith.constant 9.99999974E-6 : f32
    %303 = vector.broadcast %cst_132 : f32 to vector<8x1xf32>
    %304 = arith.addf %300, %303 : vector<8x1xf32>
    %305 = math.rsqrt %304 : vector<8x1xf32>
    %306 = vector.broadcast %305 : vector<8x1xf32> to vector<8x32xf32>
    %307 = arith.mulf %302, %306 : vector<8x32xf32>
    %308 = vector.broadcast %186 : vector<1x32xf32> to vector<8x32xf32>
    %309 = arith.mulf %307, %308 : vector<8x32xf32>
    %310 = vector.broadcast %188 : vector<1x32xf32> to vector<8x32xf32>
    %311 = arith.addf %309, %310 : vector<8x32xf32>
    %312 = arith.truncf %311 : vector<8x32xf32> to vector<8x32xbf16>
    %cst_133 = arith.constant dense<0.000000e+00> : vector<8x64xf32>
    %313 = tpu.matmul %312, %190, %cst_133 {dimension_numbers = #tpu.dot_dimension_numbers<[1], [0], [0], [1], [0, 0, 1, 1], [], []>} : vector<8x32xbf16>, vector<32x64xbf16>, vector<8x64xf32> -> vector<8x64xf32>
    %314 = vector.broadcast %192 : vector<1x64xf32> to vector<8x64xf32>
    %315 = arith.addf %313, %314 : vector<8x64xf32>
    %cst_134 = arith.constant 0.000000e+00 : f32
    %316 = vector.broadcast %cst_134 : f32 to vector<8x64xf32>
    %317 = arith.maximumf %315, %316 : vector<8x64xf32>
    %318 = arith.truncf %317 : vector<8x64xf32> to vector<8x64xbf16>
    %cst_135 = arith.constant dense<0.000000e+00> : vector<8x32xf32>
    %319 = tpu.matmul %318, %194, %cst_135 {dimension_numbers = #tpu.dot_dimension_numbers<[1], [0], [0], [1], [0, 0, 1, 1], [], []>} : vector<8x64xbf16>, vector<64x32xbf16>, vector<8x32xf32> -> vector<8x32xf32>
    %320 = vector.broadcast %196 : vector<1x32xf32> to vector<8x32xf32>
    %321 = arith.addf %319, %320 : vector<8x32xf32>
    %322 = arith.addf %311, %321 : vector<8x32xf32>
    %cst_136 = arith.constant dense<0.000000e+00> : vector<8xf32>
    %323 = vector.multi_reduction <add>, %322, %cst_136 [1] : vector<8x32xf32> to vector<8xf32>
    %324 = vector.shape_cast %323 : vector<8xf32> to vector<8x1xf32>
    %cst_137 = arith.constant 3.200000e+01 : f32
    %325 = vector.broadcast %cst_137 : f32 to vector<8x1xf32>
    %326 = arith.divf %324, %325 : vector<8x1xf32>
    %327 = vector.broadcast %326 : vector<8x1xf32> to vector<8x32xf32>
    %328 = arith.subf %322, %327 : vector<8x32xf32>
    %329 = arith.mulf %328, %328 : vector<8x32xf32>
    %cst_138 = arith.constant dense<0.000000e+00> : vector<8xf32>
    %330 = vector.multi_reduction <add>, %329, %cst_138 [1] : vector<8x32xf32> to vector<8xf32>
    %331 = vector.shape_cast %330 : vector<8xf32> to vector<8x1xf32>
    %cst_139 = arith.constant 3.200000e+01 : f32
    %332 = vector.broadcast %cst_139 : f32 to vector<8x1xf32>
    %333 = arith.divf %331, %332 : vector<8x1xf32>
    %334 = vector.broadcast %326 : vector<8x1xf32> to vector<8x32xf32>
    %335 = arith.subf %322, %334 : vector<8x32xf32>
    %cst_140 = arith.constant 9.99999974E-6 : f32
    %336 = vector.broadcast %cst_140 : f32 to vector<8x1xf32>
    %337 = arith.addf %333, %336 : vector<8x1xf32>
    %338 = math.rsqrt %337 : vector<8x1xf32>
    %339 = vector.broadcast %338 : vector<8x1xf32> to vector<8x32xf32>
    %340 = arith.mulf %335, %339 : vector<8x32xf32>
    %341 = vector.broadcast %198 : vector<1x32xf32> to vector<8x32xf32>
    %342 = arith.mulf %340, %341 : vector<8x32xf32>
    %343 = vector.broadcast %200 : vector<1x32xf32> to vector<8x32xf32>
    %344 = arith.addf %342, %343 : vector<8x32xf32>
    %c0_141 = arith.constant 0 : index
    %c0_142 = arith.constant 0 : index
    %c0_143 = arith.constant 0 : index
    %345 = vector.load %arg2[%c0_141, %c0_142, %c0_143] : memref<1x8x1xf32, #tpu.memory_space<vmem>>, vector<1x8x1xf32>
    %346 = vector.shape_cast %345 : vector<1x8x1xf32> to vector<8x1xf32>
    %c0_144 = arith.constant 0 : index
    %c0_145 = arith.constant 0 : index
    %347 = vector.load %arg6[%c0_144, %c0_145] : memref<1x32xf32, #tpu.memory_space<vmem>>, vector<1x32xf32>
    %cst_146 = arith.constant dense<0.000000e+00> : vector<8x32xf32>
    %348 = tpu.matmul %346, %347, %cst_146 {dimension_numbers = #tpu.dot_dimension_numbers<[1], [0], [0], [1], [0, 0, 1, 1], [], []>} : vector<8x1xf32>, vector<1x32xf32>, vector<8x32xf32> -> vector<8x32xf32>
    %c0_147 = arith.constant 0 : index
    %c0_148 = arith.constant 0 : index
    %349 = vector.load %arg7[%c0_147, %c0_148] : memref<1x32xf32, #tpu.memory_space<vmem>>, vector<1x32xf32>
    %350 = vector.broadcast %349 : vector<1x32xf32> to vector<8x32xf32>
    %351 = arith.addf %348, %350 : vector<8x32xf32>
    %c0_149 = arith.constant 0 : index
    %c0_150 = arith.constant 0 : index
    %c0_151 = arith.constant 0 : index
    %352 = vector.load %arg22[%c0_149, %c0_150, %c0_151] : memref<2x32x96xbf16, #tpu.memory_space<vmem>>, vector<1x32x96xbf16>
    %353 = vector.shape_cast %352 : vector<1x32x96xbf16> to vector<32x96xbf16>
    %c0_152 = arith.constant 0 : index
    %c0_153 = arith.constant 0 : index
    %c0_154 = arith.constant 0 : index
    %354 = vector.load %arg23[%c0_152, %c0_153, %c0_154] : memref<2x1x96xf32, #tpu.memory_space<vmem>>, vector<1x1x96xf32>
    %355 = vector.shape_cast %354 : vector<1x1x96xf32> to vector<1x96xf32>
    %c0_155 = arith.constant 0 : index
    %c0_156 = arith.constant 0 : index
    %c0_157 = arith.constant 0 : index
    %356 = vector.load %arg24[%c0_155, %c0_156, %c0_157] : memref<2x32x32xbf16, #tpu.memory_space<vmem>>, vector<1x32x32xbf16>
    %357 = vector.shape_cast %356 : vector<1x32x32xbf16> to vector<32x32xbf16>
    %c0_158 = arith.constant 0 : index
    %c0_159 = arith.constant 0 : index
    %c0_160 = arith.constant 0 : index
    %358 = vector.load %arg25[%c0_158, %c0_159, %c0_160] : memref<2x1x32xf32, #tpu.memory_space<vmem>>, vector<1x1x32xf32>
    %359 = vector.shape_cast %358 : vector<1x1x32xf32> to vector<1x32xf32>
    %c0_161 = arith.constant 0 : index
    %c0_162 = arith.constant 0 : index
    %c0_163 = arith.constant 0 : index
    %360 = vector.load %arg26[%c0_161, %c0_162, %c0_163] : memref<2x1x32xf32, #tpu.memory_space<vmem>>, vector<1x1x32xf32>
    %361 = vector.shape_cast %360 : vector<1x1x32xf32> to vector<1x32xf32>
    %c0_164 = arith.constant 0 : index
    %c0_165 = arith.constant 0 : index
    %c0_166 = arith.constant 0 : index
    %362 = vector.load %arg27[%c0_164, %c0_165, %c0_166] : memref<2x1x32xf32, #tpu.memory_space<vmem>>, vector<1x1x32xf32>
    %363 = vector.shape_cast %362 : vector<1x1x32xf32> to vector<1x32xf32>
    %c0_167 = arith.constant 0 : index
    %c0_168 = arith.constant 0 : index
    %c0_169 = arith.constant 0 : index
    %364 = vector.load %arg28[%c0_167, %c0_168, %c0_169] : memref<2x32x32xbf16, #tpu.memory_space<vmem>>, vector<1x32x32xbf16>
    %365 = vector.shape_cast %364 : vector<1x32x32xbf16> to vector<32x32xbf16>
    %c0_170 = arith.constant 0 : index
    %c0_171 = arith.constant 0 : index
    %c0_172 = arith.constant 0 : index
    %366 = vector.load %arg29[%c0_170, %c0_171, %c0_172] : memref<2x1x32xf32, #tpu.memory_space<vmem>>, vector<1x1x32xf32>
    %367 = vector.shape_cast %366 : vector<1x1x32xf32> to vector<1x32xf32>
    %c0_173 = arith.constant 0 : index
    %c0_174 = arith.constant 0 : index
    %c0_175 = arith.constant 0 : index
    %368 = vector.load %arg30[%c0_173, %c0_174, %c0_175] : memref<2x32x64xbf16, #tpu.memory_space<vmem>>, vector<1x32x64xbf16>
    %369 = vector.shape_cast %368 : vector<1x32x64xbf16> to vector<32x64xbf16>
    %c0_176 = arith.constant 0 : index
    %c0_177 = arith.constant 0 : index
    %c0_178 = arith.constant 0 : index
    %370 = vector.load %arg31[%c0_176, %c0_177, %c0_178] : memref<2x1x64xf32, #tpu.memory_space<vmem>>, vector<1x1x64xf32>
    %371 = vector.shape_cast %370 : vector<1x1x64xf32> to vector<1x64xf32>
    %c0_179 = arith.constant 0 : index
    %c0_180 = arith.constant 0 : index
    %c0_181 = arith.constant 0 : index
    %372 = vector.load %arg32[%c0_179, %c0_180, %c0_181] : memref<2x32x32xbf16, #tpu.memory_space<vmem>>, vector<1x32x32xbf16>
    %373 = vector.shape_cast %372 : vector<1x32x32xbf16> to vector<32x32xbf16>
    %c0_182 = arith.constant 0 : index
    %c0_183 = arith.constant 0 : index
    %c0_184 = arith.constant 0 : index
    %374 = vector.load %arg33[%c0_182, %c0_183, %c0_184] : memref<2x1x32xf32, #tpu.memory_space<vmem>>, vector<1x1x32xf32>
    %375 = vector.shape_cast %374 : vector<1x1x32xf32> to vector<1x32xf32>
    %c0_185 = arith.constant 0 : index
    %c0_186 = arith.constant 0 : index
    %c0_187 = arith.constant 0 : index
    %376 = vector.load %arg34[%c0_185, %c0_186, %c0_187] : memref<2x1x32xf32, #tpu.memory_space<vmem>>, vector<1x1x32xf32>
    %377 = vector.shape_cast %376 : vector<1x1x32xf32> to vector<1x32xf32>
    %c0_188 = arith.constant 0 : index
    %c0_189 = arith.constant 0 : index
    %c0_190 = arith.constant 0 : index
    %378 = vector.load %arg35[%c0_188, %c0_189, %c0_190] : memref<2x1x32xf32, #tpu.memory_space<vmem>>, vector<1x1x32xf32>
    %379 = vector.shape_cast %378 : vector<1x1x32xf32> to vector<1x32xf32>
    %c0_191 = arith.constant 0 : index
    %c0_192 = arith.constant 0 : index
    %c0_193 = arith.constant 0 : index
    %380 = vector.load %arg36[%c0_191, %c0_192, %c0_193] : memref<2x32x64xbf16, #tpu.memory_space<vmem>>, vector<1x32x64xbf16>
    %381 = vector.shape_cast %380 : vector<1x32x64xbf16> to vector<32x64xbf16>
    %c0_194 = arith.constant 0 : index
    %c0_195 = arith.constant 0 : index
    %c0_196 = arith.constant 0 : index
    %382 = vector.load %arg37[%c0_194, %c0_195, %c0_196] : memref<2x1x64xf32, #tpu.memory_space<vmem>>, vector<1x1x64xf32>
    %383 = vector.shape_cast %382 : vector<1x1x64xf32> to vector<1x64xf32>
    %c0_197 = arith.constant 0 : index
    %c0_198 = arith.constant 0 : index
    %c0_199 = arith.constant 0 : index
    %384 = vector.load %arg38[%c0_197, %c0_198, %c0_199] : memref<2x64x32xbf16, #tpu.memory_space<vmem>>, vector<1x64x32xbf16>
    %385 = vector.shape_cast %384 : vector<1x64x32xbf16> to vector<64x32xbf16>
    %c0_200 = arith.constant 0 : index
    %c0_201 = arith.constant 0 : index
    %c0_202 = arith.constant 0 : index
    %386 = vector.load %arg39[%c0_200, %c0_201, %c0_202] : memref<2x1x32xf32, #tpu.memory_space<vmem>>, vector<1x1x32xf32>
    %387 = vector.shape_cast %386 : vector<1x1x32xf32> to vector<1x32xf32>
    %c0_203 = arith.constant 0 : index
    %c0_204 = arith.constant 0 : index
    %c0_205 = arith.constant 0 : index
    %388 = vector.load %arg40[%c0_203, %c0_204, %c0_205] : memref<2x1x32xf32, #tpu.memory_space<vmem>>, vector<1x1x32xf32>
    %389 = vector.shape_cast %388 : vector<1x1x32xf32> to vector<1x32xf32>
    %c0_206 = arith.constant 0 : index
    %c0_207 = arith.constant 0 : index
    %c0_208 = arith.constant 0 : index
    %390 = vector.load %arg41[%c0_206, %c0_207, %c0_208] : memref<2x1x32xf32, #tpu.memory_space<vmem>>, vector<1x1x32xf32>
    %391 = vector.shape_cast %390 : vector<1x1x32xf32> to vector<1x32xf32>
    %392 = arith.truncf %351 : vector<8x32xf32> to vector<8x32xbf16>
    %cst_209 = arith.constant dense<0.000000e+00> : vector<8x96xf32>
    %393 = tpu.matmul %392, %353, %cst_209 {dimension_numbers = #tpu.dot_dimension_numbers<[1], [0], [0], [1], [0, 0, 1, 1], [], []>} : vector<8x32xbf16>, vector<32x96xbf16>, vector<8x96xf32> -> vector<8x96xf32>
    %394 = vector.broadcast %355 : vector<1x96xf32> to vector<8x96xf32>
    %395 = arith.addf %393, %394 : vector<8x96xf32>
    %396 = vector.extract_strided_slice %395 {offsets = [0, 0], sizes = [8, 32], strides = [1, 1]} : vector<8x96xf32> to vector<8x32xf32>
    %397 = vector.extract_strided_slice %395 {offsets = [0, 32], sizes = [8, 32], strides = [1, 1]} : vector<8x96xf32> to vector<8x32xf32>
    %398 = vector.extract_strided_slice %395 {offsets = [0, 64], sizes = [8, 32], strides = [1, 1]} : vector<8x96xf32> to vector<8x32xf32>
    %399 = vector.extract_strided_slice %396 {offsets = [0, 0], sizes = [8, 8], strides = [1, 1]} : vector<8x32xf32> to vector<8x8xf32>
    %400 = arith.truncf %399 : vector<8x8xf32> to vector<8x8xbf16>
    %401 = vector.extract_strided_slice %397 {offsets = [0, 0], sizes = [8, 8], strides = [1, 1]} : vector<8x32xf32> to vector<8x8xf32>
    %402 = arith.truncf %401 : vector<8x8xf32> to vector<8x8xbf16>
    %403 = vector.extract_strided_slice %398 {offsets = [0, 0], sizes = [8, 8], strides = [1, 1]} : vector<8x32xf32> to vector<8x8xf32>
    %404 = arith.truncf %403 : vector<8x8xf32> to vector<8x8xbf16>
    %cst_210 = arith.constant dense<0.000000e+00> : vector<8x8xf32>
    %405 = tpu.matmul %400, %402, %cst_210 {dimension_numbers = #tpu.dot_dimension_numbers<[1], [1], [0], [0], [0, 0, 1, 0], [], []>} : vector<8x8xbf16>, vector<8x8xbf16>, vector<8x8xf32> -> vector<8x8xf32>
    %cst_211 = arith.constant dense<0xFF800000> : vector<8xf32>
    %406 = vector.multi_reduction <maximumf>, %405, %cst_211 [1] : vector<8x8xf32> to vector<8xf32>
    %407 = vector.shape_cast %406 : vector<8xf32> to vector<8x1xf32>
    %408 = vector.broadcast %407 : vector<8x1xf32> to vector<8x8xf32>
    %409 = arith.subf %405, %408 : vector<8x8xf32>
    %410 = math.exp %409 : vector<8x8xf32>
    %cst_212 = arith.constant dense<0.000000e+00> : vector<8xf32>
    %411 = vector.multi_reduction <add>, %410, %cst_212 [1] : vector<8x8xf32> to vector<8xf32>
    %412 = vector.shape_cast %411 : vector<8xf32> to vector<8x1xf32>
    %413 = arith.truncf %410 : vector<8x8xf32> to vector<8x8xbf16>
    %cst_213 = arith.constant dense<0.000000e+00> : vector<8x8xf32>
    %414 = tpu.matmul %413, %404, %cst_213 {dimension_numbers = #tpu.dot_dimension_numbers<[1], [0], [0], [1], [0, 0, 1, 1], [], []>} : vector<8x8xbf16>, vector<8x8xbf16>, vector<8x8xf32> -> vector<8x8xf32>
    %415 = tpu.reciprocal %412 {approx = true} : vector<8x1xf32> -> vector<8x1xf32>
    %416 = vector.broadcast %415 : vector<8x1xf32> to vector<8x8xf32>
    %417 = arith.mulf %414, %416 : vector<8x8xf32>
    %418 = vector.extract_strided_slice %396 {offsets = [0, 8], sizes = [8, 8], strides = [1, 1]} : vector<8x32xf32> to vector<8x8xf32>
    %419 = arith.truncf %418 : vector<8x8xf32> to vector<8x8xbf16>
    %420 = vector.extract_strided_slice %397 {offsets = [0, 8], sizes = [8, 8], strides = [1, 1]} : vector<8x32xf32> to vector<8x8xf32>
    %421 = arith.truncf %420 : vector<8x8xf32> to vector<8x8xbf16>
    %422 = vector.extract_strided_slice %398 {offsets = [0, 8], sizes = [8, 8], strides = [1, 1]} : vector<8x32xf32> to vector<8x8xf32>
    %423 = arith.truncf %422 : vector<8x8xf32> to vector<8x8xbf16>
    %cst_214 = arith.constant dense<0.000000e+00> : vector<8x8xf32>
    %424 = tpu.matmul %419, %421, %cst_214 {dimension_numbers = #tpu.dot_dimension_numbers<[1], [1], [0], [0], [0, 0, 1, 0], [], []>} : vector<8x8xbf16>, vector<8x8xbf16>, vector<8x8xf32> -> vector<8x8xf32>
    %cst_215 = arith.constant dense<0xFF800000> : vector<8xf32>
    %425 = vector.multi_reduction <maximumf>, %424, %cst_215 [1] : vector<8x8xf32> to vector<8xf32>
    %426 = vector.shape_cast %425 : vector<8xf32> to vector<8x1xf32>
    %427 = vector.broadcast %426 : vector<8x1xf32> to vector<8x8xf32>
    %428 = arith.subf %424, %427 : vector<8x8xf32>
    %429 = math.exp %428 : vector<8x8xf32>
    %cst_216 = arith.constant dense<0.000000e+00> : vector<8xf32>
    %430 = vector.multi_reduction <add>, %429, %cst_216 [1] : vector<8x8xf32> to vector<8xf32>
    %431 = vector.shape_cast %430 : vector<8xf32> to vector<8x1xf32>
    %432 = arith.truncf %429 : vector<8x8xf32> to vector<8x8xbf16>
    %cst_217 = arith.constant dense<0.000000e+00> : vector<8x8xf32>
    %433 = tpu.matmul %432, %423, %cst_217 {dimension_numbers = #tpu.dot_dimension_numbers<[1], [0], [0], [1], [0, 0, 1, 1], [], []>} : vector<8x8xbf16>, vector<8x8xbf16>, vector<8x8xf32> -> vector<8x8xf32>
    %434 = tpu.reciprocal %431 {approx = true} : vector<8x1xf32> -> vector<8x1xf32>
    %435 = vector.broadcast %434 : vector<8x1xf32> to vector<8x8xf32>
    %436 = arith.mulf %433, %435 : vector<8x8xf32>
    %437 = vector.extract_strided_slice %396 {offsets = [0, 16], sizes = [8, 8], strides = [1, 1]} : vector<8x32xf32> to vector<8x8xf32>
    %438 = arith.truncf %437 : vector<8x8xf32> to vector<8x8xbf16>
    %439 = vector.extract_strided_slice %397 {offsets = [0, 16], sizes = [8, 8], strides = [1, 1]} : vector<8x32xf32> to vector<8x8xf32>
    %440 = arith.truncf %439 : vector<8x8xf32> to vector<8x8xbf16>
    %441 = vector.extract_strided_slice %398 {offsets = [0, 16], sizes = [8, 8], strides = [1, 1]} : vector<8x32xf32> to vector<8x8xf32>
    %442 = arith.truncf %441 : vector<8x8xf32> to vector<8x8xbf16>
    %cst_218 = arith.constant dense<0.000000e+00> : vector<8x8xf32>
    %443 = tpu.matmul %438, %440, %cst_218 {dimension_numbers = #tpu.dot_dimension_numbers<[1], [1], [0], [0], [0, 0, 1, 0], [], []>} : vector<8x8xbf16>, vector<8x8xbf16>, vector<8x8xf32> -> vector<8x8xf32>
    %cst_219 = arith.constant dense<0xFF800000> : vector<8xf32>
    %444 = vector.multi_reduction <maximumf>, %443, %cst_219 [1] : vector<8x8xf32> to vector<8xf32>
    %445 = vector.shape_cast %444 : vector<8xf32> to vector<8x1xf32>
    %446 = vector.broadcast %445 : vector<8x1xf32> to vector<8x8xf32>
    %447 = arith.subf %443, %446 : vector<8x8xf32>
    %448 = math.exp %447 : vector<8x8xf32>
    %cst_220 = arith.constant dense<0.000000e+00> : vector<8xf32>
    %449 = vector.multi_reduction <add>, %448, %cst_220 [1] : vector<8x8xf32> to vector<8xf32>
    %450 = vector.shape_cast %449 : vector<8xf32> to vector<8x1xf32>
    %451 = arith.truncf %448 : vector<8x8xf32> to vector<8x8xbf16>
    %cst_221 = arith.constant dense<0.000000e+00> : vector<8x8xf32>
    %452 = tpu.matmul %451, %442, %cst_221 {dimension_numbers = #tpu.dot_dimension_numbers<[1], [0], [0], [1], [0, 0, 1, 1], [], []>} : vector<8x8xbf16>, vector<8x8xbf16>, vector<8x8xf32> -> vector<8x8xf32>
    %453 = tpu.reciprocal %450 {approx = true} : vector<8x1xf32> -> vector<8x1xf32>
    %454 = vector.broadcast %453 : vector<8x1xf32> to vector<8x8xf32>
    %455 = arith.mulf %452, %454 : vector<8x8xf32>
    %456 = vector.extract_strided_slice %396 {offsets = [0, 24], sizes = [8, 8], strides = [1, 1]} : vector<8x32xf32> to vector<8x8xf32>
    %457 = arith.truncf %456 : vector<8x8xf32> to vector<8x8xbf16>
    %458 = vector.extract_strided_slice %397 {offsets = [0, 24], sizes = [8, 8], strides = [1, 1]} : vector<8x32xf32> to vector<8x8xf32>
    %459 = arith.truncf %458 : vector<8x8xf32> to vector<8x8xbf16>
    %460 = vector.extract_strided_slice %398 {offsets = [0, 24], sizes = [8, 8], strides = [1, 1]} : vector<8x32xf32> to vector<8x8xf32>
    %461 = arith.truncf %460 : vector<8x8xf32> to vector<8x8xbf16>
    %cst_222 = arith.constant dense<0.000000e+00> : vector<8x8xf32>
    %462 = tpu.matmul %457, %459, %cst_222 {dimension_numbers = #tpu.dot_dimension_numbers<[1], [1], [0], [0], [0, 0, 1, 0], [], []>} : vector<8x8xbf16>, vector<8x8xbf16>, vector<8x8xf32> -> vector<8x8xf32>
    %cst_223 = arith.constant dense<0xFF800000> : vector<8xf32>
    %463 = vector.multi_reduction <maximumf>, %462, %cst_223 [1] : vector<8x8xf32> to vector<8xf32>
    %464 = vector.shape_cast %463 : vector<8xf32> to vector<8x1xf32>
    %465 = vector.broadcast %464 : vector<8x1xf32> to vector<8x8xf32>
    %466 = arith.subf %462, %465 : vector<8x8xf32>
    %467 = math.exp %466 : vector<8x8xf32>
    %cst_224 = arith.constant dense<0.000000e+00> : vector<8xf32>
    %468 = vector.multi_reduction <add>, %467, %cst_224 [1] : vector<8x8xf32> to vector<8xf32>
    %469 = vector.shape_cast %468 : vector<8xf32> to vector<8x1xf32>
    %470 = arith.truncf %467 : vector<8x8xf32> to vector<8x8xbf16>
    %cst_225 = arith.constant dense<0.000000e+00> : vector<8x8xf32>
    %471 = tpu.matmul %470, %461, %cst_225 {dimension_numbers = #tpu.dot_dimension_numbers<[1], [0], [0], [1], [0, 0, 1, 1], [], []>} : vector<8x8xbf16>, vector<8x8xbf16>, vector<8x8xf32> -> vector<8x8xf32>
    %472 = tpu.reciprocal %469 {approx = true} : vector<8x1xf32> -> vector<8x1xf32>
    %473 = vector.broadcast %472 : vector<8x1xf32> to vector<8x8xf32>
    %474 = arith.mulf %471, %473 : vector<8x8xf32>
    %475 = tpu.concatenate %417, %436, %455, %474 in 1 : vector<8x8xf32>, vector<8x8xf32>, vector<8x8xf32>, vector<8x8xf32> -> vector<8x32xf32>
    %476 = arith.truncf %475 : vector<8x32xf32> to vector<8x32xbf16>
    %cst_226 = arith.constant dense<0.000000e+00> : vector<8x32xf32>
    %477 = tpu.matmul %476, %357, %cst_226 {dimension_numbers = #tpu.dot_dimension_numbers<[1], [0], [0], [1], [0, 0, 1, 1], [], []>} : vector<8x32xbf16>, vector<32x32xbf16>, vector<8x32xf32> -> vector<8x32xf32>
    %478 = vector.broadcast %359 : vector<1x32xf32> to vector<8x32xf32>
    %479 = arith.addf %477, %478 : vector<8x32xf32>
    %480 = arith.addf %351, %479 : vector<8x32xf32>
    %cst_227 = arith.constant dense<0.000000e+00> : vector<8xf32>
    %481 = vector.multi_reduction <add>, %480, %cst_227 [1] : vector<8x32xf32> to vector<8xf32>
    %482 = vector.shape_cast %481 : vector<8xf32> to vector<8x1xf32>
    %cst_228 = arith.constant 3.200000e+01 : f32
    %483 = vector.broadcast %cst_228 : f32 to vector<8x1xf32>
    %484 = arith.divf %482, %483 : vector<8x1xf32>
    %485 = vector.broadcast %484 : vector<8x1xf32> to vector<8x32xf32>
    %486 = arith.subf %480, %485 : vector<8x32xf32>
    %487 = arith.mulf %486, %486 : vector<8x32xf32>
    %cst_229 = arith.constant dense<0.000000e+00> : vector<8xf32>
    %488 = vector.multi_reduction <add>, %487, %cst_229 [1] : vector<8x32xf32> to vector<8xf32>
    %489 = vector.shape_cast %488 : vector<8xf32> to vector<8x1xf32>
    %cst_230 = arith.constant 3.200000e+01 : f32
    %490 = vector.broadcast %cst_230 : f32 to vector<8x1xf32>
    %491 = arith.divf %489, %490 : vector<8x1xf32>
    %492 = vector.broadcast %484 : vector<8x1xf32> to vector<8x32xf32>
    %493 = arith.subf %480, %492 : vector<8x32xf32>
    %cst_231 = arith.constant 9.99999974E-6 : f32
    %494 = vector.broadcast %cst_231 : f32 to vector<8x1xf32>
    %495 = arith.addf %491, %494 : vector<8x1xf32>
    %496 = math.rsqrt %495 : vector<8x1xf32>
    %497 = vector.broadcast %496 : vector<8x1xf32> to vector<8x32xf32>
    %498 = arith.mulf %493, %497 : vector<8x32xf32>
    %499 = vector.broadcast %361 : vector<1x32xf32> to vector<8x32xf32>
    %500 = arith.mulf %498, %499 : vector<8x32xf32>
    %501 = vector.broadcast %363 : vector<1x32xf32> to vector<8x32xf32>
    %502 = arith.addf %500, %501 : vector<8x32xf32>
    %503 = arith.truncf %502 : vector<8x32xf32> to vector<8x32xbf16>
    %cst_232 = arith.constant dense<0.000000e+00> : vector<8x32xf32>
    %504 = tpu.matmul %503, %365, %cst_232 {dimension_numbers = #tpu.dot_dimension_numbers<[1], [0], [0], [1], [0, 0, 1, 1], [], []>} : vector<8x32xbf16>, vector<32x32xbf16>, vector<8x32xf32> -> vector<8x32xf32>
    %505 = vector.broadcast %367 : vector<1x32xf32> to vector<8x32xf32>
    %506 = arith.addf %504, %505 : vector<8x32xf32>
    %507 = arith.truncf %344 : vector<8x32xf32> to vector<8x32xbf16>
    %cst_233 = arith.constant dense<0.000000e+00> : vector<8x64xf32>
    %508 = tpu.matmul %507, %369, %cst_233 {dimension_numbers = #tpu.dot_dimension_numbers<[1], [0], [0], [1], [0, 0, 1, 1], [], []>} : vector<8x32xbf16>, vector<32x64xbf16>, vector<8x64xf32> -> vector<8x64xf32>
    %509 = vector.broadcast %371 : vector<1x64xf32> to vector<8x64xf32>
    %510 = arith.addf %508, %509 : vector<8x64xf32>
    %511 = vector.extract_strided_slice %510 {offsets = [0, 0], sizes = [8, 32], strides = [1, 1]} : vector<8x64xf32> to vector<8x32xf32>
    %512 = vector.extract_strided_slice %510 {offsets = [0, 32], sizes = [8, 32], strides = [1, 1]} : vector<8x64xf32> to vector<8x32xf32>
    %513 = vector.extract_strided_slice %506 {offsets = [0, 0], sizes = [8, 8], strides = [1, 1]} : vector<8x32xf32> to vector<8x8xf32>
    %514 = arith.truncf %513 : vector<8x8xf32> to vector<8x8xbf16>
    %515 = vector.extract_strided_slice %511 {offsets = [0, 0], sizes = [8, 8], strides = [1, 1]} : vector<8x32xf32> to vector<8x8xf32>
    %516 = arith.truncf %515 : vector<8x8xf32> to vector<8x8xbf16>
    %517 = vector.extract_strided_slice %512 {offsets = [0, 0], sizes = [8, 8], strides = [1, 1]} : vector<8x32xf32> to vector<8x8xf32>
    %518 = arith.truncf %517 : vector<8x8xf32> to vector<8x8xbf16>
    %cst_234 = arith.constant dense<0.000000e+00> : vector<8x8xf32>
    %519 = tpu.matmul %514, %516, %cst_234 {dimension_numbers = #tpu.dot_dimension_numbers<[1], [1], [0], [0], [0, 0, 1, 0], [], []>} : vector<8x8xbf16>, vector<8x8xbf16>, vector<8x8xf32> -> vector<8x8xf32>
    %cst_235 = arith.constant dense<0xFF800000> : vector<8xf32>
    %520 = vector.multi_reduction <maximumf>, %519, %cst_235 [1] : vector<8x8xf32> to vector<8xf32>
    %521 = vector.shape_cast %520 : vector<8xf32> to vector<8x1xf32>
    %522 = vector.broadcast %521 : vector<8x1xf32> to vector<8x8xf32>
    %523 = arith.subf %519, %522 : vector<8x8xf32>
    %524 = math.exp %523 : vector<8x8xf32>
    %cst_236 = arith.constant dense<0.000000e+00> : vector<8xf32>
    %525 = vector.multi_reduction <add>, %524, %cst_236 [1] : vector<8x8xf32> to vector<8xf32>
    %526 = vector.shape_cast %525 : vector<8xf32> to vector<8x1xf32>
    %527 = arith.truncf %524 : vector<8x8xf32> to vector<8x8xbf16>
    %cst_237 = arith.constant dense<0.000000e+00> : vector<8x8xf32>
    %528 = tpu.matmul %527, %518, %cst_237 {dimension_numbers = #tpu.dot_dimension_numbers<[1], [0], [0], [1], [0, 0, 1, 1], [], []>} : vector<8x8xbf16>, vector<8x8xbf16>, vector<8x8xf32> -> vector<8x8xf32>
    %529 = tpu.reciprocal %526 {approx = true} : vector<8x1xf32> -> vector<8x1xf32>
    %530 = vector.broadcast %529 : vector<8x1xf32> to vector<8x8xf32>
    %531 = arith.mulf %528, %530 : vector<8x8xf32>
    %532 = vector.extract_strided_slice %506 {offsets = [0, 8], sizes = [8, 8], strides = [1, 1]} : vector<8x32xf32> to vector<8x8xf32>
    %533 = arith.truncf %532 : vector<8x8xf32> to vector<8x8xbf16>
    %534 = vector.extract_strided_slice %511 {offsets = [0, 8], sizes = [8, 8], strides = [1, 1]} : vector<8x32xf32> to vector<8x8xf32>
    %535 = arith.truncf %534 : vector<8x8xf32> to vector<8x8xbf16>
    %536 = vector.extract_strided_slice %512 {offsets = [0, 8], sizes = [8, 8], strides = [1, 1]} : vector<8x32xf32> to vector<8x8xf32>
    %537 = arith.truncf %536 : vector<8x8xf32> to vector<8x8xbf16>
    %cst_238 = arith.constant dense<0.000000e+00> : vector<8x8xf32>
    %538 = tpu.matmul %533, %535, %cst_238 {dimension_numbers = #tpu.dot_dimension_numbers<[1], [1], [0], [0], [0, 0, 1, 0], [], []>} : vector<8x8xbf16>, vector<8x8xbf16>, vector<8x8xf32> -> vector<8x8xf32>
    %cst_239 = arith.constant dense<0xFF800000> : vector<8xf32>
    %539 = vector.multi_reduction <maximumf>, %538, %cst_239 [1] : vector<8x8xf32> to vector<8xf32>
    %540 = vector.shape_cast %539 : vector<8xf32> to vector<8x1xf32>
    %541 = vector.broadcast %540 : vector<8x1xf32> to vector<8x8xf32>
    %542 = arith.subf %538, %541 : vector<8x8xf32>
    %543 = math.exp %542 : vector<8x8xf32>
    %cst_240 = arith.constant dense<0.000000e+00> : vector<8xf32>
    %544 = vector.multi_reduction <add>, %543, %cst_240 [1] : vector<8x8xf32> to vector<8xf32>
    %545 = vector.shape_cast %544 : vector<8xf32> to vector<8x1xf32>
    %546 = arith.truncf %543 : vector<8x8xf32> to vector<8x8xbf16>
    %cst_241 = arith.constant dense<0.000000e+00> : vector<8x8xf32>
    %547 = tpu.matmul %546, %537, %cst_241 {dimension_numbers = #tpu.dot_dimension_numbers<[1], [0], [0], [1], [0, 0, 1, 1], [], []>} : vector<8x8xbf16>, vector<8x8xbf16>, vector<8x8xf32> -> vector<8x8xf32>
    %548 = tpu.reciprocal %545 {approx = true} : vector<8x1xf32> -> vector<8x1xf32>
    %549 = vector.broadcast %548 : vector<8x1xf32> to vector<8x8xf32>
    %550 = arith.mulf %547, %549 : vector<8x8xf32>
    %551 = vector.extract_strided_slice %506 {offsets = [0, 16], sizes = [8, 8], strides = [1, 1]} : vector<8x32xf32> to vector<8x8xf32>
    %552 = arith.truncf %551 : vector<8x8xf32> to vector<8x8xbf16>
    %553 = vector.extract_strided_slice %511 {offsets = [0, 16], sizes = [8, 8], strides = [1, 1]} : vector<8x32xf32> to vector<8x8xf32>
    %554 = arith.truncf %553 : vector<8x8xf32> to vector<8x8xbf16>
    %555 = vector.extract_strided_slice %512 {offsets = [0, 16], sizes = [8, 8], strides = [1, 1]} : vector<8x32xf32> to vector<8x8xf32>
    %556 = arith.truncf %555 : vector<8x8xf32> to vector<8x8xbf16>
    %cst_242 = arith.constant dense<0.000000e+00> : vector<8x8xf32>
    %557 = tpu.matmul %552, %554, %cst_242 {dimension_numbers = #tpu.dot_dimension_numbers<[1], [1], [0], [0], [0, 0, 1, 0], [], []>} : vector<8x8xbf16>, vector<8x8xbf16>, vector<8x8xf32> -> vector<8x8xf32>
    %cst_243 = arith.constant dense<0xFF800000> : vector<8xf32>
    %558 = vector.multi_reduction <maximumf>, %557, %cst_243 [1] : vector<8x8xf32> to vector<8xf32>
    %559 = vector.shape_cast %558 : vector<8xf32> to vector<8x1xf32>
    %560 = vector.broadcast %559 : vector<8x1xf32> to vector<8x8xf32>
    %561 = arith.subf %557, %560 : vector<8x8xf32>
    %562 = math.exp %561 : vector<8x8xf32>
    %cst_244 = arith.constant dense<0.000000e+00> : vector<8xf32>
    %563 = vector.multi_reduction <add>, %562, %cst_244 [1] : vector<8x8xf32> to vector<8xf32>
    %564 = vector.shape_cast %563 : vector<8xf32> to vector<8x1xf32>
    %565 = arith.truncf %562 : vector<8x8xf32> to vector<8x8xbf16>
    %cst_245 = arith.constant dense<0.000000e+00> : vector<8x8xf32>
    %566 = tpu.matmul %565, %556, %cst_245 {dimension_numbers = #tpu.dot_dimension_numbers<[1], [0], [0], [1], [0, 0, 1, 1], [], []>} : vector<8x8xbf16>, vector<8x8xbf16>, vector<8x8xf32> -> vector<8x8xf32>
    %567 = tpu.reciprocal %564 {approx = true} : vector<8x1xf32> -> vector<8x1xf32>
    %568 = vector.broadcast %567 : vector<8x1xf32> to vector<8x8xf32>
    %569 = arith.mulf %566, %568 : vector<8x8xf32>
    %570 = vector.extract_strided_slice %506 {offsets = [0, 24], sizes = [8, 8], strides = [1, 1]} : vector<8x32xf32> to vector<8x8xf32>
    %571 = arith.truncf %570 : vector<8x8xf32> to vector<8x8xbf16>
    %572 = vector.extract_strided_slice %511 {offsets = [0, 24], sizes = [8, 8], strides = [1, 1]} : vector<8x32xf32> to vector<8x8xf32>
    %573 = arith.truncf %572 : vector<8x8xf32> to vector<8x8xbf16>
    %574 = vector.extract_strided_slice %512 {offsets = [0, 24], sizes = [8, 8], strides = [1, 1]} : vector<8x32xf32> to vector<8x8xf32>
    %575 = arith.truncf %574 : vector<8x8xf32> to vector<8x8xbf16>
    %cst_246 = arith.constant dense<0.000000e+00> : vector<8x8xf32>
    %576 = tpu.matmul %571, %573, %cst_246 {dimension_numbers = #tpu.dot_dimension_numbers<[1], [1], [0], [0], [0, 0, 1, 0], [], []>} : vector<8x8xbf16>, vector<8x8xbf16>, vector<8x8xf32> -> vector<8x8xf32>
    %cst_247 = arith.constant dense<0xFF800000> : vector<8xf32>
    %577 = vector.multi_reduction <maximumf>, %576, %cst_247 [1] : vector<8x8xf32> to vector<8xf32>
    %578 = vector.shape_cast %577 : vector<8xf32> to vector<8x1xf32>
    %579 = vector.broadcast %578 : vector<8x1xf32> to vector<8x8xf32>
    %580 = arith.subf %576, %579 : vector<8x8xf32>
    %581 = math.exp %580 : vector<8x8xf32>
    %cst_248 = arith.constant dense<0.000000e+00> : vector<8xf32>
    %582 = vector.multi_reduction <add>, %581, %cst_248 [1] : vector<8x8xf32> to vector<8xf32>
    %583 = vector.shape_cast %582 : vector<8xf32> to vector<8x1xf32>
    %584 = arith.truncf %581 : vector<8x8xf32> to vector<8x8xbf16>
    %cst_249 = arith.constant dense<0.000000e+00> : vector<8x8xf32>
    %585 = tpu.matmul %584, %575, %cst_249 {dimension_numbers = #tpu.dot_dimension_numbers<[1], [0], [0], [1], [0, 0, 1, 1], [], []>} : vector<8x8xbf16>, vector<8x8xbf16>, vector<8x8xf32> -> vector<8x8xf32>
    %586 = tpu.reciprocal %583 {approx = true} : vector<8x1xf32> -> vector<8x1xf32>
    %587 = vector.broadcast %586 : vector<8x1xf32> to vector<8x8xf32>
    %588 = arith.mulf %585, %587 : vector<8x8xf32>
    %589 = tpu.concatenate %531, %550, %569, %588 in 1 : vector<8x8xf32>, vector<8x8xf32>, vector<8x8xf32>, vector<8x8xf32> -> vector<8x32xf32>
    %590 = arith.truncf %589 : vector<8x32xf32> to vector<8x32xbf16>
    %cst_250 = arith.constant dense<0.000000e+00> : vector<8x32xf32>
    %591 = tpu.matmul %590, %373, %cst_250 {dimension_numbers = #tpu.dot_dimension_numbers<[1], [0], [0], [1], [0, 0, 1, 1], [], []>} : vector<8x32xbf16>, vector<32x32xbf16>, vector<8x32xf32> -> vector<8x32xf32>
    %592 = vector.broadcast %375 : vector<1x32xf32> to vector<8x32xf32>
    %593 = arith.addf %591, %592 : vector<8x32xf32>
    %594 = arith.addf %502, %593 : vector<8x32xf32>
    %cst_251 = arith.constant dense<0.000000e+00> : vector<8xf32>
    %595 = vector.multi_reduction <add>, %594, %cst_251 [1] : vector<8x32xf32> to vector<8xf32>
    %596 = vector.shape_cast %595 : vector<8xf32> to vector<8x1xf32>
    %cst_252 = arith.constant 3.200000e+01 : f32
    %597 = vector.broadcast %cst_252 : f32 to vector<8x1xf32>
    %598 = arith.divf %596, %597 : vector<8x1xf32>
    %599 = vector.broadcast %598 : vector<8x1xf32> to vector<8x32xf32>
    %600 = arith.subf %594, %599 : vector<8x32xf32>
    %601 = arith.mulf %600, %600 : vector<8x32xf32>
    %cst_253 = arith.constant dense<0.000000e+00> : vector<8xf32>
    %602 = vector.multi_reduction <add>, %601, %cst_253 [1] : vector<8x32xf32> to vector<8xf32>
    %603 = vector.shape_cast %602 : vector<8xf32> to vector<8x1xf32>
    %cst_254 = arith.constant 3.200000e+01 : f32
    %604 = vector.broadcast %cst_254 : f32 to vector<8x1xf32>
    %605 = arith.divf %603, %604 : vector<8x1xf32>
    %606 = vector.broadcast %598 : vector<8x1xf32> to vector<8x32xf32>
    %607 = arith.subf %594, %606 : vector<8x32xf32>
    %cst_255 = arith.constant 9.99999974E-6 : f32
    %608 = vector.broadcast %cst_255 : f32 to vector<8x1xf32>
    %609 = arith.addf %605, %608 : vector<8x1xf32>
    %610 = math.rsqrt %609 : vector<8x1xf32>
    %611 = vector.broadcast %610 : vector<8x1xf32> to vector<8x32xf32>
    %612 = arith.mulf %607, %611 : vector<8x32xf32>
    %613 = vector.broadcast %377 : vector<1x32xf32> to vector<8x32xf32>
    %614 = arith.mulf %612, %613 : vector<8x32xf32>
    %615 = vector.broadcast %379 : vector<1x32xf32> to vector<8x32xf32>
    %616 = arith.addf %614, %615 : vector<8x32xf32>
    %617 = arith.truncf %616 : vector<8x32xf32> to vector<8x32xbf16>
    %cst_256 = arith.constant dense<0.000000e+00> : vector<8x64xf32>
    %618 = tpu.matmul %617, %381, %cst_256 {dimension_numbers = #tpu.dot_dimension_numbers<[1], [0], [0], [1], [0, 0, 1, 1], [], []>} : vector<8x32xbf16>, vector<32x64xbf16>, vector<8x64xf32> -> vector<8x64xf32>
    %619 = vector.broadcast %383 : vector<1x64xf32> to vector<8x64xf32>
    %620 = arith.addf %618, %619 : vector<8x64xf32>
    %cst_257 = arith.constant 0.000000e+00 : f32
    %621 = vector.broadcast %cst_257 : f32 to vector<8x64xf32>
    %622 = arith.maximumf %620, %621 : vector<8x64xf32>
    %623 = arith.truncf %622 : vector<8x64xf32> to vector<8x64xbf16>
    %cst_258 = arith.constant dense<0.000000e+00> : vector<8x32xf32>
    %624 = tpu.matmul %623, %385, %cst_258 {dimension_numbers = #tpu.dot_dimension_numbers<[1], [0], [0], [1], [0, 0, 1, 1], [], []>} : vector<8x64xbf16>, vector<64x32xbf16>, vector<8x32xf32> -> vector<8x32xf32>
    %625 = vector.broadcast %387 : vector<1x32xf32> to vector<8x32xf32>
    %626 = arith.addf %624, %625 : vector<8x32xf32>
    %627 = arith.addf %616, %626 : vector<8x32xf32>
    %cst_259 = arith.constant dense<0.000000e+00> : vector<8xf32>
    %628 = vector.multi_reduction <add>, %627, %cst_259 [1] : vector<8x32xf32> to vector<8xf32>
    %629 = vector.shape_cast %628 : vector<8xf32> to vector<8x1xf32>
    %cst_260 = arith.constant 3.200000e+01 : f32
    %630 = vector.broadcast %cst_260 : f32 to vector<8x1xf32>
    %631 = arith.divf %629, %630 : vector<8x1xf32>
    %632 = vector.broadcast %631 : vector<8x1xf32> to vector<8x32xf32>
    %633 = arith.subf %627, %632 : vector<8x32xf32>
    %634 = arith.mulf %633, %633 : vector<8x32xf32>
    %cst_261 = arith.constant dense<0.000000e+00> : vector<8xf32>
    %635 = vector.multi_reduction <add>, %634, %cst_261 [1] : vector<8x32xf32> to vector<8xf32>
    %636 = vector.shape_cast %635 : vector<8xf32> to vector<8x1xf32>
    %cst_262 = arith.constant 3.200000e+01 : f32
    %637 = vector.broadcast %cst_262 : f32 to vector<8x1xf32>
    %638 = arith.divf %636, %637 : vector<8x1xf32>
    %639 = vector.broadcast %631 : vector<8x1xf32> to vector<8x32xf32>
    %640 = arith.subf %627, %639 : vector<8x32xf32>
    %cst_263 = arith.constant 9.99999974E-6 : f32
    %641 = vector.broadcast %cst_263 : f32 to vector<8x1xf32>
    %642 = arith.addf %638, %641 : vector<8x1xf32>
    %643 = math.rsqrt %642 : vector<8x1xf32>
    %644 = vector.broadcast %643 : vector<8x1xf32> to vector<8x32xf32>
    %645 = arith.mulf %640, %644 : vector<8x32xf32>
    %646 = vector.broadcast %389 : vector<1x32xf32> to vector<8x32xf32>
    %647 = arith.mulf %645, %646 : vector<8x32xf32>
    %648 = vector.broadcast %391 : vector<1x32xf32> to vector<8x32xf32>
    %649 = arith.addf %647, %648 : vector<8x32xf32>
    %c1_264 = arith.constant 1 : index
    %c0_265 = arith.constant 0 : index
    %c0_266 = arith.constant 0 : index
    %650 = vector.load %arg22[%c1_264, %c0_265, %c0_266] : memref<2x32x96xbf16, #tpu.memory_space<vmem>>, vector<1x32x96xbf16>
    %651 = vector.shape_cast %650 : vector<1x32x96xbf16> to vector<32x96xbf16>
    %c1_267 = arith.constant 1 : index
    %c0_268 = arith.constant 0 : index
    %c0_269 = arith.constant 0 : index
    %652 = vector.load %arg23[%c1_267, %c0_268, %c0_269] : memref<2x1x96xf32, #tpu.memory_space<vmem>>, vector<1x1x96xf32>
    %653 = vector.shape_cast %652 : vector<1x1x96xf32> to vector<1x96xf32>
    %c1_270 = arith.constant 1 : index
    %c0_271 = arith.constant 0 : index
    %c0_272 = arith.constant 0 : index
    %654 = vector.load %arg24[%c1_270, %c0_271, %c0_272] : memref<2x32x32xbf16, #tpu.memory_space<vmem>>, vector<1x32x32xbf16>
    %655 = vector.shape_cast %654 : vector<1x32x32xbf16> to vector<32x32xbf16>
    %c1_273 = arith.constant 1 : index
    %c0_274 = arith.constant 0 : index
    %c0_275 = arith.constant 0 : index
    %656 = vector.load %arg25[%c1_273, %c0_274, %c0_275] : memref<2x1x32xf32, #tpu.memory_space<vmem>>, vector<1x1x32xf32>
    %657 = vector.shape_cast %656 : vector<1x1x32xf32> to vector<1x32xf32>
    %c1_276 = arith.constant 1 : index
    %c0_277 = arith.constant 0 : index
    %c0_278 = arith.constant 0 : index
    %658 = vector.load %arg26[%c1_276, %c0_277, %c0_278] : memref<2x1x32xf32, #tpu.memory_space<vmem>>, vector<1x1x32xf32>
    %659 = vector.shape_cast %658 : vector<1x1x32xf32> to vector<1x32xf32>
    %c1_279 = arith.constant 1 : index
    %c0_280 = arith.constant 0 : index
    %c0_281 = arith.constant 0 : index
    %660 = vector.load %arg27[%c1_279, %c0_280, %c0_281] : memref<2x1x32xf32, #tpu.memory_space<vmem>>, vector<1x1x32xf32>
    %661 = vector.shape_cast %660 : vector<1x1x32xf32> to vector<1x32xf32>
    %c1_282 = arith.constant 1 : index
    %c0_283 = arith.constant 0 : index
    %c0_284 = arith.constant 0 : index
    %662 = vector.load %arg28[%c1_282, %c0_283, %c0_284] : memref<2x32x32xbf16, #tpu.memory_space<vmem>>, vector<1x32x32xbf16>
    %663 = vector.shape_cast %662 : vector<1x32x32xbf16> to vector<32x32xbf16>
    %c1_285 = arith.constant 1 : index
    %c0_286 = arith.constant 0 : index
    %c0_287 = arith.constant 0 : index
    %664 = vector.load %arg29[%c1_285, %c0_286, %c0_287] : memref<2x1x32xf32, #tpu.memory_space<vmem>>, vector<1x1x32xf32>
    %665 = vector.shape_cast %664 : vector<1x1x32xf32> to vector<1x32xf32>
    %c1_288 = arith.constant 1 : index
    %c0_289 = arith.constant 0 : index
    %c0_290 = arith.constant 0 : index
    %666 = vector.load %arg30[%c1_288, %c0_289, %c0_290] : memref<2x32x64xbf16, #tpu.memory_space<vmem>>, vector<1x32x64xbf16>
    %667 = vector.shape_cast %666 : vector<1x32x64xbf16> to vector<32x64xbf16>
    %c1_291 = arith.constant 1 : index
    %c0_292 = arith.constant 0 : index
    %c0_293 = arith.constant 0 : index
    %668 = vector.load %arg31[%c1_291, %c0_292, %c0_293] : memref<2x1x64xf32, #tpu.memory_space<vmem>>, vector<1x1x64xf32>
    %669 = vector.shape_cast %668 : vector<1x1x64xf32> to vector<1x64xf32>
    %c1_294 = arith.constant 1 : index
    %c0_295 = arith.constant 0 : index
    %c0_296 = arith.constant 0 : index
    %670 = vector.load %arg32[%c1_294, %c0_295, %c0_296] : memref<2x32x32xbf16, #tpu.memory_space<vmem>>, vector<1x32x32xbf16>
    %671 = vector.shape_cast %670 : vector<1x32x32xbf16> to vector<32x32xbf16>
    %c1_297 = arith.constant 1 : index
    %c0_298 = arith.constant 0 : index
    %c0_299 = arith.constant 0 : index
    %672 = vector.load %arg33[%c1_297, %c0_298, %c0_299] : memref<2x1x32xf32, #tpu.memory_space<vmem>>, vector<1x1x32xf32>
    %673 = vector.shape_cast %672 : vector<1x1x32xf32> to vector<1x32xf32>
    %c1_300 = arith.constant 1 : index
    %c0_301 = arith.constant 0 : index
    %c0_302 = arith.constant 0 : index
    %674 = vector.load %arg34[%c1_300, %c0_301, %c0_302] : memref<2x1x32xf32, #tpu.memory_space<vmem>>, vector<1x1x32xf32>
    %675 = vector.shape_cast %674 : vector<1x1x32xf32> to vector<1x32xf32>
    %c1_303 = arith.constant 1 : index
    %c0_304 = arith.constant 0 : index
    %c0_305 = arith.constant 0 : index
    %676 = vector.load %arg35[%c1_303, %c0_304, %c0_305] : memref<2x1x32xf32, #tpu.memory_space<vmem>>, vector<1x1x32xf32>
    %677 = vector.shape_cast %676 : vector<1x1x32xf32> to vector<1x32xf32>
    %c1_306 = arith.constant 1 : index
    %c0_307 = arith.constant 0 : index
    %c0_308 = arith.constant 0 : index
    %678 = vector.load %arg36[%c1_306, %c0_307, %c0_308] : memref<2x32x64xbf16, #tpu.memory_space<vmem>>, vector<1x32x64xbf16>
    %679 = vector.shape_cast %678 : vector<1x32x64xbf16> to vector<32x64xbf16>
    %c1_309 = arith.constant 1 : index
    %c0_310 = arith.constant 0 : index
    %c0_311 = arith.constant 0 : index
    %680 = vector.load %arg37[%c1_309, %c0_310, %c0_311] : memref<2x1x64xf32, #tpu.memory_space<vmem>>, vector<1x1x64xf32>
    %681 = vector.shape_cast %680 : vector<1x1x64xf32> to vector<1x64xf32>
    %c1_312 = arith.constant 1 : index
    %c0_313 = arith.constant 0 : index
    %c0_314 = arith.constant 0 : index
    %682 = vector.load %arg38[%c1_312, %c0_313, %c0_314] : memref<2x64x32xbf16, #tpu.memory_space<vmem>>, vector<1x64x32xbf16>
    %683 = vector.shape_cast %682 : vector<1x64x32xbf16> to vector<64x32xbf16>
    %c1_315 = arith.constant 1 : index
    %c0_316 = arith.constant 0 : index
    %c0_317 = arith.constant 0 : index
    %684 = vector.load %arg39[%c1_315, %c0_316, %c0_317] : memref<2x1x32xf32, #tpu.memory_space<vmem>>, vector<1x1x32xf32>
    %685 = vector.shape_cast %684 : vector<1x1x32xf32> to vector<1x32xf32>
    %c1_318 = arith.constant 1 : index
    %c0_319 = arith.constant 0 : index
    %c0_320 = arith.constant 0 : index
    %686 = vector.load %arg40[%c1_318, %c0_319, %c0_320] : memref<2x1x32xf32, #tpu.memory_space<vmem>>, vector<1x1x32xf32>
    %687 = vector.shape_cast %686 : vector<1x1x32xf32> to vector<1x32xf32>
    %c1_321 = arith.constant 1 : index
    %c0_322 = arith.constant 0 : index
    %c0_323 = arith.constant 0 : index
    %688 = vector.load %arg41[%c1_321, %c0_322, %c0_323] : memref<2x1x32xf32, #tpu.memory_space<vmem>>, vector<1x1x32xf32>
    %689 = vector.shape_cast %688 : vector<1x1x32xf32> to vector<1x32xf32>
    %690 = arith.truncf %649 : vector<8x32xf32> to vector<8x32xbf16>
    %cst_324 = arith.constant dense<0.000000e+00> : vector<8x96xf32>
    %691 = tpu.matmul %690, %651, %cst_324 {dimension_numbers = #tpu.dot_dimension_numbers<[1], [0], [0], [1], [0, 0, 1, 1], [], []>} : vector<8x32xbf16>, vector<32x96xbf16>, vector<8x96xf32> -> vector<8x96xf32>
    %692 = vector.broadcast %653 : vector<1x96xf32> to vector<8x96xf32>
    %693 = arith.addf %691, %692 : vector<8x96xf32>
    %694 = vector.extract_strided_slice %693 {offsets = [0, 0], sizes = [8, 32], strides = [1, 1]} : vector<8x96xf32> to vector<8x32xf32>
    %695 = vector.extract_strided_slice %693 {offsets = [0, 32], sizes = [8, 32], strides = [1, 1]} : vector<8x96xf32> to vector<8x32xf32>
    %696 = vector.extract_strided_slice %693 {offsets = [0, 64], sizes = [8, 32], strides = [1, 1]} : vector<8x96xf32> to vector<8x32xf32>
    %697 = vector.extract_strided_slice %694 {offsets = [0, 0], sizes = [8, 8], strides = [1, 1]} : vector<8x32xf32> to vector<8x8xf32>
    %698 = arith.truncf %697 : vector<8x8xf32> to vector<8x8xbf16>
    %699 = vector.extract_strided_slice %695 {offsets = [0, 0], sizes = [8, 8], strides = [1, 1]} : vector<8x32xf32> to vector<8x8xf32>
    %700 = arith.truncf %699 : vector<8x8xf32> to vector<8x8xbf16>
    %701 = vector.extract_strided_slice %696 {offsets = [0, 0], sizes = [8, 8], strides = [1, 1]} : vector<8x32xf32> to vector<8x8xf32>
    %702 = arith.truncf %701 : vector<8x8xf32> to vector<8x8xbf16>
    %cst_325 = arith.constant dense<0.000000e+00> : vector<8x8xf32>
    %703 = tpu.matmul %698, %700, %cst_325 {dimension_numbers = #tpu.dot_dimension_numbers<[1], [1], [0], [0], [0, 0, 1, 0], [], []>} : vector<8x8xbf16>, vector<8x8xbf16>, vector<8x8xf32> -> vector<8x8xf32>
    %cst_326 = arith.constant dense<0xFF800000> : vector<8xf32>
    %704 = vector.multi_reduction <maximumf>, %703, %cst_326 [1] : vector<8x8xf32> to vector<8xf32>
    %705 = vector.shape_cast %704 : vector<8xf32> to vector<8x1xf32>
    %706 = vector.broadcast %705 : vector<8x1xf32> to vector<8x8xf32>
    %707 = arith.subf %703, %706 : vector<8x8xf32>
    %708 = math.exp %707 : vector<8x8xf32>
    %cst_327 = arith.constant dense<0.000000e+00> : vector<8xf32>
    %709 = vector.multi_reduction <add>, %708, %cst_327 [1] : vector<8x8xf32> to vector<8xf32>
    %710 = vector.shape_cast %709 : vector<8xf32> to vector<8x1xf32>
    %711 = arith.truncf %708 : vector<8x8xf32> to vector<8x8xbf16>
    %cst_328 = arith.constant dense<0.000000e+00> : vector<8x8xf32>
    %712 = tpu.matmul %711, %702, %cst_328 {dimension_numbers = #tpu.dot_dimension_numbers<[1], [0], [0], [1], [0, 0, 1, 1], [], []>} : vector<8x8xbf16>, vector<8x8xbf16>, vector<8x8xf32> -> vector<8x8xf32>
    %713 = tpu.reciprocal %710 {approx = true} : vector<8x1xf32> -> vector<8x1xf32>
    %714 = vector.broadcast %713 : vector<8x1xf32> to vector<8x8xf32>
    %715 = arith.mulf %712, %714 : vector<8x8xf32>
    %716 = vector.extract_strided_slice %694 {offsets = [0, 8], sizes = [8, 8], strides = [1, 1]} : vector<8x32xf32> to vector<8x8xf32>
    %717 = arith.truncf %716 : vector<8x8xf32> to vector<8x8xbf16>
    %718 = vector.extract_strided_slice %695 {offsets = [0, 8], sizes = [8, 8], strides = [1, 1]} : vector<8x32xf32> to vector<8x8xf32>
    %719 = arith.truncf %718 : vector<8x8xf32> to vector<8x8xbf16>
    %720 = vector.extract_strided_slice %696 {offsets = [0, 8], sizes = [8, 8], strides = [1, 1]} : vector<8x32xf32> to vector<8x8xf32>
    %721 = arith.truncf %720 : vector<8x8xf32> to vector<8x8xbf16>
    %cst_329 = arith.constant dense<0.000000e+00> : vector<8x8xf32>
    %722 = tpu.matmul %717, %719, %cst_329 {dimension_numbers = #tpu.dot_dimension_numbers<[1], [1], [0], [0], [0, 0, 1, 0], [], []>} : vector<8x8xbf16>, vector<8x8xbf16>, vector<8x8xf32> -> vector<8x8xf32>
    %cst_330 = arith.constant dense<0xFF800000> : vector<8xf32>
    %723 = vector.multi_reduction <maximumf>, %722, %cst_330 [1] : vector<8x8xf32> to vector<8xf32>
    %724 = vector.shape_cast %723 : vector<8xf32> to vector<8x1xf32>
    %725 = vector.broadcast %724 : vector<8x1xf32> to vector<8x8xf32>
    %726 = arith.subf %722, %725 : vector<8x8xf32>
    %727 = math.exp %726 : vector<8x8xf32>
    %cst_331 = arith.constant dense<0.000000e+00> : vector<8xf32>
    %728 = vector.multi_reduction <add>, %727, %cst_331 [1] : vector<8x8xf32> to vector<8xf32>
    %729 = vector.shape_cast %728 : vector<8xf32> to vector<8x1xf32>
    %730 = arith.truncf %727 : vector<8x8xf32> to vector<8x8xbf16>
    %cst_332 = arith.constant dense<0.000000e+00> : vector<8x8xf32>
    %731 = tpu.matmul %730, %721, %cst_332 {dimension_numbers = #tpu.dot_dimension_numbers<[1], [0], [0], [1], [0, 0, 1, 1], [], []>} : vector<8x8xbf16>, vector<8x8xbf16>, vector<8x8xf32> -> vector<8x8xf32>
    %732 = tpu.reciprocal %729 {approx = true} : vector<8x1xf32> -> vector<8x1xf32>
    %733 = vector.broadcast %732 : vector<8x1xf32> to vector<8x8xf32>
    %734 = arith.mulf %731, %733 : vector<8x8xf32>
    %735 = vector.extract_strided_slice %694 {offsets = [0, 16], sizes = [8, 8], strides = [1, 1]} : vector<8x32xf32> to vector<8x8xf32>
    %736 = arith.truncf %735 : vector<8x8xf32> to vector<8x8xbf16>
    %737 = vector.extract_strided_slice %695 {offsets = [0, 16], sizes = [8, 8], strides = [1, 1]} : vector<8x32xf32> to vector<8x8xf32>
    %738 = arith.truncf %737 : vector<8x8xf32> to vector<8x8xbf16>
    %739 = vector.extract_strided_slice %696 {offsets = [0, 16], sizes = [8, 8], strides = [1, 1]} : vector<8x32xf32> to vector<8x8xf32>
    %740 = arith.truncf %739 : vector<8x8xf32> to vector<8x8xbf16>
    %cst_333 = arith.constant dense<0.000000e+00> : vector<8x8xf32>
    %741 = tpu.matmul %736, %738, %cst_333 {dimension_numbers = #tpu.dot_dimension_numbers<[1], [1], [0], [0], [0, 0, 1, 0], [], []>} : vector<8x8xbf16>, vector<8x8xbf16>, vector<8x8xf32> -> vector<8x8xf32>
    %cst_334 = arith.constant dense<0xFF800000> : vector<8xf32>
    %742 = vector.multi_reduction <maximumf>, %741, %cst_334 [1] : vector<8x8xf32> to vector<8xf32>
    %743 = vector.shape_cast %742 : vector<8xf32> to vector<8x1xf32>
    %744 = vector.broadcast %743 : vector<8x1xf32> to vector<8x8xf32>
    %745 = arith.subf %741, %744 : vector<8x8xf32>
    %746 = math.exp %745 : vector<8x8xf32>
    %cst_335 = arith.constant dense<0.000000e+00> : vector<8xf32>
    %747 = vector.multi_reduction <add>, %746, %cst_335 [1] : vector<8x8xf32> to vector<8xf32>
    %748 = vector.shape_cast %747 : vector<8xf32> to vector<8x1xf32>
    %749 = arith.truncf %746 : vector<8x8xf32> to vector<8x8xbf16>
    %cst_336 = arith.constant dense<0.000000e+00> : vector<8x8xf32>
    %750 = tpu.matmul %749, %740, %cst_336 {dimension_numbers = #tpu.dot_dimension_numbers<[1], [0], [0], [1], [0, 0, 1, 1], [], []>} : vector<8x8xbf16>, vector<8x8xbf16>, vector<8x8xf32> -> vector<8x8xf32>
    %751 = tpu.reciprocal %748 {approx = true} : vector<8x1xf32> -> vector<8x1xf32>
    %752 = vector.broadcast %751 : vector<8x1xf32> to vector<8x8xf32>
    %753 = arith.mulf %750, %752 : vector<8x8xf32>
    %754 = vector.extract_strided_slice %694 {offsets = [0, 24], sizes = [8, 8], strides = [1, 1]} : vector<8x32xf32> to vector<8x8xf32>
    %755 = arith.truncf %754 : vector<8x8xf32> to vector<8x8xbf16>
    %756 = vector.extract_strided_slice %695 {offsets = [0, 24], sizes = [8, 8], strides = [1, 1]} : vector<8x32xf32> to vector<8x8xf32>
    %757 = arith.truncf %756 : vector<8x8xf32> to vector<8x8xbf16>
    %758 = vector.extract_strided_slice %696 {offsets = [0, 24], sizes = [8, 8], strides = [1, 1]} : vector<8x32xf32> to vector<8x8xf32>
    %759 = arith.truncf %758 : vector<8x8xf32> to vector<8x8xbf16>
    %cst_337 = arith.constant dense<0.000000e+00> : vector<8x8xf32>
    %760 = tpu.matmul %755, %757, %cst_337 {dimension_numbers = #tpu.dot_dimension_numbers<[1], [1], [0], [0], [0, 0, 1, 0], [], []>} : vector<8x8xbf16>, vector<8x8xbf16>, vector<8x8xf32> -> vector<8x8xf32>
    %cst_338 = arith.constant dense<0xFF800000> : vector<8xf32>
    %761 = vector.multi_reduction <maximumf>, %760, %cst_338 [1] : vector<8x8xf32> to vector<8xf32>
    %762 = vector.shape_cast %761 : vector<8xf32> to vector<8x1xf32>
    %763 = vector.broadcast %762 : vector<8x1xf32> to vector<8x8xf32>
    %764 = arith.subf %760, %763 : vector<8x8xf32>
    %765 = math.exp %764 : vector<8x8xf32>
    %cst_339 = arith.constant dense<0.000000e+00> : vector<8xf32>
    %766 = vector.multi_reduction <add>, %765, %cst_339 [1] : vector<8x8xf32> to vector<8xf32>
    %767 = vector.shape_cast %766 : vector<8xf32> to vector<8x1xf32>
    %768 = arith.truncf %765 : vector<8x8xf32> to vector<8x8xbf16>
    %cst_340 = arith.constant dense<0.000000e+00> : vector<8x8xf32>
    %769 = tpu.matmul %768, %759, %cst_340 {dimension_numbers = #tpu.dot_dimension_numbers<[1], [0], [0], [1], [0, 0, 1, 1], [], []>} : vector<8x8xbf16>, vector<8x8xbf16>, vector<8x8xf32> -> vector<8x8xf32>
    %770 = tpu.reciprocal %767 {approx = true} : vector<8x1xf32> -> vector<8x1xf32>
    %771 = vector.broadcast %770 : vector<8x1xf32> to vector<8x8xf32>
    %772 = arith.mulf %769, %771 : vector<8x8xf32>
    %773 = tpu.concatenate %715, %734, %753, %772 in 1 : vector<8x8xf32>, vector<8x8xf32>, vector<8x8xf32>, vector<8x8xf32> -> vector<8x32xf32>
    %774 = arith.truncf %773 : vector<8x32xf32> to vector<8x32xbf16>
    %cst_341 = arith.constant dense<0.000000e+00> : vector<8x32xf32>
    %775 = tpu.matmul %774, %655, %cst_341 {dimension_numbers = #tpu.dot_dimension_numbers<[1], [0], [0], [1], [0, 0, 1, 1], [], []>} : vector<8x32xbf16>, vector<32x32xbf16>, vector<8x32xf32> -> vector<8x32xf32>
    %776 = vector.broadcast %657 : vector<1x32xf32> to vector<8x32xf32>
    %777 = arith.addf %775, %776 : vector<8x32xf32>
    %778 = arith.addf %649, %777 : vector<8x32xf32>
    %cst_342 = arith.constant dense<0.000000e+00> : vector<8xf32>
    %779 = vector.multi_reduction <add>, %778, %cst_342 [1] : vector<8x32xf32> to vector<8xf32>
    %780 = vector.shape_cast %779 : vector<8xf32> to vector<8x1xf32>
    %cst_343 = arith.constant 3.200000e+01 : f32
    %781 = vector.broadcast %cst_343 : f32 to vector<8x1xf32>
    %782 = arith.divf %780, %781 : vector<8x1xf32>
    %783 = vector.broadcast %782 : vector<8x1xf32> to vector<8x32xf32>
    %784 = arith.subf %778, %783 : vector<8x32xf32>
    %785 = arith.mulf %784, %784 : vector<8x32xf32>
    %cst_344 = arith.constant dense<0.000000e+00> : vector<8xf32>
    %786 = vector.multi_reduction <add>, %785, %cst_344 [1] : vector<8x32xf32> to vector<8xf32>
    %787 = vector.shape_cast %786 : vector<8xf32> to vector<8x1xf32>
    %cst_345 = arith.constant 3.200000e+01 : f32
    %788 = vector.broadcast %cst_345 : f32 to vector<8x1xf32>
    %789 = arith.divf %787, %788 : vector<8x1xf32>
    %790 = vector.broadcast %782 : vector<8x1xf32> to vector<8x32xf32>
    %791 = arith.subf %778, %790 : vector<8x32xf32>
    %cst_346 = arith.constant 9.99999974E-6 : f32
    %792 = vector.broadcast %cst_346 : f32 to vector<8x1xf32>
    %793 = arith.addf %789, %792 : vector<8x1xf32>
    %794 = math.rsqrt %793 : vector<8x1xf32>
    %795 = vector.broadcast %794 : vector<8x1xf32> to vector<8x32xf32>
    %796 = arith.mulf %791, %795 : vector<8x32xf32>
    %797 = vector.broadcast %659 : vector<1x32xf32> to vector<8x32xf32>
    %798 = arith.mulf %796, %797 : vector<8x32xf32>
    %799 = vector.broadcast %661 : vector<1x32xf32> to vector<8x32xf32>
    %800 = arith.addf %798, %799 : vector<8x32xf32>
    %801 = arith.truncf %800 : vector<8x32xf32> to vector<8x32xbf16>
    %cst_347 = arith.constant dense<0.000000e+00> : vector<8x32xf32>
    %802 = tpu.matmul %801, %663, %cst_347 {dimension_numbers = #tpu.dot_dimension_numbers<[1], [0], [0], [1], [0, 0, 1, 1], [], []>} : vector<8x32xbf16>, vector<32x32xbf16>, vector<8x32xf32> -> vector<8x32xf32>
    %803 = vector.broadcast %665 : vector<1x32xf32> to vector<8x32xf32>
    %804 = arith.addf %802, %803 : vector<8x32xf32>
    %805 = arith.truncf %344 : vector<8x32xf32> to vector<8x32xbf16>
    %cst_348 = arith.constant dense<0.000000e+00> : vector<8x64xf32>
    %806 = tpu.matmul %805, %667, %cst_348 {dimension_numbers = #tpu.dot_dimension_numbers<[1], [0], [0], [1], [0, 0, 1, 1], [], []>} : vector<8x32xbf16>, vector<32x64xbf16>, vector<8x64xf32> -> vector<8x64xf32>
    %807 = vector.broadcast %669 : vector<1x64xf32> to vector<8x64xf32>
    %808 = arith.addf %806, %807 : vector<8x64xf32>
    %809 = vector.extract_strided_slice %808 {offsets = [0, 0], sizes = [8, 32], strides = [1, 1]} : vector<8x64xf32> to vector<8x32xf32>
    %810 = vector.extract_strided_slice %808 {offsets = [0, 32], sizes = [8, 32], strides = [1, 1]} : vector<8x64xf32> to vector<8x32xf32>
    %811 = vector.extract_strided_slice %804 {offsets = [0, 0], sizes = [8, 8], strides = [1, 1]} : vector<8x32xf32> to vector<8x8xf32>
    %812 = arith.truncf %811 : vector<8x8xf32> to vector<8x8xbf16>
    %813 = vector.extract_strided_slice %809 {offsets = [0, 0], sizes = [8, 8], strides = [1, 1]} : vector<8x32xf32> to vector<8x8xf32>
    %814 = arith.truncf %813 : vector<8x8xf32> to vector<8x8xbf16>
    %815 = vector.extract_strided_slice %810 {offsets = [0, 0], sizes = [8, 8], strides = [1, 1]} : vector<8x32xf32> to vector<8x8xf32>
    %816 = arith.truncf %815 : vector<8x8xf32> to vector<8x8xbf16>
    %cst_349 = arith.constant dense<0.000000e+00> : vector<8x8xf32>
    %817 = tpu.matmul %812, %814, %cst_349 {dimension_numbers = #tpu.dot_dimension_numbers<[1], [1], [0], [0], [0, 0, 1, 0], [], []>} : vector<8x8xbf16>, vector<8x8xbf16>, vector<8x8xf32> -> vector<8x8xf32>
    %cst_350 = arith.constant dense<0xFF800000> : vector<8xf32>
    %818 = vector.multi_reduction <maximumf>, %817, %cst_350 [1] : vector<8x8xf32> to vector<8xf32>
    %819 = vector.shape_cast %818 : vector<8xf32> to vector<8x1xf32>
    %820 = vector.broadcast %819 : vector<8x1xf32> to vector<8x8xf32>
    %821 = arith.subf %817, %820 : vector<8x8xf32>
    %822 = math.exp %821 : vector<8x8xf32>
    %cst_351 = arith.constant dense<0.000000e+00> : vector<8xf32>
    %823 = vector.multi_reduction <add>, %822, %cst_351 [1] : vector<8x8xf32> to vector<8xf32>
    %824 = vector.shape_cast %823 : vector<8xf32> to vector<8x1xf32>
    %825 = arith.truncf %822 : vector<8x8xf32> to vector<8x8xbf16>
    %cst_352 = arith.constant dense<0.000000e+00> : vector<8x8xf32>
    %826 = tpu.matmul %825, %816, %cst_352 {dimension_numbers = #tpu.dot_dimension_numbers<[1], [0], [0], [1], [0, 0, 1, 1], [], []>} : vector<8x8xbf16>, vector<8x8xbf16>, vector<8x8xf32> -> vector<8x8xf32>
    %827 = tpu.reciprocal %824 {approx = true} : vector<8x1xf32> -> vector<8x1xf32>
    %828 = vector.broadcast %827 : vector<8x1xf32> to vector<8x8xf32>
    %829 = arith.mulf %826, %828 : vector<8x8xf32>
    %830 = vector.extract_strided_slice %804 {offsets = [0, 8], sizes = [8, 8], strides = [1, 1]} : vector<8x32xf32> to vector<8x8xf32>
    %831 = arith.truncf %830 : vector<8x8xf32> to vector<8x8xbf16>
    %832 = vector.extract_strided_slice %809 {offsets = [0, 8], sizes = [8, 8], strides = [1, 1]} : vector<8x32xf32> to vector<8x8xf32>
    %833 = arith.truncf %832 : vector<8x8xf32> to vector<8x8xbf16>
    %834 = vector.extract_strided_slice %810 {offsets = [0, 8], sizes = [8, 8], strides = [1, 1]} : vector<8x32xf32> to vector<8x8xf32>
    %835 = arith.truncf %834 : vector<8x8xf32> to vector<8x8xbf16>
    %cst_353 = arith.constant dense<0.000000e+00> : vector<8x8xf32>
    %836 = tpu.matmul %831, %833, %cst_353 {dimension_numbers = #tpu.dot_dimension_numbers<[1], [1], [0], [0], [0, 0, 1, 0], [], []>} : vector<8x8xbf16>, vector<8x8xbf16>, vector<8x8xf32> -> vector<8x8xf32>
    %cst_354 = arith.constant dense<0xFF800000> : vector<8xf32>
    %837 = vector.multi_reduction <maximumf>, %836, %cst_354 [1] : vector<8x8xf32> to vector<8xf32>
    %838 = vector.shape_cast %837 : vector<8xf32> to vector<8x1xf32>
    %839 = vector.broadcast %838 : vector<8x1xf32> to vector<8x8xf32>
    %840 = arith.subf %836, %839 : vector<8x8xf32>
    %841 = math.exp %840 : vector<8x8xf32>
    %cst_355 = arith.constant dense<0.000000e+00> : vector<8xf32>
    %842 = vector.multi_reduction <add>, %841, %cst_355 [1] : vector<8x8xf32> to vector<8xf32>
    %843 = vector.shape_cast %842 : vector<8xf32> to vector<8x1xf32>
    %844 = arith.truncf %841 : vector<8x8xf32> to vector<8x8xbf16>
    %cst_356 = arith.constant dense<0.000000e+00> : vector<8x8xf32>
    %845 = tpu.matmul %844, %835, %cst_356 {dimension_numbers = #tpu.dot_dimension_numbers<[1], [0], [0], [1], [0, 0, 1, 1], [], []>} : vector<8x8xbf16>, vector<8x8xbf16>, vector<8x8xf32> -> vector<8x8xf32>
    %846 = tpu.reciprocal %843 {approx = true} : vector<8x1xf32> -> vector<8x1xf32>
    %847 = vector.broadcast %846 : vector<8x1xf32> to vector<8x8xf32>
    %848 = arith.mulf %845, %847 : vector<8x8xf32>
    %849 = vector.extract_strided_slice %804 {offsets = [0, 16], sizes = [8, 8], strides = [1, 1]} : vector<8x32xf32> to vector<8x8xf32>
    %850 = arith.truncf %849 : vector<8x8xf32> to vector<8x8xbf16>
    %851 = vector.extract_strided_slice %809 {offsets = [0, 16], sizes = [8, 8], strides = [1, 1]} : vector<8x32xf32> to vector<8x8xf32>
    %852 = arith.truncf %851 : vector<8x8xf32> to vector<8x8xbf16>
    %853 = vector.extract_strided_slice %810 {offsets = [0, 16], sizes = [8, 8], strides = [1, 1]} : vector<8x32xf32> to vector<8x8xf32>
    %854 = arith.truncf %853 : vector<8x8xf32> to vector<8x8xbf16>
    %cst_357 = arith.constant dense<0.000000e+00> : vector<8x8xf32>
    %855 = tpu.matmul %850, %852, %cst_357 {dimension_numbers = #tpu.dot_dimension_numbers<[1], [1], [0], [0], [0, 0, 1, 0], [], []>} : vector<8x8xbf16>, vector<8x8xbf16>, vector<8x8xf32> -> vector<8x8xf32>
    %cst_358 = arith.constant dense<0xFF800000> : vector<8xf32>
    %856 = vector.multi_reduction <maximumf>, %855, %cst_358 [1] : vector<8x8xf32> to vector<8xf32>
    %857 = vector.shape_cast %856 : vector<8xf32> to vector<8x1xf32>
    %858 = vector.broadcast %857 : vector<8x1xf32> to vector<8x8xf32>
    %859 = arith.subf %855, %858 : vector<8x8xf32>
    %860 = math.exp %859 : vector<8x8xf32>
    %cst_359 = arith.constant dense<0.000000e+00> : vector<8xf32>
    %861 = vector.multi_reduction <add>, %860, %cst_359 [1] : vector<8x8xf32> to vector<8xf32>
    %862 = vector.shape_cast %861 : vector<8xf32> to vector<8x1xf32>
    %863 = arith.truncf %860 : vector<8x8xf32> to vector<8x8xbf16>
    %cst_360 = arith.constant dense<0.000000e+00> : vector<8x8xf32>
    %864 = tpu.matmul %863, %854, %cst_360 {dimension_numbers = #tpu.dot_dimension_numbers<[1], [0], [0], [1], [0, 0, 1, 1], [], []>} : vector<8x8xbf16>, vector<8x8xbf16>, vector<8x8xf32> -> vector<8x8xf32>
    %865 = tpu.reciprocal %862 {approx = true} : vector<8x1xf32> -> vector<8x1xf32>
    %866 = vector.broadcast %865 : vector<8x1xf32> to vector<8x8xf32>
    %867 = arith.mulf %864, %866 : vector<8x8xf32>
    %868 = vector.extract_strided_slice %804 {offsets = [0, 24], sizes = [8, 8], strides = [1, 1]} : vector<8x32xf32> to vector<8x8xf32>
    %869 = arith.truncf %868 : vector<8x8xf32> to vector<8x8xbf16>
    %870 = vector.extract_strided_slice %809 {offsets = [0, 24], sizes = [8, 8], strides = [1, 1]} : vector<8x32xf32> to vector<8x8xf32>
    %871 = arith.truncf %870 : vector<8x8xf32> to vector<8x8xbf16>
    %872 = vector.extract_strided_slice %810 {offsets = [0, 24], sizes = [8, 8], strides = [1, 1]} : vector<8x32xf32> to vector<8x8xf32>
    %873 = arith.truncf %872 : vector<8x8xf32> to vector<8x8xbf16>
    %cst_361 = arith.constant dense<0.000000e+00> : vector<8x8xf32>
    %874 = tpu.matmul %869, %871, %cst_361 {dimension_numbers = #tpu.dot_dimension_numbers<[1], [1], [0], [0], [0, 0, 1, 0], [], []>} : vector<8x8xbf16>, vector<8x8xbf16>, vector<8x8xf32> -> vector<8x8xf32>
    %cst_362 = arith.constant dense<0xFF800000> : vector<8xf32>
    %875 = vector.multi_reduction <maximumf>, %874, %cst_362 [1] : vector<8x8xf32> to vector<8xf32>
    %876 = vector.shape_cast %875 : vector<8xf32> to vector<8x1xf32>
    %877 = vector.broadcast %876 : vector<8x1xf32> to vector<8x8xf32>
    %878 = arith.subf %874, %877 : vector<8x8xf32>
    %879 = math.exp %878 : vector<8x8xf32>
    %cst_363 = arith.constant dense<0.000000e+00> : vector<8xf32>
    %880 = vector.multi_reduction <add>, %879, %cst_363 [1] : vector<8x8xf32> to vector<8xf32>
    %881 = vector.shape_cast %880 : vector<8xf32> to vector<8x1xf32>
    %882 = arith.truncf %879 : vector<8x8xf32> to vector<8x8xbf16>
    %cst_364 = arith.constant dense<0.000000e+00> : vector<8x8xf32>
    %883 = tpu.matmul %882, %873, %cst_364 {dimension_numbers = #tpu.dot_dimension_numbers<[1], [0], [0], [1], [0, 0, 1, 1], [], []>} : vector<8x8xbf16>, vector<8x8xbf16>, vector<8x8xf32> -> vector<8x8xf32>
    %884 = tpu.reciprocal %881 {approx = true} : vector<8x1xf32> -> vector<8x1xf32>
    %885 = vector.broadcast %884 : vector<8x1xf32> to vector<8x8xf32>
    %886 = arith.mulf %883, %885 : vector<8x8xf32>
    %887 = tpu.concatenate %829, %848, %867, %886 in 1 : vector<8x8xf32>, vector<8x8xf32>, vector<8x8xf32>, vector<8x8xf32> -> vector<8x32xf32>
    %888 = arith.truncf %887 : vector<8x32xf32> to vector<8x32xbf16>
    %cst_365 = arith.constant dense<0.000000e+00> : vector<8x32xf32>
    %889 = tpu.matmul %888, %671, %cst_365 {dimension_numbers = #tpu.dot_dimension_numbers<[1], [0], [0], [1], [0, 0, 1, 1], [], []>} : vector<8x32xbf16>, vector<32x32xbf16>, vector<8x32xf32> -> vector<8x32xf32>
    %890 = vector.broadcast %673 : vector<1x32xf32> to vector<8x32xf32>
    %891 = arith.addf %889, %890 : vector<8x32xf32>
    %892 = arith.addf %800, %891 : vector<8x32xf32>
    %cst_366 = arith.constant dense<0.000000e+00> : vector<8xf32>
    %893 = vector.multi_reduction <add>, %892, %cst_366 [1] : vector<8x32xf32> to vector<8xf32>
    %894 = vector.shape_cast %893 : vector<8xf32> to vector<8x1xf32>
    %cst_367 = arith.constant 3.200000e+01 : f32
    %895 = vector.broadcast %cst_367 : f32 to vector<8x1xf32>
    %896 = arith.divf %894, %895 : vector<8x1xf32>
    %897 = vector.broadcast %896 : vector<8x1xf32> to vector<8x32xf32>
    %898 = arith.subf %892, %897 : vector<8x32xf32>
    %899 = arith.mulf %898, %898 : vector<8x32xf32>
    %cst_368 = arith.constant dense<0.000000e+00> : vector<8xf32>
    %900 = vector.multi_reduction <add>, %899, %cst_368 [1] : vector<8x32xf32> to vector<8xf32>
    %901 = vector.shape_cast %900 : vector<8xf32> to vector<8x1xf32>
    %cst_369 = arith.constant 3.200000e+01 : f32
    %902 = vector.broadcast %cst_369 : f32 to vector<8x1xf32>
    %903 = arith.divf %901, %902 : vector<8x1xf32>
    %904 = vector.broadcast %896 : vector<8x1xf32> to vector<8x32xf32>
    %905 = arith.subf %892, %904 : vector<8x32xf32>
    %cst_370 = arith.constant 9.99999974E-6 : f32
    %906 = vector.broadcast %cst_370 : f32 to vector<8x1xf32>
    %907 = arith.addf %903, %906 : vector<8x1xf32>
    %908 = math.rsqrt %907 : vector<8x1xf32>
    %909 = vector.broadcast %908 : vector<8x1xf32> to vector<8x32xf32>
    %910 = arith.mulf %905, %909 : vector<8x32xf32>
    %911 = vector.broadcast %675 : vector<1x32xf32> to vector<8x32xf32>
    %912 = arith.mulf %910, %911 : vector<8x32xf32>
    %913 = vector.broadcast %677 : vector<1x32xf32> to vector<8x32xf32>
    %914 = arith.addf %912, %913 : vector<8x32xf32>
    %915 = arith.truncf %914 : vector<8x32xf32> to vector<8x32xbf16>
    %cst_371 = arith.constant dense<0.000000e+00> : vector<8x64xf32>
    %916 = tpu.matmul %915, %679, %cst_371 {dimension_numbers = #tpu.dot_dimension_numbers<[1], [0], [0], [1], [0, 0, 1, 1], [], []>} : vector<8x32xbf16>, vector<32x64xbf16>, vector<8x64xf32> -> vector<8x64xf32>
    %917 = vector.broadcast %681 : vector<1x64xf32> to vector<8x64xf32>
    %918 = arith.addf %916, %917 : vector<8x64xf32>
    %cst_372 = arith.constant 0.000000e+00 : f32
    %919 = vector.broadcast %cst_372 : f32 to vector<8x64xf32>
    %920 = arith.maximumf %918, %919 : vector<8x64xf32>
    %921 = arith.truncf %920 : vector<8x64xf32> to vector<8x64xbf16>
    %cst_373 = arith.constant dense<0.000000e+00> : vector<8x32xf32>
    %922 = tpu.matmul %921, %683, %cst_373 {dimension_numbers = #tpu.dot_dimension_numbers<[1], [0], [0], [1], [0, 0, 1, 1], [], []>} : vector<8x64xbf16>, vector<64x32xbf16>, vector<8x32xf32> -> vector<8x32xf32>
    %923 = vector.broadcast %685 : vector<1x32xf32> to vector<8x32xf32>
    %924 = arith.addf %922, %923 : vector<8x32xf32>
    %925 = arith.addf %914, %924 : vector<8x32xf32>
    %cst_374 = arith.constant dense<0.000000e+00> : vector<8xf32>
    %926 = vector.multi_reduction <add>, %925, %cst_374 [1] : vector<8x32xf32> to vector<8xf32>
    %927 = vector.shape_cast %926 : vector<8xf32> to vector<8x1xf32>
    %cst_375 = arith.constant 3.200000e+01 : f32
    %928 = vector.broadcast %cst_375 : f32 to vector<8x1xf32>
    %929 = arith.divf %927, %928 : vector<8x1xf32>
    %930 = vector.broadcast %929 : vector<8x1xf32> to vector<8x32xf32>
    %931 = arith.subf %925, %930 : vector<8x32xf32>
    %932 = arith.mulf %931, %931 : vector<8x32xf32>
    %cst_376 = arith.constant dense<0.000000e+00> : vector<8xf32>
    %933 = vector.multi_reduction <add>, %932, %cst_376 [1] : vector<8x32xf32> to vector<8xf32>
    %934 = vector.shape_cast %933 : vector<8xf32> to vector<8x1xf32>
    %cst_377 = arith.constant 3.200000e+01 : f32
    %935 = vector.broadcast %cst_377 : f32 to vector<8x1xf32>
    %936 = arith.divf %934, %935 : vector<8x1xf32>
    %937 = vector.broadcast %929 : vector<8x1xf32> to vector<8x32xf32>
    %938 = arith.subf %925, %937 : vector<8x32xf32>
    %cst_378 = arith.constant 9.99999974E-6 : f32
    %939 = vector.broadcast %cst_378 : f32 to vector<8x1xf32>
    %940 = arith.addf %936, %939 : vector<8x1xf32>
    %941 = math.rsqrt %940 : vector<8x1xf32>
    %942 = vector.broadcast %941 : vector<8x1xf32> to vector<8x32xf32>
    %943 = arith.mulf %938, %942 : vector<8x32xf32>
    %944 = vector.broadcast %687 : vector<1x32xf32> to vector<8x32xf32>
    %945 = arith.mulf %943, %944 : vector<8x32xf32>
    %946 = vector.broadcast %689 : vector<1x32xf32> to vector<8x32xf32>
    %947 = arith.addf %945, %946 : vector<8x32xf32>
    %c0_379 = arith.constant 0 : index
    %c0_380 = arith.constant 0 : index
    %948 = vector.load %arg8[%c0_379, %c0_380] : memref<32x1xf32, #tpu.memory_space<vmem>>, vector<32x1xf32>
    %cst_381 = arith.constant dense<0.000000e+00> : vector<8x1xf32>
    %949 = tpu.matmul %947, %948, %cst_381 {dimension_numbers = #tpu.dot_dimension_numbers<[1], [0], [0], [1], [0, 0, 1, 1], [], []>} : vector<8x32xf32>, vector<32x1xf32>, vector<8x1xf32> -> vector<8x1xf32>
    %c0_382 = arith.constant 0 : index
    %c0_383 = arith.constant 0 : index
    %950 = vector.load %arg9[%c0_382, %c0_383] : memref<1x1xf32, #tpu.memory_space<vmem>>, vector<1x1xf32>
    %951 = vector.broadcast %950 : vector<1x1xf32> to vector<8x1xf32>
    %952 = arith.addf %949, %951 : vector<8x1xf32>
    %c0_384 = arith.constant 0 : index
    %c0_385 = arith.constant 0 : index
    %c0_386 = arith.constant 0 : index
    %953 = vector.load %arg42[%c0_384, %c0_385, %c0_386] : memref<1x8x1xf32, #tpu.memory_space<vmem>>, vector<1x8x1xf32>
    %954 = vector.shape_cast %953 : vector<1x8x1xf32> to vector<8x1xf32>
    %955 = vector.shape_cast %952 : vector<8x1xf32> to vector<1x8x1xf32>
    tpu.vector_store %arg42[%c0_384, %c0_385, %c0_386], %955 {strides = array<i32>} : memref<1x8x1xf32, #tpu.memory_space<vmem>>, vector<1x8x1xf32>,
    return
  }
  func.func @transform_0(%arg0: i32) -> (i32, i32, i32) {
    %c0_i32 = arith.constant 0 : i32
    %c0_i32_0 = arith.constant 0 : i32
    %c0_i32_1 = arith.constant 0 : i32
    return %arg0, %c0_i32, %c0_i32_0 : i32, i32, i32
  }
  func.func @transform_1(%arg0: i32) -> (i32, i32, i32) {
    %c0_i32 = arith.constant 0 : i32
    %c0_i32_0 = arith.constant 0 : i32
    %c0_i32_1 = arith.constant 0 : i32
    return %arg0, %c0_i32, %c0_i32_0 : i32, i32, i32
  }
  func.func @transform_2(%arg0: i32) -> (i32, i32) {
    %c0_i32 = arith.constant 0 : i32
    %c0_i32_0 = arith.constant 0 : i32
    %c0_i32_1 = arith.constant 0 : i32
    return %c0_i32, %c0_i32_0 : i32, i32
  }
  func.func @transform_3(%arg0: i32) -> (i32, i32) {
    %c0_i32 = arith.constant 0 : i32
    %c0_i32_0 = arith.constant 0 : i32
    %c0_i32_1 = arith.constant 0 : i32
    return %c0_i32, %c0_i32_0 : i32, i32
  }
  func.func @transform_4(%arg0: i32) -> (i32, i32) {
    %c0_i32 = arith.constant 0 : i32
    %c0_i32_0 = arith.constant 0 : i32
    %c0_i32_1 = arith.constant 0 : i32
    return %c0_i32, %c0_i32_0 : i32, i32
  }
  func.func @transform_5(%arg0: i32) -> (i32, i32) {
    %c0_i32 = arith.constant 0 : i32
    %c0_i32_0 = arith.constant 0 : i32
    %c0_i32_1 = arith.constant 0 : i32
    return %c0_i32, %c0_i32_0 : i32, i32
  }
  func.func @transform_6(%arg0: i32) -> (i32, i32) {
    %c0_i32 = arith.constant 0 : i32
    %c0_i32_0 = arith.constant 0 : i32
    %c0_i32_1 = arith.constant 0 : i32
    return %c0_i32, %c0_i32_0 : i32, i32
  }
  func.func @transform_7(%arg0: i32) -> (i32, i32) {
    %c0_i32 = arith.constant 0 : i32
    %c0_i32_0 = arith.constant 0 : i32
    %c0_i32_1 = arith.constant 0 : i32
    return %c0_i32, %c0_i32_0 : i32, i32
  }
  func.func @transform_8(%arg0: i32) -> (i32, i32) {
    %c0_i32 = arith.constant 0 : i32
    %c0_i32_0 = arith.constant 0 : i32
    %c0_i32_1 = arith.constant 0 : i32
    return %c0_i32, %c0_i32_0 : i32, i32
  }
  func.func @transform_9(%arg0: i32) -> (i32, i32, i32) {
    %c0_i32 = arith.constant 0 : i32
    %c0_i32_0 = arith.constant 0 : i32
    %c0_i32_1 = arith.constant 0 : i32
    %c0_i32_2 = arith.constant 0 : i32
    return %c0_i32, %c0_i32_0, %c0_i32_1 : i32, i32, i32
  }
  func.func @transform_10(%arg0: i32) -> (i32, i32, i32) {
    %c0_i32 = arith.constant 0 : i32
    %c0_i32_0 = arith.constant 0 : i32
    %c0_i32_1 = arith.constant 0 : i32
    %c0_i32_2 = arith.constant 0 : i32
    return %c0_i32, %c0_i32_0, %c0_i32_1 : i32, i32, i32
  }
  func.func @transform_11(%arg0: i32) -> (i32, i32, i32) {
    %c0_i32 = arith.constant 0 : i32
    %c0_i32_0 = arith.constant 0 : i32
    %c0_i32_1 = arith.constant 0 : i32
    %c0_i32_2 = arith.constant 0 : i32
    return %c0_i32, %c0_i32_0, %c0_i32_1 : i32, i32, i32
  }
  func.func @transform_12(%arg0: i32) -> (i32, i32, i32) {
    %c0_i32 = arith.constant 0 : i32
    %c0_i32_0 = arith.constant 0 : i32
    %c0_i32_1 = arith.constant 0 : i32
    %c0_i32_2 = arith.constant 0 : i32
    return %c0_i32, %c0_i32_0, %c0_i32_1 : i32, i32, i32
  }
  func.func @transform_13(%arg0: i32) -> (i32, i32, i32) {
    %c0_i32 = arith.constant 0 : i32
    %c0_i32_0 = arith.constant 0 : i32
    %c0_i32_1 = arith.constant 0 : i32
    %c0_i32_2 = arith.constant 0 : i32
    return %c0_i32, %c0_i32_0, %c0_i32_1 : i32, i32, i32
  }
  func.func @transform_14(%arg0: i32) -> (i32, i32, i32) {
    %c0_i32 = arith.constant 0 : i32
    %c0_i32_0 = arith.constant 0 : i32
    %c0_i32_1 = arith.constant 0 : i32
    %c0_i32_2 = arith.constant 0 : i32
    return %c0_i32, %c0_i32_0, %c0_i32_1 : i32, i32, i32
  }
  func.func @transform_15(%arg0: i32) -> (i32, i32, i32) {
    %c0_i32 = arith.constant 0 : i32
    %c0_i32_0 = arith.constant 0 : i32
    %c0_i32_1 = arith.constant 0 : i32
    %c0_i32_2 = arith.constant 0 : i32
    return %c0_i32, %c0_i32_0, %c0_i32_1 : i32, i32, i32
  }
  func.func @transform_16(%arg0: i32) -> (i32, i32, i32) {
    %c0_i32 = arith.constant 0 : i32
    %c0_i32_0 = arith.constant 0 : i32
    %c0_i32_1 = arith.constant 0 : i32
    %c0_i32_2 = arith.constant 0 : i32
    return %c0_i32, %c0_i32_0, %c0_i32_1 : i32, i32, i32
  }
  func.func @transform_17(%arg0: i32) -> (i32, i32, i32) {
    %c0_i32 = arith.constant 0 : i32
    %c0_i32_0 = arith.constant 0 : i32
    %c0_i32_1 = arith.constant 0 : i32
    %c0_i32_2 = arith.constant 0 : i32
    return %c0_i32, %c0_i32_0, %c0_i32_1 : i32, i32, i32
  }
  func.func @transform_18(%arg0: i32) -> (i32, i32, i32) {
    %c0_i32 = arith.constant 0 : i32
    %c0_i32_0 = arith.constant 0 : i32
    %c0_i32_1 = arith.constant 0 : i32
    %c0_i32_2 = arith.constant 0 : i32
    return %c0_i32, %c0_i32_0, %c0_i32_1 : i32, i32, i32
  }
  func.func @transform_19(%arg0: i32) -> (i32, i32, i32) {
    %c0_i32 = arith.constant 0 : i32
    %c0_i32_0 = arith.constant 0 : i32
    %c0_i32_1 = arith.constant 0 : i32
    %c0_i32_2 = arith.constant 0 : i32
    return %c0_i32, %c0_i32_0, %c0_i32_1 : i32, i32, i32
  }
  func.func @transform_20(%arg0: i32) -> (i32, i32, i32) {
    %c0_i32 = arith.constant 0 : i32
    %c0_i32_0 = arith.constant 0 : i32
    %c0_i32_1 = arith.constant 0 : i32
    %c0_i32_2 = arith.constant 0 : i32
    return %c0_i32, %c0_i32_0, %c0_i32_1 : i32, i32, i32
  }
  func.func @transform_21(%arg0: i32) -> (i32, i32, i32) {
    %c0_i32 = arith.constant 0 : i32
    %c0_i32_0 = arith.constant 0 : i32
    %c0_i32_1 = arith.constant 0 : i32
    %c0_i32_2 = arith.constant 0 : i32
    return %c0_i32, %c0_i32_0, %c0_i32_1 : i32, i32, i32
  }
  func.func @transform_22(%arg0: i32) -> (i32, i32, i32) {
    %c0_i32 = arith.constant 0 : i32
    %c0_i32_0 = arith.constant 0 : i32
    %c0_i32_1 = arith.constant 0 : i32
    %c0_i32_2 = arith.constant 0 : i32
    return %c0_i32, %c0_i32_0, %c0_i32_1 : i32, i32, i32
  }
  func.func @transform_23(%arg0: i32) -> (i32, i32, i32) {
    %c0_i32 = arith.constant 0 : i32
    %c0_i32_0 = arith.constant 0 : i32
    %c0_i32_1 = arith.constant 0 : i32
    %c0_i32_2 = arith.constant 0 : i32
    return %c0_i32, %c0_i32_0, %c0_i32_1 : i32, i32, i32
  }
  func.func @transform_24(%arg0: i32) -> (i32, i32, i32) {
    %c0_i32 = arith.constant 0 : i32
    %c0_i32_0 = arith.constant 0 : i32
    %c0_i32_1 = arith.constant 0 : i32
    %c0_i32_2 = arith.constant 0 : i32
    return %c0_i32, %c0_i32_0, %c0_i32_1 : i32, i32, i32
  }
  func.func @transform_25(%arg0: i32) -> (i32, i32, i32) {
    %c0_i32 = arith.constant 0 : i32
    %c0_i32_0 = arith.constant 0 : i32
    %c0_i32_1 = arith.constant 0 : i32
    %c0_i32_2 = arith.constant 0 : i32
    return %c0_i32, %c0_i32_0, %c0_i32_1 : i32, i32, i32
  }
  func.func @transform_26(%arg0: i32) -> (i32, i32, i32) {
    %c0_i32 = arith.constant 0 : i32
    %c0_i32_0 = arith.constant 0 : i32
    %c0_i32_1 = arith.constant 0 : i32
    %c0_i32_2 = arith.constant 0 : i32
    return %c0_i32, %c0_i32_0, %c0_i32_1 : i32, i32, i32
  }
  func.func @transform_27(%arg0: i32) -> (i32, i32, i32) {
    %c0_i32 = arith.constant 0 : i32
    %c0_i32_0 = arith.constant 0 : i32
    %c0_i32_1 = arith.constant 0 : i32
    %c0_i32_2 = arith.constant 0 : i32
    return %c0_i32, %c0_i32_0, %c0_i32_1 : i32, i32, i32
  }
  func.func @transform_28(%arg0: i32) -> (i32, i32, i32) {
    %c0_i32 = arith.constant 0 : i32
    %c0_i32_0 = arith.constant 0 : i32
    %c0_i32_1 = arith.constant 0 : i32
    %c0_i32_2 = arith.constant 0 : i32
    return %c0_i32, %c0_i32_0, %c0_i32_1 : i32, i32, i32
  }
  func.func @transform_29(%arg0: i32) -> (i32, i32, i32) {
    %c0_i32 = arith.constant 0 : i32
    %c0_i32_0 = arith.constant 0 : i32
    %c0_i32_1 = arith.constant 0 : i32
    %c0_i32_2 = arith.constant 0 : i32
    return %c0_i32, %c0_i32_0, %c0_i32_1 : i32, i32, i32
  }
  func.func @transform_30(%arg0: i32) -> (i32, i32, i32) {
    %c0_i32 = arith.constant 0 : i32
    %c0_i32_0 = arith.constant 0 : i32
    %c0_i32_1 = arith.constant 0 : i32
    %c0_i32_2 = arith.constant 0 : i32
    return %c0_i32, %c0_i32_0, %c0_i32_1 : i32, i32, i32
  }
  func.func @transform_31(%arg0: i32) -> (i32, i32, i32) {
    %c0_i32 = arith.constant 0 : i32
    %c0_i32_0 = arith.constant 0 : i32
    %c0_i32_1 = arith.constant 0 : i32
    %c0_i32_2 = arith.constant 0 : i32
    return %c0_i32, %c0_i32_0, %c0_i32_1 : i32, i32, i32
  }
  func.func @transform_32(%arg0: i32) -> (i32, i32, i32) {
    %c0_i32 = arith.constant 0 : i32
    %c0_i32_0 = arith.constant 0 : i32
    %c0_i32_1 = arith.constant 0 : i32
    %c0_i32_2 = arith.constant 0 : i32
    return %c0_i32, %c0_i32_0, %c0_i32_1 : i32, i32, i32
  }
  func.func @transform_33(%arg0: i32) -> (i32, i32, i32) {
    %c0_i32 = arith.constant 0 : i32
    %c0_i32_0 = arith.constant 0 : i32
    %c0_i32_1 = arith.constant 0 : i32
    %c0_i32_2 = arith.constant 0 : i32
    return %c0_i32, %c0_i32_0, %c0_i32_1 : i32, i32, i32
  }
  func.func @transform_34(%arg0: i32) -> (i32, i32, i32) {
    %c0_i32 = arith.constant 0 : i32
    %c0_i32_0 = arith.constant 0 : i32
    %c0_i32_1 = arith.constant 0 : i32
    %c0_i32_2 = arith.constant 0 : i32
    return %c0_i32, %c0_i32_0, %c0_i32_1 : i32, i32, i32
  }
  func.func @transform_35(%arg0: i32) -> (i32, i32, i32) {
    %c0_i32 = arith.constant 0 : i32
    %c0_i32_0 = arith.constant 0 : i32
    %c0_i32_1 = arith.constant 0 : i32
    %c0_i32_2 = arith.constant 0 : i32
    return %c0_i32, %c0_i32_0, %c0_i32_1 : i32, i32, i32
  }
  func.func @transform_36(%arg0: i32) -> (i32, i32, i32) {
    %c0_i32 = arith.constant 0 : i32
    %c0_i32_0 = arith.constant 0 : i32
    %c0_i32_1 = arith.constant 0 : i32
    %c0_i32_2 = arith.constant 0 : i32
    return %c0_i32, %c0_i32_0, %c0_i32_1 : i32, i32, i32
  }
  func.func @transform_37(%arg0: i32) -> (i32, i32, i32) {
    %c0_i32 = arith.constant 0 : i32
    %c0_i32_0 = arith.constant 0 : i32
    %c0_i32_1 = arith.constant 0 : i32
    %c0_i32_2 = arith.constant 0 : i32
    return %c0_i32, %c0_i32_0, %c0_i32_1 : i32, i32, i32
  }
  func.func @transform_38(%arg0: i32) -> (i32, i32, i32) {
    %c0_i32 = arith.constant 0 : i32
    %c0_i32_0 = arith.constant 0 : i32
    %c0_i32_1 = arith.constant 0 : i32
    %c0_i32_2 = arith.constant 0 : i32
    return %c0_i32, %c0_i32_0, %c0_i32_1 : i32, i32, i32
  }
  func.func @transform_39(%arg0: i32) -> (i32, i32, i32) {
    %c0_i32 = arith.constant 0 : i32
    %c0_i32_0 = arith.constant 0 : i32
    %c0_i32_1 = arith.constant 0 : i32
    %c0_i32_2 = arith.constant 0 : i32
    return %c0_i32, %c0_i32_0, %c0_i32_1 : i32, i32, i32
  }
  func.func @transform_40(%arg0: i32) -> (i32, i32, i32) {
    %c0_i32 = arith.constant 0 : i32
    %c0_i32_0 = arith.constant 0 : i32
    %c0_i32_1 = arith.constant 0 : i32
    %c0_i32_2 = arith.constant 0 : i32
    return %c0_i32, %c0_i32_0, %c0_i32_1 : i32, i32, i32
  }
  func.func @transform_41(%arg0: i32) -> (i32, i32, i32) {
    %c0_i32 = arith.constant 0 : i32
    %c0_i32_0 = arith.constant 0 : i32
    %c0_i32_1 = arith.constant 0 : i32
    return %arg0, %c0_i32, %c0_i32_0 : i32, i32, i32
  }
}

</mosaic_0001>

<bundles_post_ra>
// kernel: time_transformer_forward.1
= control target key start
LH: loop header
LB: loop body
LE: loop exit
PB: predicated region body
PF: predicated region fallthrough
CT: control target
= control target key end

     0   :  { %s8391_s6 = smov 1   ;;  %s8392_s10 = smov 2   ;;  %s9672_s0 = inlined_call_operand.smem [shape: u32[42], index: -1, kind: input, shape index: {}] }
   0x1   :  { %s8474_s5 = sld [smem:[%s9672_s0]]   ;;  %s8393_s14 = smov 3  }
   0x2   :  { %s8479_s9 = sld [smem:[%s9672_s0 + %s8391_s6]]   ;;  %s8394_s18 = smov 4  }
   0x3   :  { %s8484_s13 = sld [smem:[%s9672_s0 + %s8392_s10]]   ;;  %s8395_s22 = smov 5  }
   0x4   :  { %s8489_s17 = sld [smem:[%s9672_s0 + %s8393_s14]]   ;;  %s8396_s26 = smov 6  }
   0x5   :  { %s8494_s21 = sld [smem:[%s9672_s0 + %s8394_s18]]   ;;  %s8397_s30 = smov 7  }
   0x6   :  { %s8499_s25 = sld [smem:[%s9672_s0 + %s8395_s22]]   ;;  %s8398_s4 = smov 8  }
   0x7   :  { %9745 = sst [smem:[#allocation34_spill]] %s8474_s5  ;;  %s8399_s10 = smov 9  }
   0x8   :  { %9746 = sst [smem:[#allocation35_spill]] %s8479_s9  ;;  %s8400_s15 = smov 10  }
   0x9   :  { %9747 = sst [smem:[#allocation36_spill]] %s8484_s13  ;;  %s8401_s20 = smov 11  }
   0xa   :  { %9748 = sst [smem:[#allocation37_spill]] %s8489_s17  ;;  %s8403_s1 = smov 13  }
   0xb   :  { %9749 = sst [smem:[#allocation38_spill]] %s8494_s21  ;;  %s8404_s7 = smov 14  }
   0xc   :  { %9750 = sst [smem:[#allocation39_spill]] %s8499_s25  ;;  %s8406_s22 = smov 16  }
   0xd   :  { %s8504_s29 = sld [smem:[%s9672_s0 + %s8396_s26]]   ;;  %s8402_s26 = smov 12  }
   0xe   :  { %s8509_s3 = sld [smem:[%s9672_s0 + %s8397_s30]]   ;;  %s8407_s28 = smov 17  }
   0xf   :  { %s6552_s8 = sld [smem:[%s9672_s0 + %s8398_s4]]  }
  0x10   :  { %s8517_s14 = sld [smem:[%s9672_s0 + %s8399_s10]]  }
  0x11   :  { %s8522_s19 = sld [smem:[%s9672_s0 + %s8400_s15]]   ;;  %s8405_s15 = smov 15  }
  0x12   :  { %s8527_s24 = sld [smem:[%s9672_s0 + %s8401_s20]]  }
  0x13   :  { %s8532_s30 = sld [smem:[%s9672_s0 + %s8402_s26]]  }
  0x14   :  { %9751 = sst [smem:[#allocation40_spill]] %s8509_s3 }
  0x15   :  { %s8537_s6 = sld [smem:[%s9672_s0 + %s8403_s1]]   ;;  %v88_v0 = vstv %s6552_s8  ;;  %s8408_s8 = smov 18  }
  0x16   :  { %9752 = sst [smem:[#allocation41_spill]] %s8517_s14  ;;  %89 = vst [vmem:[#allocation2] sm:$0x1] %v88_v0 }
  0x17   :  { %9753 = sst [smem:[#allocation42_spill]] %s8522_s19 }
  0x18   :  { %9754 = sst [smem:[#allocation43_spill]] %s8527_s24 }
  0x19   :  { %9755 = sst [smem:[#allocation44_spill]] %s8532_s30 }
  0x1a   :  { %s8542_s12 = sld [smem:[%s9672_s0 + %s8404_s7]]  }
  0x1b   :  { %9756 = sst [smem:[#allocation45_spill]] %s8537_s6 }
  0x1c   :  { %s8547_s20 = sld [smem:[%s9672_s0 + %s8405_s15]]   ;;  %s8409_s15 = smov 19  }
  0x1d   :  { %s8552_s27 = sld [smem:[%s9672_s0 + %s8406_s22]]   ;;  %s8410_s22 = smov 20  }
  0x1e   :  { %s8557_s4 = sld [smem:[%s9672_s0 + %s8407_s28]]   ;;  %s8411_s28 = smov 21  }
  0x1f   :  { %s8562_s11 = sld [smem:[%s9672_s0 + %s8408_s8]]   ;;  %s8412_s8 = smov 22  }
  0x20   :  { %9757 = sst [smem:[#allocation46_spill]] %s8542_s12 }
  0x21   :  { %s8567_s3 = sld [smem:[%s9672_s0 + %s8409_s15]]   ;;  %s8413_s15 = smov 23  }
  0x22   :  { %9758 = sst [smem:[#allocation47_spill]] %s8547_s20 }
  0x23   :  { %9759 = sst [smem:[#allocation48_spill]] %s8552_s27 }
  0x24   :  { %9760 = sst [smem:[#allocation49_spill]] %s8557_s4 }
  0x25   :  { %9761 = sst [smem:[#allocation50_spill]] %s8562_s11 }
  0x26   :  { %s8572_s9 = sld [smem:[%s9672_s0 + %s8410_s22]]   ;;  %s8414_s22 = smov 24  }
  0x27   :  { %9762 = sst [smem:[#allocation51_spill]] %s8567_s3 }
  0x28   :  { %s8577_s27 = sld [smem:[%s9672_s0 + %s8411_s28]]   ;;  %s8415_s28 = smov 25  }
  0x29   :  { %s8582_s11 = sld [smem:[%s9672_s0 + %s8412_s8]]   ;;  %s8416_s8 = smov 26  }
  0x2a   :  { %s8587_s3 = sld [smem:[%s9672_s0 + %s8413_s15]]   ;;  %s8417_s15 = smov 27  }
  0x2b   :  { %s8602_s12 = sld [smem:[%s9672_s0 + %s8416_s8]]   ;;  %s8420_s8 = smov 30  }
  0x2c   :  { %9763 = sst [smem:[#allocation52_spill]] %s8572_s9 }
  0x2d   :  { %s8592_s9 = sld [smem:[%s9672_s0 + %s8414_s22]]   ;;  %s8418_s22 = smov 28  }
  0x2e   :  { %9764 = sst [smem:[#allocation53_spill]] %s8577_s27 }
  0x2f   :  { %9765 = sst [smem:[#allocation54_spill]] %s8582_s11 }
  0x30   :  { %9766 = sst [smem:[#allocation55_spill]] %s8587_s3 }
  0x31   :  { %s8597_s27 = sld [smem:[%s9672_s0 + %s8415_s28]]   ;;  %s8419_s28 = smov 29  }
  0x32   :  { %9768 = sst [smem:[#allocation57_spill]] %s8602_s12 }
  0x33   :  { %9767 = sst [smem:[#allocation56_spill]] %s8592_s9 }
  0x34   :  { %s8607_s3 = sld [smem:[%s9672_s0 + %s8417_s15]]   ;;  %s8421_s15 = smov 31  }
  0x35   :  { %s8612_s6 = sld [smem:[%s9672_s0 + %s8418_s22]]   ;;  %s8422_s22 = smov 32  }
  0x36   :  { %s8617_s4 = sld [smem:[%s9672_s0 + %s8419_s28]]   ;;  %s8423_s28 = smov 33  }
  0x37   :  { %s8622_s20 = sld [smem:[%s9672_s0 + %s8420_s8]]   ;;  %s8424_s8 = smov 34  }
  0x38   :  { %s8632_s30 = sld [smem:[%s9672_s0 + %s8422_s22]]   ;;  %s8426_s22 = smov 36  }
  0x39   :  { %s8642_s24 = sld [smem:[%s9672_s0 + %s8424_s8]]   ;;  %s8428_s8 = smov 38  }
  0x3a   :  { %9769 = sst [smem:[#allocation58_spill]] %s8607_s3 }
  0x3b   :  { %9770 = sst [smem:[#allocation59_spill]] %s8612_s6 }
  0x3c   :  { %9771 = sst [smem:[#allocation60_spill]] %s8617_s4 }
  0x3d   :  { %9772 = sst [smem:[#allocation61_spill]] %s8622_s20 }
  0x3e   :  { %s8627_s3 = sld [smem:[%s9672_s0 + %s8421_s15]]   ;;  %s8425_s15 = smov 35  }
  0x3f   :  { %s8637_s4 = sld [smem:[%s9672_s0 + %s8423_s28]]   ;;  %s8427_s28 = smov 37  }
  0x40   :  { %9775 = sst [smem:[#allocation64_spill]] %s8642_s24 }
  0x41   :  { %s8652_s19 = sld [smem:[%s9672_s0 + %s8426_s22]]   ;;  %s8430_s22 = smov 40  }
  0x42   :  { %s8657_s13 = sld [smem:[%s9672_s0 + %s8427_s28]]   ;;  %s8431_s28 = smov 41  }
  0x43   :  { %s8662_s21 = sld [smem:[%s9672_s0 + %s8428_s8]]  }
  0x44   :  { %9773 = sst [smem:[#allocation62_spill]] %s8627_s3 }
  0x45   :  { %9774 = sst [smem:[#allocation63_spill]] %s8637_s4 }
  0x46   :  { %s8647_s3 = sld [smem:[%s9672_s0 + %s8425_s15]]   ;;  %s8429_s15 = smov 39  }
  0x47   :  { %9777 = sst [smem:[#allocation66_spill]] %s8652_s19 }
  0x48   :  { %9778 = sst [smem:[#allocation67_spill]] %s8657_s13 }
  0x49   :  { %9779 = sst [smem:[#allocation68_spill]] %s8662_s21 }
  0x4a   :  { %s8672_s14 = sld [smem:[%s9672_s0 + %s8430_s22]]  }
  0x4b   :  { %s8677_s13 = sld [smem:[%s9672_s0 + %s8431_s28]]  }
  0x4c   :  { %9776 = sst [smem:[#allocation65_spill]] %s8647_s3 }
  0x4d   :  { %s8667_s3 = sld [smem:[%s9672_s0 + %s8429_s15]]  }
  0x50   :  { %9781 = sst [smem:[#allocation70_spill]] %s8672_s14 }
  0x53   :  { %9780 = sst [smem:[#allocation69_spill]] %s8667_s3 }
  0x54   :  { %90 = vsyncpa [#allocation4], 0 }
  0x55   :  { %91 = vsyncpa [#allocation6], 0 }
  0x56   :  { %92 = vsyncpa [#allocation9], 0 }
  0x57   :  { %93 = vsyncpa [#allocation12], 0 }
  0x58   :  { %94 = vsyncpa [#allocation15], 0 }
  0x59   :  { %95 = vsyncpa [#allocation18], 0 }
  0x5a   :  { %96 = vsyncpa [#allocation21], 0 }
  0x5b   :  { %97 = vsyncpa [#allocation24], 0  ;;  %s8679_s8 = smov 0  }
  0x5c LB: > { %s9782_s25 = sld [smem:[#allocation39_spill]]  ;;  %s9783_s24 = sld [smem:[#allocation64_spill]]  ;;  %s8389_s8 = sphi %s8679_s8, %s103_s8  }
  0x5d   : > { %s9784_s21 = sld [smem:[#allocation68_spill]]  ;;  %s9785_s20 = sld [smem:[#allocation61_spill]] }
  0x5e   : > { %s9786_s19 = sld [smem:[#allocation66_spill]]  ;;  %s9787_s14 = sld [smem:[#allocation70_spill]] }
  0x5f   : > { %s9788_s12 = sld [smem:[#allocation57_spill]]  ;;  %s9789_s11 = sld [smem:[#allocation54_spill]] }
  0x60   : > { %s9790_s6 = sld [smem:[#allocation59_spill]]  ;;  %s9791_s4 = sld [smem:[#allocation63_spill]] }
  0x61   : > { %s9792_s3 = sld [smem:[#allocation69_spill]]  ;;  %s9793_s9 = sld [smem:[#allocation56_spill]] }
  0x62   : > { %s8432_s0 = smov [#allocation5]   ;;  %s8685_s10 = sadd.s32 4294967295, %s8389_s8  }
  0x63   : > { %s1038_s7 = sshll.u32 %s8432_s0, 4  ;;  %p6588_p0 = scmp.ge.s32.totalorder %s8389_s8, 1  ;;  %s8690_s7 = int_to_ptr.vmem [resolvable:$true] %s1038_s7 }
  0x64   : > { %p1005_p1 = scmp.lt.s32.totalorder %s8389_s8, 3  ;;  %p9693_p2 = scmp.eq.s32.totalorder %s8685_s10, 0 }
  0x65   : > { %s8433_s16 = smov [#allocation8]   ;;  %s8434_s23 = smov [#allocation11]  }
  0x66   : > { %p8692_p3 = pnand %p6588_p0, %p1005_p1  ;;  %s1109_s18 = sshll.u32 %s8433_s16, 4  ;;  %s8698_s18 = int_to_ptr.vmem [resolvable:$true] %s1109_s18 }
  0x67   : > { %s1135_s26 = sshll.u32 %s8434_s23, 4  ;;  %s8435_s28 = smov [#allocation14]   ;;  %s8706_s26 = int_to_ptr.vmem [resolvable:$true] %s1135_s26 }
  0x68   : > { %s9794_s15 = scalar_select %p8692_p3, 1, 0 }
  0x69   : > { %p7604_p4 = pneg %p8692_p3  ;;  %s8708_s1 = sshll.u32 %s8435_s28, 4  ;;  %s1168_s1 = int_to_ptr.vmem [resolvable:$true] %s8708_s1 }
  0x6a   : > { %s7931_s2 = scalar_lea.hbm %s8504_s29, 16 }
  0x6b   : > { %p8702_p5 = pnand %p9693_p2, %p7604_p4  ;;  %p7932_p6 = scmp.ne.s32.totalorder %s8504_s29, %s7931_s2 }
  0x6c   : > { %p7938_p10 = scmp.lt.u32.totalorder %s7931_s2, %s8504_s29 }
  0x6d   : > { %p8714_p7 = pneg %p8702_p5 }
  0x6f   : > { %p7934_p8 = pnand %p8714_p7, %p7932_p6 }
  0x71   : > { %p7935_p9 = pneg %p7934_p8 }
  0x73   : > { %p7940_p11 = pnand %p7938_p10, %p7935_p9 }
  0x75   : > { %7943 = shalt.err (!%p7940_p11)
}
  0x76   : > { %s7944_s16 = scalar_lea.vmem %s8690_s7, 16  ;;  %s7951_s23 = scalar_lea.vmem %s8690_s7, 32 }
  0x77   : > { %p7945_p12 = scmp.ne.s32.totalorder %s8690_s7, %s7944_s16  ;;  %p7952_p1 = scmp.lt.s32.totalorder %s8690_s7, %s8690_s7 }
  0x78   : > { %p7953_p4 = scmp.lt.s32.totalorder %s7951_s23, %s7944_s16 }
  0x79   : > { %p7947_p13 = pnand %p7945_p12, %p8714_p7 }
  0x7a   : > { %p7954_p2 = por %p7953_p4, %p7952_p1 }
  0x7b   : > { %p7948_p0 = pneg %p7947_p13 }
  0x7d   : > { %p7955_p6 = pnand %p7954_p2, %p7948_p0 }
  0x7f   : > { %7958 = shalt.err (!%p7955_p6)
}
  0x80   : > { %7610 = dma.hbm_to_vmem [thread:$0]  (!%p8702_p5), %s8504_s29, 16, %s8690_s7, [#allocation6]  }
  0x81   : > { %s7959_s28 = scalar_lea.hbm %s9793_s9, 32 }
  0x82   : > { %p7960_p8 = scmp.ne.s32.totalorder %s9793_s9, %s7959_s28  ;;  %p7966_p11 = scmp.lt.u32.totalorder %s7959_s28, %s9793_s9 }
  0x84   : > { %p7962_p9 = pnand %p7960_p8, %p8714_p7 }
  0x86   : > { %p7963_p10 = pneg %p7962_p9 }
  0x88   : > { %p7968_p12 = pnand %p7966_p11, %p7963_p10 }
  0x8a   : > { %7971 = shalt.err (!%p7968_p12)
}
  0x8b   : > { %s7972_s2 = scalar_lea.vmem %s8698_s18, 32  ;;  %p7980_p1 = scmp.lt.s32.totalorder %s8698_s18, %s8698_s18 }
  0x8c   : > { %p7973_p2 = scmp.ne.s32.totalorder %s8698_s18, %s7972_s2  ;;  %p7981_p4 = scmp.lt.s32.totalorder %s7972_s2, %s7972_s2 }
  0x8e   : > { %p7975_p13 = pnand %p7973_p2, %p8714_p7  ;;  %p7982_p6 = por %p7981_p4, %p7980_p1 }
  0x90   : > { %p7976_p0 = pneg %p7975_p13 }
  0x92   : > { %p7983_p3 = pnand %p7982_p6, %p7976_p0 }
  0x94   : > { %7986 = shalt.err (!%p7983_p3)
}
  0x95   : > { %s9696_s7 = smov 16   ;;  %s8437_s16 = smov 1  }
  0x96   : > { %7616 = dma.hbm_to_vmem [thread:$0]  (!%p8702_p5), %s9793_s9, 32, %s8698_s18, [#allocation9], %s9696_s7, %s9696_s7, %s8437_s16  }
  0x97   : > { %s7987_s23 = scalar_lea.hbm %s9788_s12, 32 }
  0x98   : > { %p7988_p8 = scmp.ne.s32.totalorder %s9788_s12, %s7987_s23  ;;  %p7994_p3 = scmp.lt.u32.totalorder %s7987_s23, %s9788_s12 }
  0x9a   : > { %p7990_p9 = pnand %p7988_p8, %p8714_p7 }
  0x9c   : > { %p7991_p10 = pneg %p7990_p9 }
  0x9e   : > { %p7996_p11 = pnand %p7994_p3, %p7991_p10 }
  0xa0   : > { %7999 = shalt.err (!%p7996_p11)
}
  0xa1   : > { %s8000_s28 = scalar_lea.vmem %s8706_s26, 32  ;;  %p8008_p0 = scmp.lt.s32.totalorder %s8706_s26, %s8706_s26 }
  0xa2   : > { %p8001_p12 = scmp.ne.s32.totalorder %s8706_s26, %s8000_s28  ;;  %p8009_p1 = scmp.lt.s32.totalorder %s8000_s28, %s8000_s28 }
  0xa4   : > { %p8003_p2 = pnand %p8001_p12, %p8714_p7  ;;  %p8010_p4 = por %p8009_p1, %p8008_p0 }
  0xa6   : > { %p8004_p13 = pneg %p8003_p2 }
  0xa8   : > { %p8011_p6 = pnand %p8010_p4, %p8004_p13 }
  0xaa   : > { %8014 = shalt.err (!%p8011_p6)
}
  0xab   : > { %7622 = dma.hbm_to_vmem [thread:$0]  (!%p8702_p5), %s9788_s12, 32, %s8706_s26, [#allocation12], %s9696_s7, %s9696_s7, %s8437_s16  }
  0xac   : > { %s8015_s18 = scalar_lea.hbm %s9785_s20, 32 }
  0xad   : > { %p8016_p8 = scmp.ne.s32.totalorder %s9785_s20, %s8015_s18  ;;  %p8022_p3 = scmp.lt.u32.totalorder %s8015_s18, %s9785_s20 }
  0xaf   : > { %p8018_p9 = pnand %p8016_p8, %p8714_p7 }
  0xb1   : > { %p8019_p10 = pneg %p8018_p9 }
  0xb3   : > { %p8024_p11 = pnand %p8022_p3, %p8019_p10 }
  0xb5   : > { %8027 = shalt.err (!%p8024_p11)
}
  0xb6   : > { %s8028_s2 = scalar_lea.vmem %s1168_s1, 32  ;;  %p8036_p0 = scmp.lt.s32.totalorder %s1168_s1, %s1168_s1 }
  0xb7   : > { %p8029_p12 = scmp.ne.s32.totalorder %s1168_s1, %s8028_s2  ;;  %p8037_p1 = scmp.lt.s32.totalorder %s8028_s2, %s8028_s2 }
  0xb9   : > { %p8031_p2 = pnand %p8029_p12, %p8714_p7  ;;  %p8038_p4 = por %p8037_p1, %p8036_p0 }
  0xbb   : > { %p8032_p13 = pneg %p8031_p2 }
  0xbd   : > { %p8039_p6 = pnand %p8038_p4, %p8032_p13 }
  0xbf   : > { %8042 = shalt.err (!%p8039_p6)
}
  0xc0   : > { %7628 = dma.hbm_to_vmem [thread:$0]  (!%p8702_p5), %s9785_s20, 32, %s1168_s1, [#allocation15], %s9696_s7, %s9696_s7, %s8437_s16  }
  0xc1   : > { %s8438_s26 = smov [#allocation17]   ;;  %s8439_s28 = smov [#allocation20]  }
  0xc2   : > { %s1196_s23 = sshll.u32 %s8438_s26, 4  ;;  %s1225_s18 = sshll.u32 %s8439_s28, 4  ;;  %s1197_s23 = int_to_ptr.vmem [resolvable:$true] %s1196_s23  ;;  %s1226_s18 = int_to_ptr.vmem [resolvable:$true] %s1225_s18 }
  0xc3   : > { %s8043_s2 = scalar_lea.hbm %s9791_s4, 32 }
  0xc4   : > { %p8044_p8 = scmp.ne.s32.totalorder %s9791_s4, %s8043_s2  ;;  %p8050_p3 = scmp.lt.u32.totalorder %s8043_s2, %s9791_s4 }
  0xc6   : > { %p8046_p9 = pnand %p8044_p8, %p8714_p7 }
  0xc8   : > { %p8047_p10 = pneg %p8046_p9 }
  0xca   : > { %p8052_p11 = pnand %p8050_p3, %p8047_p10 }
  0xcc   : > { %8055 = shalt.err (!%p8052_p11)
}
  0xcd   : > { %s8056_s9 = scalar_lea.vmem %s1197_s23, 32  ;;  %p8064_p0 = scmp.lt.s32.totalorder %s1197_s23, %s1197_s23 }
  0xce   : > { %p8057_p12 = scmp.ne.s32.totalorder %s1197_s23, %s8056_s9  ;;  %p8065_p1 = scmp.lt.s32.totalorder %s8056_s9, %s8056_s9 }
  0xd0   : > { %p8059_p2 = pnand %p8057_p12, %p8714_p7  ;;  %p8066_p4 = por %p8065_p1, %p8064_p0 }
  0xd2   : > { %p8060_p13 = pneg %p8059_p2 }
  0xd4   : > { %p8067_p6 = pnand %p8066_p4, %p8060_p13 }
  0xd6   : > { %8070 = shalt.err (!%p8067_p6)
}
  0xd7   : > { %7634 = dma.hbm_to_vmem [thread:$0]  (!%p8702_p5), %s9791_s4, 32, %s1197_s23, [#allocation18], %s9696_s7, %s9696_s7, %s8437_s16  }
  0xd8   : > { %s8071_s1 = scalar_lea.hbm %s9786_s19, 32 }
  0xd9   : > { %p8072_p8 = scmp.ne.s32.totalorder %s9786_s19, %s8071_s1  ;;  %p8078_p3 = scmp.lt.u32.totalorder %s8071_s1, %s9786_s19 }
  0xdb   : > { %p8074_p9 = pnand %p8072_p8, %p8714_p7 }
  0xdd   : > { %p8075_p10 = pneg %p8074_p9 }
  0xdf   : > { %p8080_p11 = pnand %p8078_p3, %p8075_p10 }
  0xe1   : > { %8083 = shalt.err (!%p8080_p11)
}
  0xe2   : > { %s8084_s9 = scalar_lea.vmem %s1226_s18, 32  ;;  %p8092_p0 = scmp.lt.s32.totalorder %s1226_s18, %s1226_s18 }
  0xe3   : > { %p8085_p12 = scmp.ne.s32.totalorder %s1226_s18, %s8084_s9  ;;  %p8093_p1 = scmp.lt.s32.totalorder %s8084_s9, %s8084_s9 }
  0xe5   : > { %p8087_p2 = pnand %p8085_p12, %p8714_p7  ;;  %p8094_p4 = por %p8093_p1, %p8092_p0 }
  0xe7   : > { %p8088_p13 = pneg %p8087_p2 }
  0xe9   : > { %p8095_p6 = pnand %p8094_p4, %p8088_p13 }
  0xeb   : > { %8098 = shalt.err (!%p8095_p6)
}
  0xec   : > { %7640 = dma.hbm_to_vmem [thread:$0]  (!%p8702_p5), %s9786_s19, 32, %s1226_s18, [#allocation21], %s9696_s7, %s9696_s7, %s8437_s16  }
  0xed   : > { %s8440_s26 = smov [#allocation23]   ;;  %s8441_s28 = smov [#allocation3]  }
  0xee   : > { %s1254_s23 = sshll.u32 %s8440_s26, 4  ;;  %s1027_s2 = sshll.u32 %s8441_s28, 4  ;;  %s1255_s23 = int_to_ptr.vmem [resolvable:$true] %s1254_s23  ;;  %s1028_s2 = int_to_ptr.vmem [resolvable:$true] %s1027_s2 }
  0xef   : > { %s8099_s1 = scalar_lea.hbm %s9792_s3, 32 }
  0xf0   : > { %p8100_p8 = scmp.ne.s32.totalorder %s9792_s3, %s8099_s1  ;;  %p8106_p3 = scmp.lt.u32.totalorder %s8099_s1, %s9792_s3 }
  0xf2   : > { %p8102_p9 = pnand %p8100_p8, %p8714_p7 }
  0xf4   : > { %p8103_p10 = pneg %p8102_p9 }
  0xf6   : > { %p8108_p11 = pnand %p8106_p3, %p8103_p10 }
  0xf8   : > { %8111 = shalt.err (!%p8108_p11)
}
  0xf9   : > { %s8112_s9 = scalar_lea.vmem %s1255_s23, 32  ;;  %p8120_p0 = scmp.lt.s32.totalorder %s1255_s23, %s1255_s23 }
  0xfa   : > { %p8113_p12 = scmp.ne.s32.totalorder %s1255_s23, %s8112_s9  ;;  %p8121_p1 = scmp.lt.s32.totalorder %s8112_s9, %s8112_s9 }
  0xfc   : > { %p8115_p2 = pnand %p8113_p12, %p8714_p7  ;;  %p8122_p4 = por %p8121_p1, %p8120_p0 }
  0xfe   : > { %p8116_p13 = pneg %p8115_p2 }
 0x100   : > { %p8123_p6 = pnand %p8122_p4, %p8116_p13 }
 0x102   : > { %8126 = shalt.err (!%p8123_p6)
}
 0x103   : > { %7646 = dma.hbm_to_vmem [thread:$0]  (!%p8702_p5), %s9792_s3, 32, %s1255_s23, [#allocation24], %s9696_s7, %s9696_s7, %s8437_s16  }
 0x104   : > { %s8127_s18 = scalar_lea.hbm %s9782_s25, 16 }
 0x105   : > { %p8128_p8 = scmp.ne.s32.totalorder %s9782_s25, %s8127_s18  ;;  %p8134_p3 = scmp.lt.u32.totalorder %s8127_s18, %s9782_s25 }
 0x107   : > { %p8130_p9 = pnand %p8128_p8, %p8714_p7 }
 0x109   : > { %p8131_p10 = pneg %p8130_p9 }
 0x10b   : > { %p8136_p11 = pnand %p8134_p3, %p8131_p10 }
 0x10d   : > { %8139 = shalt.err (!%p8136_p11)
}
 0x10e   : > { %s8140_s26 = scalar_lea.vmem %s1028_s2, 16  ;;  %s8147_s28 = scalar_lea.vmem %s1028_s2, 32 }
 0x10f   : > { %p8141_p12 = scmp.ne.s32.totalorder %s1028_s2, %s8140_s26  ;;  %p8148_p0 = scmp.lt.s32.totalorder %s1028_s2, %s1028_s2 }
 0x110   : > { %p8149_p1 = scmp.lt.s32.totalorder %s8147_s28, %s8140_s26 }
 0x111   : > { %p8143_p2 = pnand %p8141_p12, %p8714_p7 }
 0x112   : > { %p8150_p4 = por %p8149_p1, %p8148_p0 }
 0x113   : > { %p8144_p13 = pneg %p8143_p2 }
 0x115   : > { %p8151_p6 = pnand %p8150_p4, %p8144_p13 }
 0x117   : > { %8154 = shalt.err (!%p8151_p6)
}
 0x118   : > { %7607 = dma.hbm_to_vmem [thread:$0]  (!%p8702_p5), %s9782_s25, 16, %s1028_s2, [#allocation4]  }
 0x119   : > { %s8442_s23 = smov [#allocation7]   ;;  %s8443_s9 = smov [#allocation10]  }
 0x11a   : > { %s1093_s1 = sshll.u32 %s8442_s23, 4  ;;  %s1122_s18 = sshll.u32 %s8443_s9, 4  ;;  %s1094_s1 = int_to_ptr.vmem [resolvable:$true] %s1093_s1  ;;  %s1123_s18 = int_to_ptr.vmem [resolvable:$true] %s1122_s18 }
 0x11b   : > { %s8155_s7 = scalar_lea.hbm %s9789_s11, 32 }
 0x11c   : > { %p8156_p8 = scmp.ne.s32.totalorder %s9789_s11, %s8155_s7  ;;  %p8162_p3 = scmp.lt.u32.totalorder %s8155_s7, %s9789_s11 }
 0x11e   : > { %p8158_p9 = pnand %p8156_p8, %p8714_p7 }
 0x120   : > { %p8159_p10 = pneg %p8158_p9 }
 0x122   : > { %p8164_p11 = pnand %p8162_p3, %p8159_p10 }
 0x124   : > { %8167 = shalt.err (!%p8164_p11)
}
 0x125   : > { %s8168_s26 = scalar_lea.vmem %s1094_s1, 32  ;;  %p8176_p0 = scmp.lt.s32.totalorder %s1094_s1, %s1094_s1 }
 0x126   : > { %p8169_p12 = scmp.ne.s32.totalorder %s1094_s1, %s8168_s26  ;;  %p8177_p1 = scmp.lt.s32.totalorder %s8168_s26, %s8168_s26 }
 0x128   : > { %p8171_p2 = pnand %p8169_p12, %p8714_p7  ;;  %p8178_p4 = por %p8177_p1, %p8176_p0 }
 0x12a   : > { %p8172_p13 = pneg %p8171_p2 }
 0x12c   : > { %p8179_p6 = pnand %p8178_p4, %p8172_p13 }
 0x12e   : > { %8182 = shalt.err (!%p8179_p6)
}
 0x12f   : > { %s9797_s2 = smov 16   ;;  %s8183_s7 = scalar_lea.hbm %s8597_s27, 32 }
 0x130   : > { %7613 = dma.hbm_to_vmem [thread:$0]  (!%p8702_p5), %s9789_s11, 32, %s1094_s1, [#allocation6], %s9797_s2, %s9797_s2, %s8437_s16  }
 0x131   : > { %p8184_p8 = scmp.ne.s32.totalorder %s8597_s27, %s8183_s7  ;;  %p8190_p3 = scmp.lt.u32.totalorder %s8183_s7, %s8597_s27 }
 0x133   : > { %p8186_p9 = pnand %p8184_p8, %p8714_p7 }
 0x135   : > { %p8187_p10 = pneg %p8186_p9 }
 0x137   : > { %p8192_p11 = pnand %p8190_p3, %p8187_p10 }
 0x139   : > { %8195 = shalt.err (!%p8192_p11)
}
 0x13a   : > { %s8196_s28 = scalar_lea.vmem %s1123_s18, 32  ;;  %p8204_p0 = scmp.lt.s32.totalorder %s1123_s18, %s1123_s18 }
 0x13b   : > { %p8197_p12 = scmp.ne.s32.totalorder %s1123_s18, %s8196_s28  ;;  %p8205_p1 = scmp.lt.s32.totalorder %s8196_s28, %s8196_s28 }
 0x13d   : > { %p8199_p2 = pnand %p8197_p12, %p8714_p7  ;;  %p8206_p4 = por %p8205_p1, %p8204_p0 }
 0x13f   : > { %p8200_p13 = pneg %p8199_p2 }
 0x141   : > { %p8207_p6 = pnand %p8206_p4, %p8200_p13 }
 0x143   : > { %8210 = shalt.err (!%p8207_p6)
}
 0x144   : > { %7619 = dma.hbm_to_vmem [thread:$0]  (!%p8702_p5), %s8597_s27, 32, %s1123_s18, [#allocation9], %s9797_s2, %s9797_s2, %s8437_s16  }
 0x145   : > { %s8444_s23 = smov [#allocation13]   ;;  %s8445_s9 = smov [#allocation16]  }
 0x146   : > { %s1151_s1 = sshll.u32 %s8444_s23, 4  ;;  %s1183_s26 = sshll.u32 %s8445_s9, 4  ;;  %s1152_s1 = int_to_ptr.vmem [resolvable:$true] %s1151_s1  ;;  %s1184_s26 = int_to_ptr.vmem [resolvable:$true] %s1183_s26 }
 0x147   : > { %s8211_s7 = scalar_lea.hbm %s9790_s6, 32 }
 0x148   : > { %p8212_p8 = scmp.ne.s32.totalorder %s9790_s6, %s8211_s7  ;;  %p8218_p3 = scmp.lt.u32.totalorder %s8211_s7, %s9790_s6 }
 0x14a   : > { %p8214_p9 = pnand %p8212_p8, %p8714_p7 }
 0x14c   : > { %p8215_p10 = pneg %p8214_p9 }
 0x14e   : > { %p8220_p11 = pnand %p8218_p3, %p8215_p10 }
 0x150   : > { %8223 = shalt.err (!%p8220_p11)
}
 0x151   : > { %s8224_s28 = scalar_lea.vmem %s1152_s1, 32  ;;  %p8232_p0 = scmp.lt.s32.totalorder %s1152_s1, %s1152_s1 }
 0x152   : > { %p8225_p12 = scmp.ne.s32.totalorder %s1152_s1, %s8224_s28  ;;  %p8233_p1 = scmp.lt.s32.totalorder %s8224_s28, %s8224_s28 }
 0x154   : > { %p8227_p2 = pnand %p8225_p12, %p8714_p7  ;;  %p8234_p4 = por %p8233_p1, %p8232_p0 }
 0x156   : > { %p8228_p13 = pneg %p8227_p2 }
 0x158   : > { %p8235_p6 = pnand %p8234_p4, %p8228_p13 }
 0x15a   : > { %8238 = shalt.err (!%p8235_p6)
}
 0x15b   : > { %7625 = dma.hbm_to_vmem [thread:$0]  (!%p8702_p5), %s9790_s6, 32, %s1152_s1, [#allocation12], %s9797_s2, %s9797_s2, %s8437_s16  }
 0x15c   : > { %s8239_s18 = scalar_lea.hbm %s8632_s30, 32 }
 0x15d   : > { %p8240_p8 = scmp.ne.s32.totalorder %s8632_s30, %s8239_s18  ;;  %p8246_p3 = scmp.lt.u32.totalorder %s8239_s18, %s8632_s30 }
 0x15f   : > { %p8242_p9 = pnand %p8240_p8, %p8714_p7 }
 0x161   : > { %p8243_p10 = pneg %p8242_p9 }
 0x163   : > { %p8248_p11 = pnand %p8246_p3, %p8243_p10 }
 0x165   : > { %8251 = shalt.err (!%p8248_p11)
}
 0x166   : > { %s8252_s23 = scalar_lea.vmem %s1184_s26, 32  ;;  %p8260_p0 = scmp.lt.s32.totalorder %s1184_s26, %s1184_s26 }
 0x167   : > { %p8253_p12 = scmp.ne.s32.totalorder %s1184_s26, %s8252_s23  ;;  %p8261_p1 = scmp.lt.s32.totalorder %s8252_s23, %s8252_s23 }
 0x169   : > { %p8255_p2 = pnand %p8253_p12, %p8714_p7  ;;  %p8262_p4 = por %p8261_p1, %p8260_p0 }
 0x16b   : > { %p8256_p13 = pneg %p8255_p2 }
 0x16d   : > { %p8263_p6 = pnand %p8262_p4, %p8256_p13 }
 0x16f   : > { %8266 = shalt.err (!%p8263_p6)
}
 0x170   : > { %7631 = dma.hbm_to_vmem [thread:$0]  (!%p8702_p5), %s8632_s30, 32, %s1184_s26, [#allocation15], %s9797_s2, %s9797_s2, %s8437_s16  }
 0x171   : > { %s8446_s1 = smov [#allocation19]   ;;  %s8447_s7 = smov [#allocation22]  }
 0x172   : > { %s1209_s9 = sshll.u32 %s8446_s1, 4  ;;  %s1241_s28 = sshll.u32 %s8447_s7, 4  ;;  %s1210_s9 = int_to_ptr.vmem [resolvable:$true] %s1209_s9  ;;  %s1242_s28 = int_to_ptr.vmem [resolvable:$true] %s1241_s28 }
 0x173   : > { %s8267_s18 = scalar_lea.hbm %s9783_s24, 32 }
 0x174   : > { %p8268_p8 = scmp.ne.s32.totalorder %s9783_s24, %s8267_s18  ;;  %p8274_p3 = scmp.lt.u32.totalorder %s8267_s18, %s9783_s24 }
 0x176   : > { %p8270_p9 = pnand %p8268_p8, %p8714_p7 }
 0x178   : > { %p8271_p10 = pneg %p8270_p9 }
 0x17a   : > { %p8276_p11 = pnand %p8274_p3, %p8271_p10 }
 0x17c   : > { %8279 = shalt.err (!%p8276_p11)
}
 0x17d   : > { %s8280_s23 = scalar_lea.vmem %s1210_s9, 32  ;;  %p8288_p0 = scmp.lt.s32.totalorder %s1210_s9, %s1210_s9 }
 0x17e   : > { %p8281_p12 = scmp.ne.s32.totalorder %s1210_s9, %s8280_s23  ;;  %p8289_p1 = scmp.lt.s32.totalorder %s8280_s23, %s8280_s23 }
 0x180   : > { %p8283_p2 = pnand %p8281_p12, %p8714_p7  ;;  %p8290_p4 = por %p8289_p1, %p8288_p0 }
 0x182   : > { %p8284_p13 = pneg %p8283_p2 }
 0x184   : > { %p8291_p6 = pnand %p8290_p4, %p8284_p13 }
 0x186   : > { %8294 = shalt.err (!%p8291_p6)
}
 0x187   : > { %7637 = dma.hbm_to_vmem [thread:$0]  (!%p8702_p5), %s9783_s24, 32, %s1210_s9, [#allocation18], %s9797_s2, %s9797_s2, %s8437_s16  }
 0x188   : > { %s8295_s26 = scalar_lea.hbm %s9784_s21, 32 }
 0x189   : > { %p8296_p8 = scmp.ne.s32.totalorder %s9784_s21, %s8295_s26  ;;  %p8302_p3 = scmp.lt.u32.totalorder %s8295_s26, %s9784_s21 }
 0x18b   : > { %p8298_p9 = pnand %p8296_p8, %p8714_p7 }
 0x18d   : > { %p8299_p10 = pneg %p8298_p9 }
 0x18f   : > { %p8304_p11 = pnand %p8302_p3, %p8299_p10 }
 0x191   : > { %8307 = shalt.err (!%p8304_p11)
}
 0x192   : > { %s8308_s1 = scalar_lea.vmem %s1242_s28, 32  ;;  %p8316_p0 = scmp.lt.s32.totalorder %s1242_s28, %s1242_s28 }
 0x193   : > { %p8309_p12 = scmp.ne.s32.totalorder %s1242_s28, %s8308_s1  ;;  %p8317_p1 = scmp.lt.s32.totalorder %s8308_s1, %s8308_s1 }
 0x195   : > { %p8311_p2 = pnand %p8309_p12, %p8714_p7  ;;  %p8318_p4 = por %p8317_p1, %p8316_p0 }
 0x197   : > { %p8312_p13 = pneg %p8311_p2 }
 0x199   : > { %p8319_p6 = pnand %p8318_p4, %p8312_p13 }
 0x19b   : > { %8322 = shalt.err (!%p8319_p6)
}
 0x19c   : > { %7643 = dma.hbm_to_vmem [thread:$0]  (!%p8702_p5), %s9784_s21, 32, %s1242_s28, [#allocation21], %s9797_s2, %s9797_s2, %s8437_s16  }
 0x19d   : > { %s8448_s9 = smov [#allocation25]   ;;  %s8323_s18 = scalar_lea.hbm %s9787_s14, 32 }
 0x19e   : > { %s1267_s7 = sshll.u32 %s8448_s9, 4  ;;  %p8324_p8 = scmp.ne.s32.totalorder %s9787_s14, %s8323_s18  ;;  %s1268_s7 = int_to_ptr.vmem [resolvable:$true] %s1267_s7 }
 0x19f   : > { %p8330_p3 = scmp.lt.u32.totalorder %s8323_s18, %s9787_s14 }
 0x1a0   : > { %p8326_p9 = pnand %p8324_p8, %p8714_p7 }
 0x1a2   : > { %p8327_p10 = pneg %p8326_p9 }
 0x1a4   : > { %p8332_p11 = pnand %p8330_p3, %p8327_p10 }
 0x1a6   : > { %8335 = shalt.err (!%p8332_p11)
}
 0x1a7   : > { %s8336_s23 = scalar_lea.vmem %s1268_s7, 32  ;;  %p8344_p0 = scmp.lt.s32.totalorder %s1268_s7, %s1268_s7 }
 0x1a8   : > { %p8337_p12 = scmp.ne.s32.totalorder %s1268_s7, %s8336_s23  ;;  %p8345_p1 = scmp.lt.s32.totalorder %s8336_s23, %s8336_s23 }
 0x1aa   : > { %p8339_p2 = pnand %p8337_p12, %p8714_p7  ;;  %p8346_p4 = por %p8345_p1, %p8344_p0 }
 0x1ac   : > { %p8340_p13 = pneg %p8339_p2 }
 0x1ae   : > { %p8347_p6 = pnand %p8346_p4, %p8340_p13 }
 0x1b0   : > { %8350 = shalt.err (!%p8347_p6)
}
 0x1b1   : > { %7649 = dma.hbm_to_vmem [thread:$0]  (!%p8702_p5), %s9787_s14, 32, %s1268_s7, [#allocation24], %s9797_s2, %s9797_s2, %s8437_s16  }
 0x1b2   : > { %p9798_p8 = scmp.ne.s32.totalorder %s9794_s15, 0 }
 0x1b3   : > { %p9799_p9 = scmp.eq.s32.totalorder (!%p9798_p8), %s8685_s10, 0 }
 0x1b4   : > { %1297 = sbr.rel (%p9798_p8) target bundleno = 13044 (0x32f4), region = 184 }
 0x1bb   : > { %8356 = dma.done.wait (%p9799_p9), [#allocation4], 16   ;;  %p9800_p7 = pmov %p9799_p9 }
 0x1bd   : > { %8358 = vsyncadd (%p9800_p7), [#allocation4], 4294967280  ;;  %p9801_p10 = pmov %p9800_p7 }
 0x1be   : > { %p9802_p3 = pmov %p9800_p7 }
 0x1bf   : > { %8360 = dma.done.wait (%p9801_p10), [#allocation6], 48  }
 0x1c0   : > { %8362 = vsyncadd (%p9802_p3), [#allocation6], 4294967248  ;;  %p9803_p11 = pmov %p9802_p3 }
 0x1c1   : > { %p9804_p5 = pmov %p9802_p3 }
 0x1c2   : > { %8364 = dma.done.wait (%p9803_p11), [#allocation9], 64  }
 0x1c3   : > { %8366 = vsyncadd (%p9804_p5), [#allocation9], 4294967232  ;;  %p9805_p12 = pmov %p9802_p3 }
 0x1c4   : > { %p9806_p2 = pmov %p9802_p3 }
 0x1c5   : > { %8368 = dma.done.wait (%p9805_p12), [#allocation12], 64  }
 0x1c6   : > { %8370 = vsyncadd (%p9806_p2), [#allocation12], 4294967232  ;;  %p9807_p13 = pmov %p9806_p2 }
 0x1c7   : > { %p9808_p0 = pmov %p9806_p2 }
 0x1c8   : > { %8372 = dma.done.wait (%p9807_p13), [#allocation15], 64  }
 0x1c9   : > { %8374 = vsyncadd (%p9808_p0), [#allocation15], 4294967232  ;;  %p9809_p1 = pmov %p9808_p0 }
 0x1ca   : > { %p9810_p4 = pmov %p9808_p0 }
 0x1cb   : > { %8376 = dma.done.wait (%p9809_p1), [#allocation18], 64  }
 0x1cc   : > { %8378 = vsyncadd (%p9810_p4), [#allocation18], 4294967232  ;;  %p9811_p6 = pmov %p9808_p0 }
 0x1cd   : > { %p9812_p8 = pmov %p9808_p0 }
 0x1ce   : > { %8380 = dma.done.wait (%p9811_p6), [#allocation21], 64  }
 0x1cf   : > { %8382 = vsyncadd (%p9812_p8), [#allocation21], 4294967232  ;;  %p9813_p9 = pmov %p9808_p0 }
 0x1d0   : > { %p9814_p7 = pmov %p9808_p0 }
 0x1d1   : > { %8384 = dma.done.wait (%p9813_p9), [#allocation24], 64  }
 0x1d2   : > { %8386 = vsyncadd (%p9814_p7), [#allocation24], 4294967232  ;;  %s9815_s5 = sld [smem:[#allocation34_spill]]  ;;  %s9816_s17 = sld [smem:[#allocation37_spill]]  ;;  %v8449_v1 = vmov 0.0   ;;  %vm8450_vm0 = vmmov 0  }
 0x1d3   : > { %p1455_p10 = scmp.lt.s32.totalorder %s8685_s10, 1  ;;  %7037 = vmatprep.subr.mxu1 %v8449_v1  ;;  %s9817_s15 = sld [smem:[#allocation41_spill]]  ;;  %7039 = vmatprep.mubr.msk.f32.mxu1 %vm8450_vm0, %v8449_v1  ;;  %vm1481_vm1 = vcmask 1043456   ;;  %vm1477_vm2 = vcmask 31744   ;;  %vm1604_vm3 = vcmask 261120   ;;  %vm1652_vm4 = vcmask 64512  }
 0x1d4   : > { %7050 = vmatprep.subr.bf16.mxu0 %v8449_v1  ;;  %7052 = vmatprep.mubr.msk.bf16.mxu0 %vm8450_vm0, %v8449_v1  ;;  %s9818_s0 = sld [smem:[#allocation38_spill]]  ;;  %s9819_s2 = sld [smem:[#allocation36_spill]]  ;;  %vm2102_vm5 = vcmask 130048   ;;  %vm2104_vm6 = vcmask 195584   ;;  %vm2291_vm7 = vcmask 523264   ;;  %vm3188_vm8 = vcmask 1040384  }
 0x1d5   : > { %s9855_s10 = smov (!%p1455_p10, %s8685_s10), 1  ;;  %s9820_s28 = sld [smem:[#allocation42_spill]]  ;;  %vm3184_vm9 = vcmask 7168  }
 0x1d6   : > { %s8964_s22 = sshll.u32 %s9855_s10, 3  ;;  %s9718_s10 = smov 120  }
 0x1d7   : > { %s9722_s26 = smov 96   ;;  %s9714_s1 = smov 80  }
 0x1d8   : > { %s1458_s16 = scalar_lea.vmem %s9815_s5, %s8964_s22  ;;  %v1469_v2 = vld [vmem:[%s9816_s17] sm:$0xf]  ;;  %s9724_s9 = smov 88  }
 0x1d9   : > { %v1468_v3 = vld [vmem:[%s1458_s16] sm:$0xff]  ;;  %7038 = vmatpush3.msk.msra.mxu1 %vm1481_vm1, %v1469_v2  ;;  %v7764_v5 = vld [vmem:[%s9817_s15 + $0x8] sm:$0xff]   ;;  %s9698_s7 = smov 72   ;;  %s9720_s18 = smov 112  }
 0x1da   : > { %7040 = vmatmul.mubr.msk.f32.vlgmr.msra.gmra.mrb[0].mxu1 %vm1477_vm2, %v1468_v3  ;;  %7042 = vmatprep.subr.bf16.mxu1 %v8449_v1  ;;  %v7763_v4 = vld [vmem:[%s9817_s15] sm:$0xff]   ;;  %s9716_s23 = smov 104   ;;  %s9704_s16 = smov 64  }
 0x1db   : > { %7046 = vmatprep.mubr.msk.bf16.mxu1 %vm8450_vm0, %v8449_v1  ;;  %7043 = vmatpush3.bf16.msra.mxu1 %v7763_v4  ;;  %v6624_v6 = vld [vmem:[%s9818_s0] ss:$0 sm:$0xff]  ;;  %s9708_s0 = smov 56   ;;  %s9831_s3 = smov 88  }
 0x1dc   : > { %7044 = vmatprep.subr.bf16.mxu1 %v8449_v1  ;;  %v1555_v8 = vld [vmem:[%s9819_s2] sm:$0xff]  ;;  %s9702_s2 = smov 40   ;;  %s9832_s4 = smov 96  }
 0x1dd   : > { %v6627_v13 = vld [vmem:[%s9820_s28] ss:$0 sm:$0xff]  ;;  %s9833_s5 = smov 112   ;;  %s9834_s6 = smov 120  }
 0x1de   : > { %s9835_s11 = smov 104   ;;  %s9836_s12 = smov 80  }
 0x1df   : > { %7045 = vmatpush3.bf16.msra.mxu1 %v7764_v5  ;;  %s9837_s14 = smov 72   ;;  %s9839_s17 = smov 64  }
 0x1e0   : > { %7056 = vmatprep.subr.bf16.mxu1 %v8449_v1  ;;  %s9840_s19 = smov 40   ;;  %s9841_s20 = smov 48  }
 0x1e1   : > { %s9842_s21 = smov 8   ;;  %s9843_s24 = smov 16  }
 0x1e2   : > { %s9844_s25 = smov 24  }
 0x2ad   : > { %v1551_v7 = vpop.f32.mrb[0].mxu1 }
 0x2ae   : > { %v1552_v9 = vadd.f32 %v6624_v6, %v1551_v7  ;;  %v7041_v10 = vpop.f32.mrb[1].mxu1 }
 0x2b0   : > { %v8979_v11 = vadd.f32 %v1555_v8, %v1552_v9 }
 0x2b2   : > { %v1585_v12 = vpack.c.bf16 %v8979_v11, %v8979_v11 }
 0x2b4   : > { %7047 = vmatmul.mubr.msk.bf16.vlgmr.msra.gmra.mrb[4].mxu1 %vm1604_vm3, %v1585_v12 }
 0x2b5   : > { %7058 = vmatprep.mubr.msk.bf16.mxu1 %vm8450_vm0, %v8449_v1 }
 0x387   : > { %v1642_v14 = vpop.f32.mrb[4].mxu1 }
 0x388   : > { %v1643_v15 = vadd.f32 %v6627_v13, %v1642_v14  ;;  %v7048_v16 = vpop.f32.mrb[5].mxu1 }
 0x389   : > { %v1645_v17 = vpop.f32.mrb[6].mxu1 }
 0x38a   : > { %v8987_v18 = vpack.c.bf16 %v1643_v15, %v1643_v15  ;;  %v7049_v19 = vpop.f32.mrb[7].mxu1 }
 0x38c   : > { %1759 = vrot.lane.b32.xlu1 %v8987_v18, %s9718_s10  ;;  %1650 = vrot.lane.b32.xlu0 %v8987_v18, %s9722_s26  ;;  %s9827_s10 = sld [smem:[#allocation48_spill]]  ;;  %s9829_s26 = sld [smem:[#allocation51_spill]] }
 0x390   : > { %1871 = vrot.lane.b32.xlu1 %v8987_v18, %s9714_s1  ;;  %1761 = vrot.lane.b32.xlu0 %v8987_v18, %s9724_s9  ;;  %s9825_s1 = sld [smem:[#allocation45_spill]]  ;;  %s9830_s9 = sld [smem:[#allocation52_spill]] }
 0x394   : > { %1981 = vrot.lane.b32.xlu1 %v8987_v18, %s9698_s7  ;;  %1869 = vrot.lane.b32.xlu0 %v8987_v18, %s9720_s18  ;;  %s9700_s7 = smov 48   ;;  %s9828_s18 = sld [smem:[#allocation50_spill]] }
 0x398   : > { %1979 = vrot.lane.b32.xlu0 %v8987_v18, %s9716_s23  ;;  %s9826_s23 = sld [smem:[#allocation46_spill]] }
 0x3fe   : > { %v1651_v20 = vpop.permute.xlu0 %1650  ;;  %v1760_v23 = vpop.permute.xlu1 %1759 }
 0x3ff   : > { %v1657_v21 = vsel %vm1652_vm4, %v1651_v20, 0 }
 0x400   : > { %7051 = vmatpush3.bf16.xpose.msra.mxu0 %v1657_v21 }
 0x401   : > { %7062 = vmatprep.subr.bf16.mxu0 %v8449_v1 }
 0x402   : > { %v1762_v22 = vpop.permute.xlu0 %1761  ;;  %v1872_v25 = vpop.permute.xlu1 %1871 }
 0x403   : > { %v1767_v24 = vsel %vm1652_vm4, %v1762_v22, 0  ;;  %v1877_v26 = vsel %vm1652_vm4, %v1872_v25, 0 }
 0x406   : > { %v1982_v27 = vpop.permute.xlu1 %1981  ;;  %v1870_v28 = vpop.permute.xlu0 %1869 }
 0x407   : > { %7053 = vmatmul.mubr.msk.bf16.vlgmr.msra.gmra.mrb[0].mxu0 %vm1652_vm4, %v8987_v18  ;;  %v1987_v29 = vsel %vm1652_vm4, %v1982_v27, 0 }
 0x408   : > { %7063 = vmatpush3.bf16.xpose.msra.mxu0 %v1767_v24  ;;  %7064 = vmatprep.mubr.msk.bf16.mxu0 %vm8450_vm0, %v8449_v1 }
 0x409   : > { %7074 = vmatprep.subr.bf16.mxu0 %v8449_v1 }
 0x40a   : > { %v1980_v30 = vpop.permute.xlu0 %1979 }
 0x40f   : > { %7065 = vmatmul.mubr.msk.bf16.vlgmr.msra.gmra.mrb[4].mxu0 %vm1652_vm4, %v1760_v23 }
 0x410   : > { %7075 = vmatpush3.bf16.xpose.msra.mxu0 %v1877_v26  ;;  %7076 = vmatprep.mubr.msk.bf16.mxu0 %vm8450_vm0, %v8449_v1 }
 0x411   : > { %7086 = vmatprep.subr.bf16.mxu0 %v8449_v1 }
 0x417   : > { %7077 = vmatmul.mubr.msk.bf16.vlgmr.msra.gmra.mrb[8].mxu0 %vm1652_vm4, %v1870_v28 }
 0x418   : > { %7087 = vmatpush3.bf16.xpose.msra.mxu0 %v1987_v29  ;;  %7088 = vmatprep.mubr.msk.bf16.mxu0 %vm8450_vm0, %v8449_v1 }
 0x419   : > { %7098 = vmatprep.subr.bf16.mxu0 %v8449_v1 }
 0x41f   : > { %7089 = vmatmul.mubr.msk.bf16.vlgmr.msra.gmra.mrb[12].mxu0 %vm1652_vm4, %v1980_v30 }
 0x420   : > { %7102 = vmatprep.mubr.msk.bf16.mxu0 %vm8450_vm0, %v8449_v1 }
 0x4da   : > { %v1693_v31 = vpop.f32.mrb[0].mxu0 }
 0x4db   : > { %v7054_v32 = vpop.f32.mrb[1].mxu0  ;;  %v1699_v33 = vsel %vm1652_vm4, %v1693_v31, -inf }
 0x4dc   : > { %1700 = vmax.xlane.f32.xlu1 %v1699_v33  ;;  %v1696_v34 = vpop.f32.mrb[2].mxu0 }
 0x4dd   : > { %v7055_v35 = vpop.f32.mrb[3].mxu0 }
 0x4e2   : > { %v1803_v36 = vpop.f32.mrb[4].mxu0 }
 0x4e3   : > { %v7066_v37 = vpop.f32.mrb[5].mxu0  ;;  %v1809_v38 = vsel %vm1652_vm4, %v1803_v36, -inf }
 0x4e4   : > { %1810 = vmax.xlane.f32.xlu0 %v1809_v38  ;;  %v1806_v39 = vpop.f32.mrb[6].mxu0 }
 0x4e5   : > { %v7067_v40 = vpop.f32.mrb[7].mxu0 }
 0x4ea   : > { %v1913_v41 = vpop.f32.mrb[8].mxu0 }
 0x4eb   : > { %v7078_v42 = vpop.f32.mrb[9].mxu0  ;;  %v1919_v43 = vsel %vm1652_vm4, %v1913_v41, -inf }
 0x4ec   : > { %1920 = vmax.xlane.f32.xlu0 %v1919_v43  ;;  %v1916_v44 = vpop.f32.mrb[10].mxu0 }
 0x4ed   : > { %1819 = vrot.lane.b32.xlu1 %v8987_v18, %s9708_s0  ;;  %v7079_v45 = vpop.f32.mrb[11].mxu0  ;;  %s9822_s0 = sld [smem:[#allocation44_spill]] }
 0x4f2   : > { %v2023_v46 = vpop.f32.mrb[12].mxu0 }
 0x4f3   : > { %v7090_v47 = vpop.f32.mrb[13].mxu0  ;;  %v2029_v50 = vsel %vm1652_vm4, %v2023_v46, -inf }
 0x4f4   : > { %v2026_v48 = vpop.f32.mrb[14].mxu0 }
 0x4f5   : > { %v7091_v49 = vpop.f32.mrb[15].mxu0 }
 0x502   : > { %1709 = vrot.lane.b32.xlu0 %v8987_v18, %s9704_s16  ;;  %s9712_s16 = smov 16  }
 0x506   : > { %2039 = vrot.lane.b32.xlu0 %v8987_v18, %s9702_s2  ;;  %s9706_s2 = smov 8  }
 0x511   : > { %2030 = vmax.xlane.f32.xlu1 %v2029_v50 }
 0x522   : > { %1929 = vrot.lane.b32.xlu1 %v8987_v18, %s9700_s7  ;;  %s9821_s7 = sld [smem:[#allocation43_spill]] }
 0x528   : > { %v7765_v33 = vld [vmem:[%s9821_s7] sm:$0xff]   ;;  %v7766_v35 = vld [vmem:[%s9821_s7 + $0x8] sm:$0xff]  }
 0x529   : > { %7099 = vmatpush3.bf16.msra.mxu0 %v7765_v33 }
 0x52a   : > { %7100 = vmatprep.subr.bf16.mxu0 %v8449_v1 }
 0x52d   : > { %7101 = vmatpush3.bf16.msra.mxu0 %v7766_v35 }
 0x52e   : > { %7114 = vmatprep.subr.bf16.mxu0 %v8449_v1 }
 0x569   : > { %v1701_v51 = vpop.xlane.xlu1 %1700 }
 0x56a   : > { %v1702_v52 = vsub.f32 %v1693_v31, %v1701_v51 }
 0x56c   : > { %v1703_v53 = vmul.f32 1.442695, %v1702_v52 }
 0x56d   : > { %v1820_v63 = vpop.permute.xlu1 %1819 }
 0x56e   : > { %7815 = vpow2.f32 %v1703_v53  ;;  %v1825_v4 = vsel %vm1481_vm1, %v1820_v63, 0 }
 0x571   : > { %v1811_v54 = vpop.xlane.xlu0 %1810 }
 0x572   : > { %v1812_v55 = vsub.f32 %v1803_v36, %v1811_v54 }
 0x574   : > { %v1813_v56 = vmul.f32 1.442695, %v1812_v55 }
 0x576   : > { %7817 = vpow2.f32 %v1813_v56 }
 0x578   : > { %v7816_v60 = vpop.eup %7815 }
 0x579   : > { %v1921_v57 = vpop.xlane.xlu0 %1920  ;;  %v1708_v2 = vpack.c.bf16 %v7816_v60, %v7816_v60  ;;  %v1705_v5 = vsel %vm1652_vm4, %v7816_v60, 0.0 }
 0x57a   : > { %v1922_v58 = vsub.f32 %v1913_v41, %v1921_v57 }
 0x57c   : > { %v1923_v59 = vmul.f32 1.442695, %v1922_v58  ;;  %v6639_v58 = vld [vmem:[%s9822_s0] ss:$0 sm:$0xff] }
 0x57d   : > { %v1710_v61 = vpop.permute.xlu0 %1709 }
 0x57e   : > { %7819 = vpow2.f32 %v1923_v59  ;;  %v1715_v62 = vsel %vm1481_vm1, %v1710_v61, 0 }
 0x57f   : > { %7057 = vmatpush3.bf16.msra.mxu1 %v1715_v62 }
 0x580   : > { %v7818_v0 = vpop.eup %7817  ;;  %7068 = vmatprep.subr.bf16.mxu1 %v8449_v1 }
 0x581   : > { %v1815_v3 = vsel %vm1652_vm4, %v7818_v0, 0.0  ;;  %v1818_v7 = vpack.c.bf16 %v7818_v0, %v7818_v0  ;;  %v2040_v15 = vpop.permute.xlu0 %2039 }
 0x582   : > { %1816 = vadd.xlane.f32.xlu1 %v1815_v3  ;;  %7059 = vmatmul.mubr.msk.bf16.vlgmr.msra.gmra.mrb[8].mxu1 %vm1652_vm4, %v1708_v2  ;;  %v2045_v17 = vsel %vm1481_vm1, %v2040_v15, 0 }
 0x583   : > { %7069 = vmatpush3.bf16.msra.mxu1 %v1825_v4  ;;  %7070 = vmatprep.mubr.msk.bf16.mxu1 %vm8450_vm0, %v8449_v1 }
 0x584   : > { %7080 = vmatprep.subr.bf16.mxu1 %v8449_v1 }
 0x586   : > { %1706 = vadd.xlane.f32.xlu1 %v1705_v5 }
 0x588   : > { %v7820_v6 = vpop.eup %7819 }
 0x589   : > { %v1925_v8 = vsel %vm1652_vm4, %v7820_v6, 0.0  ;;  %v1928_v16 = vpack.c.bf16 %v7820_v6, %v7820_v6 }
 0x58a   : > { %1926 = vadd.xlane.f32.xlu0 %v1925_v8  ;;  %7071 = vmatmul.mubr.msk.bf16.vlgmr.msra.gmra.mrb[12].mxu1 %vm1652_vm4, %v1818_v7 }
 0x58b   : > { %7082 = vmatprep.mubr.msk.bf16.mxu1 %vm8450_vm0, %v8449_v1 }
 0x59e   : > { %v2031_v9 = vpop.xlane.xlu1 %2030 }
 0x59f   : > { %v2032_v10 = vsub.f32 %v2023_v46, %v2031_v9 }
 0x5a1   : > { %v2033_v12 = vmul.f32 1.442695, %v2032_v10 }
 0x5a2   : > { %v1930_v13 = vpop.permute.xlu1 %1929 }
 0x5a3   : > { %7821 = vpow2.f32 %v2033_v12  ;;  %v1935_v14 = vsel %vm1481_vm1, %v1930_v13, 0 }
 0x5a4   : > { %7081 = vmatpush3.bf16.msra.mxu1 %v1935_v14 }
 0x5a5   : > { %7092 = vmatprep.subr.bf16.mxu1 %v8449_v1 }
 0x5a7   : > { %7083 = vmatmul.mubr.msk.bf16.vlgmr.msra.gmra.mrb[16].mxu1 %vm1652_vm4, %v1928_v16  ;;  %v6643_v16 = vld [vmem:[%s9825_s1] ss:$0 sm:$0xff] }
 0x5a8   : > { %7093 = vmatpush3.bf16.msra.mxu1 %v2045_v17  ;;  %7094 = vmatprep.mubr.msk.bf16.mxu1 %vm8450_vm0, %v8449_v1 }
 0x5a9   : > { %7106 = vmatprep.subr.bf16.mxu1 %v8449_v1 }
 0x5ad   : > { %v7822_v18 = vpop.eup %7821 }
 0x5ae   : > { %v2035_v19 = vsel %vm1652_vm4, %v7822_v18, 0.0  ;;  %v2038_v20 = vpack.c.bf16 %v7822_v18, %v7822_v18  ;;  %v6644_v18 = vld [vmem:[%s9826_s23] ss:$0 sm:$0xff] }
 0x5af   : > { %2036 = vadd.xlane.f32.xlu0 %v2035_v19 }
 0x5b0   : > { %7095 = vmatmul.mubr.msk.bf16.vlgmr.msra.gmra.mrb[20].mxu1 %vm1652_vm4, %v2038_v20 }
 0x5b1   : > { %7110 = vmatprep.mubr.msk.bf16.mxu1 %vm8450_vm0, %v8449_v1 }
 0x60f   : > { %v1817_v21 = vpop.xlane.xlu1 %1816 }
 0x610   : > { %7823 = vrcp.f32 %v1817_v21 }
 0x613   : > { %v1707_v48 = vpop.xlane.xlu1 %1706 }
 0x617   : > { %v1927_v32 = vpop.xlane.xlu0 %1926 }
 0x618   : > { %7825 = vrcp.f32 %v1927_v32  ;;  %v6649_v32 = vld [vmem:[%s9828_s18] ss:$0 sm:$0xff] }
 0x61a   : > { %v7824_v26 = vpop.eup %7823 }
 0x622   : > { %v7826_v36 = vpop.eup %7825 }
 0x63c   : > { %v2037_v34 = vpop.xlane.xlu0 %2036 }
 0x63d   : > { %7827 = vrcp.f32 %v2037_v34 }
 0x63e   : > { %7829 = vrcp.f32 %v1707_v48 }
 0x647   : > { %v7828_v42 = vpop.eup %7827 }
 0x648   : > { %v7830_v49 = vpop.eup %7829 }
 0x655   : > { %v1751_v22 = vpop.f32.mrb[8].mxu1 }
 0x656   : > { %v7060_v23 = vpop.f32.mrb[9].mxu1  ;;  %v1758_v52 = vmul.f32 %v7830_v49, %v1751_v22 }
 0x657   : > { %v1754_v24 = vpop.f32.mrb[10].mxu1 }
 0x658   : > { %v7061_v25 = vpop.f32.mrb[11].mxu1  ;;  %v6645_v24 = vld [vmem:[%s9827_s10] ss:$0 sm:$0xff] }
 0x65d   : > { %v1861_v27 = vpop.f32.mrb[12].mxu1 }
 0x65e   : > { %v1868_v28 = vmul.f32 %v7824_v26, %v1861_v27  ;;  %v7072_v29 = vpop.f32.mrb[13].mxu1 }
 0x65f   : > { %v1864_v30 = vpop.f32.mrb[14].mxu1 }
 0x660   : > { %2090 = vrot.lane.b32.xlu0 %v1868_v28, %s9706_s2  ;;  %v7073_v31 = vpop.f32.mrb[15].mxu1  ;;  %s9710_s2 = smov 24  }
 0x67a   : > { %v1971_v37 = vpop.f32.mrb[16].mxu1 }
 0x67b   : > { %v1978_v38 = vmul.f32 %v7826_v36, %v1971_v37  ;;  %v7084_v39 = vpop.f32.mrb[17].mxu1 }
 0x67c   : > { %v1974_v40 = vpop.f32.mrb[18].mxu1 }
 0x67d   : > { %2094 = vrot.lane.b32.xlu1 %v1978_v38, %s9712_s16  ;;  %v7085_v41 = vpop.f32.mrb[19].mxu1  ;;  %s9824_s16 = sld [smem:[#allocation49_spill]] }
 0x683   : > { %v2081_v43 = vpop.f32.mrb[20].mxu1  ;;  %v7770_v10 = vld [vmem:[%s9824_s16 + $0x8] sm:$0xff]   ;;  %v7771_v22 = vld [vmem:[%s9824_s16 + $0x10] sm:$0xff]   ;;  %v7772_v23 = vld [vmem:[%s9824_s16 + $0x18] sm:$0xff]  }
 0x684   : > { %v2088_v44 = vmul.f32 %v7828_v42, %v2081_v43  ;;  %v7096_v45 = vpop.f32.mrb[21].mxu1 }
 0x685   : > { %v2084_v46 = vpop.f32.mrb[22].mxu1  ;;  %v7773_v45 = vld [vmem:[%s9817_s15 + $0x10] sm:$0xff]  }
 0x686   : > { %2098 = vrot.lane.b32.xlu1 %v2088_v44, %s9710_s2  ;;  %v7097_v47 = vpop.f32.mrb[23].mxu1  ;;  %s9823_s2 = sld [smem:[#allocation47_spill]]  ;;  %v7774_v46 = vld [vmem:[%s9817_s15 + $0x18] sm:$0xff]   ;;  %s9838_s15 = smov 56  }
 0x68c   : > { %v7767_v8 = vld [vmem:[%s9823_s2] sm:$0xff]   ;;  %v7768_v9 = vld [vmem:[%s9823_s2 + $0x8] sm:$0xff]  }
 0x68d   : > { %7107 = vmatpush3.bf16.msra.mxu1 %v7767_v8 }
 0x68e   : > { %7108 = vmatprep.subr.bf16.mxu1 %v8449_v1 }
 0x691   : > { %7109 = vmatpush3.bf16.msra.mxu1 %v7768_v9 }
 0x692   : > { %7126 = vmatprep.subr.bf16.mxu1 %v8449_v1 }
 0x6d2   : > { %v2091_v50 = vpop.permute.xlu0 %2090 }
 0x6d3   : > { %v2101_v53 = vsel %vm1652_vm4, %v1758_v52, %v2091_v50 }
 0x6ef   : > { %v2095_v51 = vpop.permute.xlu1 %2094 }
 0x6f0   : > { %v2103_v54 = vsel %vm2102_vm5, %v2101_v53, %v2095_v51  ;;  %v6655_v51 = vld [vmem:[%s9829_s26] ss:$0 sm:$0xff] }
 0x6f1   : > { %v6656_v53 = vld [vmem:[%s9830_s9] ss:$0 sm:$0xff] }
 0x6f8   : > { %v2099_v55 = vpop.permute.xlu1 %2098 }
 0x6f9   : > { %v2105_v56 = vsel %vm2104_vm6, %v2103_v54, %v2099_v55 }
 0x6fa   : > { %v2106_v57 = vpack.c.bf16 %v2105_v56, %v2105_v56 }
 0x6fc   : > { %7103 = vmatmul.mubr.msk.bf16.vlgmr.msra.gmra.mrb[16].mxu0 %vm1604_vm3, %v2106_v57  ;;  %v6685_v57 = vld [vmem:[%s9820_s28 + $0x1] ss:$0 sm:$0xff] }
 0x6fd   : > { %7122 = vmatprep.mubr.msk.bf16.mxu0 %vm8450_vm0, %v8449_v1 }
 0x7cf   : > { %v2162_v59 = vpop.f32.mrb[16].mxu0 }
 0x7d0   : > { %v2163_v60 = vadd.f32 %v6639_v58, %v2162_v59  ;;  %v7104_v61 = vpop.f32.mrb[17].mxu0 }
 0x7d1   : > { %v2165_v62 = vpop.f32.mrb[18].mxu0 }
 0x7d2   : > { %v7105_v63 = vpop.f32.mrb[19].mxu0  ;;  %v2168_v0 = vadd.f32 %v2163_v60, %v8979_v11  ;;  %v7769_v11 = vld [vmem:[%s9824_s16] sm:$0xff]  }
 0x7d3   : > { %7115 = vmatpush3.bf16.msra.mxu0 %v7769_v11 }
 0x7d4   : > { %v2169_v2 = vsel %vm1604_vm3, %v2168_v0, 0.0  ;;  %7116 = vmatprep.subr.bf16.mxu0 %v8449_v1 }
 0x7d5   : > { %2170 = vadd.xlane.f32.xlu0 %v2169_v2 }
 0x7d7   : > { %7117 = vmatpush3.bf16.msra.mxu0 %v7770_v10 }
 0x7d8   : > { %7118 = vmatprep.subr.bf16.mxu0 %v8449_v1 }
 0x7db   : > { %7119 = vmatpush3.bf16.msra.mxu0 %v7771_v22 }
 0x7dc   : > { %7120 = vmatprep.subr.bf16.mxu0 %v8449_v1 }
 0x7df   : > { %7121 = vmatpush3.bf16.msra.mxu0 %v7772_v23 }
 0x7e0   : > { %7140 = vmatprep.subr.bf16.mxu0 %v8449_v1 }
 0x862   : > { %v2171_v3 = vpop.xlane.xlu0 %2170 }
 0x863   : > { %v2173_v4 = vmul.f32 0.03125, %v2171_v3 }
 0x865   : > { %v2174_v5 = vsub.f32 %v2168_v0, %v2173_v4 }
 0x867   : > { %v2175_v6 = vmul.f32 %v2174_v5, %v2174_v5 }
 0x869   : > { %v2176_v7 = vsel %vm1604_vm3, %v2175_v6, 0.0 }
 0x86a   : > { %2177 = vadd.xlane.f32.xlu1 %v2176_v7 }
 0x8f7   : > { %v2178_v12 = vpop.xlane.xlu1 %2177 }
 0x8f8   : > { %v2179_v13 = vmul.f32 0.03125, %v2178_v12 }
 0x8fa   : > { %v2180_v14 = vadd.f32 1e-05, %v2179_v13 }
 0x8fc   : > { %7831 = vrsqrt.f32 %v2180_v14 }
 0x906   : > { %v7832_v15 = vpop.eup %7831 }
 0x907   : > { %v2182_v17 = vmul.f32 %v7832_v15, %v2174_v5 }
 0x909   : > { %v2189_v19 = vmul.f32 %v6643_v16, %v2182_v17 }
 0x90b   : > { %v2196_v20 = vadd.f32 %v6644_v18, %v2189_v19 }
 0x90d   : > { %v2197_v21 = vpack.c.bf16 %v2196_v20, %v2196_v20 }
 0x90f   : > { %7111 = vmatmul.mubr.msk.bf16.vlgmr.msra.gmra.mrb[24].mxu1 %vm1604_vm3, %v2197_v21 }
 0x910   : > { %7130 = vmatprep.mubr.msk.bf16.mxu1 %vm8450_vm0, %v8449_v1  ;;  %7127 = vmatpush3.bf16.msra.mxu1 %v7773_v45 }
 0x911   : > { %7128 = vmatprep.subr.bf16.mxu1 %v8449_v1 }
 0x914   : > { %7129 = vmatpush3.bf16.msra.mxu1 %v7774_v46 }
 0x915   : > { %7134 = vmatprep.subr.bf16.mxu1 %v8449_v1 }
 0x9e2   : > { %v2253_v25 = vpop.f32.mrb[24].mxu1 }
 0x9e3   : > { %v2254_v26 = vadd.f32 %v6645_v24, %v2253_v25  ;;  %v7112_v27 = vpop.f32.mrb[25].mxu1 }
 0x9e4   : > { %v2256_v28 = vpop.f32.mrb[26].mxu1 }
 0x9e5   : > { %v2259_v29 = vmax.f32 %v2254_v26, 0.0  ;;  %v7113_v30 = vpop.f32.mrb[27].mxu1 }
 0x9e7   : > { %v2260_v31 = vpack.c.bf16 %v2259_v29, %v2259_v29 }
 0x9e9   : > { %7123 = vmatmul.mubr.msk.bf16.vlgmr.msra.gmra.mrb[20].mxu0 %vm2291_vm7, %v2260_v31 }
 0x9ea   : > { %7142 = vmatprep.mubr.msk.bf16.mxu0 %vm8450_vm0, %v8449_v1 }
 0xabc   : > { %v2329_v33 = vpop.f32.mrb[20].mxu0 }
 0xabd   : > { %v2330_v34 = vadd.f32 %v6649_v32, %v2329_v33  ;;  %v7124_v35 = vpop.f32.mrb[21].mxu0 }
 0xabe   : > { %v2332_v36 = vpop.f32.mrb[22].mxu0 }
 0xabf   : > { %v7125_v37 = vpop.f32.mrb[23].mxu0  ;;  %v2335_v38 = vadd.f32 %v2330_v34, %v2196_v20 }
 0xac1   : > { %v2336_v39 = vsel %vm1604_vm3, %v2335_v38, 0.0 }
 0xac2   : > { %2337 = vadd.xlane.f32.xlu0 %v2336_v39 }
 0xb4f   : > { %v2338_v40 = vpop.xlane.xlu0 %2337 }
 0xb50   : > { %v2339_v41 = vmul.f32 0.03125, %v2338_v40 }
 0xb52   : > { %v2340_v42 = vsub.f32 %v2335_v38, %v2339_v41 }
 0xb54   : > { %v2341_v43 = vmul.f32 %v2340_v42, %v2340_v42 }
 0xb56   : > { %v2342_v44 = vsel %vm1604_vm3, %v2341_v43, 0.0 }
 0xb57   : > { %2343 = vadd.xlane.f32.xlu0 %v2342_v44 }
 0xbe4   : > { %v2344_v47 = vpop.xlane.xlu0 %2343 }
 0xbe5   : > { %v2345_v48 = vmul.f32 0.03125, %v2344_v47 }
 0xbe7   : > { %v2346_v49 = vadd.f32 1e-05, %v2345_v48 }
 0xbe9   : > { %7833 = vrsqrt.f32 %v2346_v49 }
 0xbf3   : > { %v7834_v50 = vpop.eup %7833 }
 0xbf4   : > { %v2348_v52 = vmul.f32 %v7834_v50, %v2340_v42 }
 0xbf6   : > { %v2355_v54 = vmul.f32 %v6655_v51, %v2348_v52 }
 0xbf8   : > { %v9107_v55 = vadd.f32 %v6656_v53, %v2355_v54 }
 0xbfa   : > { %v2403_v56 = vpack.c.bf16 %v9107_v55, %v9107_v55 }
 0xbfc   : > { %7131 = vmatmul.mubr.msk.bf16.vlgmr.msra.gmra.mrb[28].mxu1 %vm1604_vm3, %v2403_v56 }
 0xbfd   : > { %7136 = vmatprep.mubr.msk.bf16.mxu1 %vm8450_vm0, %v8449_v1 }
 0xccf   : > { %v2459_v58 = vpop.f32.mrb[28].mxu1 }
 0xcd0   : > { %v2460_v59 = vadd.f32 %v6685_v57, %v2459_v58  ;;  %v7132_v60 = vpop.f32.mrb[29].mxu1 }
 0xcd1   : > { %v2462_v61 = vpop.f32.mrb[30].mxu1 }
 0xcd2   : > { %v2465_v62 = vpack.c.bf16 %v2460_v59, %v2460_v59  ;;  %v7133_v63 = vpop.f32.mrb[31].mxu1 }
 0xcd4   : > { %2577 = vrot.lane.b32.xlu0 %v2465_v62, %s9831_s3  ;;  %2467 = vrot.lane.b32.xlu1 %v2465_v62, %s9832_s4 }
 0xcd8   : > { %2685 = vrot.lane.b32.xlu0 %v2465_v62, %s9833_s5  ;;  %2575 = vrot.lane.b32.xlu1 %v2465_v62, %s9834_s6 }
 0xcdc   : > { %2795 = vrot.lane.b32.xlu0 %v2465_v62, %s9835_s11  ;;  %2687 = vrot.lane.b32.xlu1 %v2465_v62, %s9836_s12 }
 0xce0   : > { %2797 = vrot.lane.b32.xlu1 %v2465_v62, %s9837_s14 }
 0xd46   : > { %v2468_v0 = vpop.permute.xlu1 %2467  ;;  %v2578_v3 = vpop.permute.xlu0 %2577 }
 0xd47   : > { %v2473_v2 = vsel %vm1652_vm4, %v2468_v0, 0  ;;  %v2583_v5 = vsel %vm1652_vm4, %v2578_v3, 0 }
 0xd48   : > { %7135 = vmatpush3.bf16.xpose.msra.mxu1 %v2473_v2 }
 0xd49   : > { %7146 = vmatprep.subr.bf16.mxu1 %v8449_v1 }
 0xd4a   : > { %v2576_v4 = vpop.permute.xlu1 %2575  ;;  %v2686_v9 = vpop.permute.xlu0 %2685 }
 0xd4e   : > { %v2688_v6 = vpop.permute.xlu1 %2687  ;;  %v2796_v10 = vpop.permute.xlu0 %2795 }
 0xd4f   : > { %7137 = vmatmul.mubr.msk.bf16.vlgmr.msra.gmra.mrb[32].mxu1 %vm1652_vm4, %v2465_v62  ;;  %v2693_v7 = vsel %vm1652_vm4, %v2688_v6, 0 }
 0xd50   : > { %7147 = vmatpush3.bf16.xpose.msra.mxu1 %v2583_v5  ;;  %7148 = vmatprep.mubr.msk.bf16.mxu1 %vm8450_vm0, %v8449_v1 }
 0xd51   : > { %7158 = vmatprep.subr.bf16.mxu1 %v8449_v1 }
 0xd52   : > { %v2798_v8 = vpop.permute.xlu1 %2797 }
 0xd53   : > { %v2803_v11 = vsel %vm1652_vm4, %v2798_v8, 0 }
 0xd57   : > { %7149 = vmatmul.mubr.msk.bf16.vlgmr.msra.gmra.mrb[36].mxu1 %vm1652_vm4, %v2576_v4 }
 0xd58   : > { %7159 = vmatpush3.bf16.xpose.msra.mxu1 %v2693_v7  ;;  %7160 = vmatprep.mubr.msk.bf16.mxu1 %vm8450_vm0, %v8449_v1 }
 0xd59   : > { %7170 = vmatprep.subr.bf16.mxu1 %v8449_v1 }
 0xd5f   : > { %7161 = vmatmul.mubr.msk.bf16.vlgmr.msra.gmra.mrb[40].mxu1 %vm1652_vm4, %v2686_v9 }
 0xd60   : > { %7171 = vmatpush3.bf16.xpose.msra.mxu1 %v2803_v11  ;;  %7172 = vmatprep.mubr.msk.bf16.mxu1 %vm8450_vm0, %v8449_v1 }
 0xd61   : > { %7182 = vmatprep.subr.bf16.mxu1 %v8449_v1 }
 0xd67   : > { %7173 = vmatmul.mubr.msk.bf16.vlgmr.msra.gmra.mrb[44].mxu1 %vm1652_vm4, %v2796_v10 }
 0xd68   : > { %7186 = vmatprep.mubr.msk.bf16.mxu1 %vm8450_vm0, %v8449_v1 }
 0xe22   : > { %v2509_v12 = vpop.f32.mrb[32].mxu1 }
 0xe23   : > { %v7138_v13 = vpop.f32.mrb[33].mxu1  ;;  %v2515_v14 = vsel %vm1652_vm4, %v2509_v12, -inf }
 0xe24   : > { %2516 = vmax.xlane.f32.xlu1 %v2515_v14  ;;  %v2512_v15 = vpop.f32.mrb[34].mxu1  ;;  %v7775_v14 = vld [vmem:[%s9821_s7 + $0x10] sm:$0xff]  }
 0xe25   : > { %v7139_v16 = vpop.f32.mrb[35].mxu1  ;;  %7183 = vmatpush3.bf16.msra.mxu1 %v7775_v14 }
 0xe26   : > { %7184 = vmatprep.subr.bf16.mxu1 %v8449_v1  ;;  %v7776_v16 = vld [vmem:[%s9821_s7 + $0x18] sm:$0xff]   ;;  %s9849_s7 = sld [smem:[#allocation58_spill]] }
 0xe29   : > { %7185 = vmatpush3.bf16.msra.mxu1 %v7776_v16 }
 0xe2a   : > { %v2619_v17 = vpop.f32.mrb[36].mxu1  ;;  %7198 = vmatprep.subr.bf16.mxu1 %v8449_v1 }
 0xe2b   : > { %v7150_v18 = vpop.f32.mrb[37].mxu1  ;;  %v2625_v19 = vsel %vm1652_vm4, %v2619_v17, -inf }
 0xe2c   : > { %2626 = vmax.xlane.f32.xlu0 %v2625_v19  ;;  %v2622_v20 = vpop.f32.mrb[38].mxu1 }
 0xe2d   : > { %v7151_v21 = vpop.f32.mrb[39].mxu1 }
 0xe32   : > { %v2729_v22 = vpop.f32.mrb[40].mxu1 }
 0xe33   : > { %v7162_v23 = vpop.f32.mrb[41].mxu1  ;;  %v2735_v24 = vsel %vm1652_vm4, %v2729_v22, -inf }
 0xe34   : > { %2736 = vmax.xlane.f32.xlu0 %v2735_v24  ;;  %v2732_v25 = vpop.f32.mrb[42].mxu1 }
 0xe35   : > { %2635 = vrot.lane.b32.xlu1 %v2465_v62, %s9838_s15  ;;  %v7163_v26 = vpop.f32.mrb[43].mxu1 }
 0xe3a   : > { %v2839_v27 = vpop.f32.mrb[44].mxu1 }
 0xe3b   : > { %v7174_v28 = vpop.f32.mrb[45].mxu1  ;;  %v2845_v31 = vsel %vm1652_vm4, %v2839_v27, -inf }
 0xe3c   : > { %v2842_v29 = vpop.f32.mrb[46].mxu1 }
 0xe3d   : > { %v7175_v30 = vpop.f32.mrb[47].mxu1 }
 0xe4a   : > { %2525 = vrot.lane.b32.xlu0 %v2465_v62, %s9839_s17 }
 0xe4e   : > { %2855 = vrot.lane.b32.xlu0 %v2465_v62, %s9840_s19 }
 0xe59   : > { %2846 = vmax.xlane.f32.xlu1 %v2845_v31 }
 0xe6a   : > { %2745 = vrot.lane.b32.xlu1 %v2465_v62, %s9841_s20 }
 0xeb1   : > { %v2517_v32 = vpop.xlane.xlu1 %2516 }
 0xeb2   : > { %v2518_v33 = vsub.f32 %v2509_v12, %v2517_v32 }
 0xeb4   : > { %v2519_v34 = vmul.f32 1.442695, %v2518_v33 }
 0xeb5   : > { %v2636_v44 = vpop.permute.xlu1 %2635 }
 0xeb6   : > { %7835 = vpow2.f32 %v2519_v34  ;;  %v2641_v48 = vsel %vm1481_vm1, %v2636_v44, 0 }
 0xeb9   : > { %v2627_v35 = vpop.xlane.xlu0 %2626 }
 0xeba   : > { %v2628_v36 = vsub.f32 %v2619_v17, %v2627_v35 }
 0xebc   : > { %v2629_v37 = vmul.f32 1.442695, %v2628_v36 }
 0xebe   : > { %7837 = vpow2.f32 %v2629_v37 }
 0xec0   : > { %v7836_v41 = vpop.eup %7835 }
 0xec1   : > { %v2737_v38 = vpop.xlane.xlu0 %2736  ;;  %v2524_v46 = vpack.c.bf16 %v7836_v41, %v7836_v41  ;;  %v2521_v49 = vsel %vm1652_vm4, %v7836_v41, 0.0 }
 0xec2   : > { %v2738_v39 = vsub.f32 %v2729_v22, %v2737_v38 }
 0xec4   : > { %v2739_v40 = vmul.f32 1.442695, %v2738_v39  ;;  %v6697_v39 = vld [vmem:[%s9822_s0 + $0x1] ss:$0 sm:$0xff]  ;;  %s9845_s0 = sld [smem:[#allocation35_spill]] }
 0xec5   : > { %v2526_v42 = vpop.permute.xlu0 %2525 }
 0xec6   : > { %7839 = vpow2.f32 %v2739_v40  ;;  %v2531_v43 = vsel %vm1481_vm1, %v2526_v42, 0 }
 0xec7   : > { %7141 = vmatpush3.bf16.msra.mxu0 %v2531_v43 }
 0xec8   : > { %v7838_v45 = vpop.eup %7837  ;;  %7152 = vmatprep.subr.bf16.mxu0 %v8449_v1 }
 0xec9   : > { %v2631_v47 = vsel %vm1652_vm4, %v7838_v45, 0.0  ;;  %v2634_v51 = vpack.c.bf16 %v7838_v45, %v7838_v45  ;;  %v2856_v59 = vpop.permute.xlu0 %2855 }
 0xeca   : > { %7143 = vmatmul.mubr.msk.bf16.vlgmr.msra.gmra.mrb[24].mxu0 %vm1652_vm4, %v2524_v46  ;;  %2632 = vadd.xlane.f32.xlu1 %v2631_v47  ;;  %v2861_v61 = vsel %vm1481_vm1, %v2856_v59, 0 }
 0xecb   : > { %7153 = vmatpush3.bf16.msra.mxu0 %v2641_v48  ;;  %7154 = vmatprep.mubr.msk.bf16.mxu0 %vm8450_vm0, %v8449_v1 }
 0xecc   : > { %7164 = vmatprep.subr.bf16.mxu0 %v8449_v1 }
 0xece   : > { %2522 = vadd.xlane.f32.xlu1 %v2521_v49 }
 0xed0   : > { %v7840_v50 = vpop.eup %7839 }
 0xed1   : > { %v2741_v52 = vsel %vm1652_vm4, %v7840_v50, 0.0  ;;  %v2744_v60 = vpack.c.bf16 %v7840_v50, %v7840_v50 }
 0xed2   : > { %2742 = vadd.xlane.f32.xlu0 %v2741_v52  ;;  %7155 = vmatmul.mubr.msk.bf16.vlgmr.msra.gmra.mrb[28].mxu0 %vm1652_vm4, %v2634_v51  ;;  %v7777_v52 = vld [vmem:[%s9823_s2 + $0x10] sm:$0xff]  }
 0xed3   : > { %7166 = vmatprep.mubr.msk.bf16.mxu0 %vm8450_vm0, %v8449_v1 }
 0xee6   : > { %v2847_v53 = vpop.xlane.xlu1 %2846 }
 0xee7   : > { %v2848_v54 = vsub.f32 %v2839_v27, %v2847_v53  ;;  %v7778_v53 = vld [vmem:[%s9823_s2 + $0x18] sm:$0xff]   ;;  %s9846_s2 = sld [smem:[#allocation53_spill]] }
 0xee9   : > { %v2849_v56 = vmul.f32 1.442695, %v2848_v54  ;;  %v7780_v54 = vld [vmem:[%s9824_s16 + $0x28] sm:$0xff]  }
 0xeea   : > { %v2746_v57 = vpop.permute.xlu1 %2745 }
 0xeeb   : > { %7841 = vpow2.f32 %v2849_v56  ;;  %v2751_v58 = vsel %vm1481_vm1, %v2746_v57, 0 }
 0xeec   : > { %7165 = vmatpush3.bf16.msra.mxu0 %v2751_v58 }
 0xeed   : > { %7176 = vmatprep.subr.bf16.mxu0 %v8449_v1 }
 0xeef   : > { %7167 = vmatmul.mubr.msk.bf16.vlgmr.msra.gmra.mrb[32].mxu0 %vm1652_vm4, %v2744_v60  ;;  %v6701_v60 = vld [vmem:[%s9825_s1 + $0x1] ss:$0 sm:$0xff]  ;;  %s1462_s1 = scalar_lea.vmem %s9845_s0, %s8964_s22  ;;  %s9848_s0 = sld [smem:[#allocation60_spill]] }
 0xef0   : > { %7177 = vmatpush3.bf16.msra.mxu0 %v2861_v61  ;;  %7178 = vmatprep.mubr.msk.bf16.mxu0 %vm8450_vm0, %v8449_v1 }
 0xef1   : > { %7190 = vmatprep.subr.bf16.mxu0 %v8449_v1 }
 0xef5   : > { %v7842_v62 = vpop.eup %7841 }
 0xef6   : > { %v2851_v63 = vsel %vm1652_vm4, %v7842_v62, 0.0  ;;  %v2854_v0 = vpack.c.bf16 %v7842_v62, %v7842_v62  ;;  %v6702_v62 = vld [vmem:[%s9826_s23 + $0x1] ss:$0 sm:$0xff] }
 0xef7   : > { %2852 = vadd.xlane.f32.xlu0 %v2851_v63 }
 0xef8   : > { %7179 = vmatmul.mubr.msk.bf16.vlgmr.msra.gmra.mrb[36].mxu0 %vm1652_vm4, %v2854_v0 }
 0xef9   : > { %7194 = vmatprep.mubr.msk.bf16.mxu0 %vm8450_vm0, %v8449_v1  ;;  %7191 = vmatpush3.bf16.msra.mxu0 %v7777_v52 }
 0xefa   : > { %7192 = vmatprep.subr.bf16.mxu0 %v8449_v1 }
 0xefd   : > { %7193 = vmatpush3.bf16.msra.mxu0 %v7778_v53 }
 0xefe   : > { %7210 = vmatprep.subr.mxu0 %v8449_v1 }
 0xf57   : > { %v2633_v2 = vpop.xlane.xlu1 %2632 }
 0xf58   : > { %7843 = vrcp.f32 %v2633_v2 }
 0xf5b   : > { %v2523_v29 = vpop.xlane.xlu1 %2522 }
 0xf5f   : > { %v2743_v13 = vpop.xlane.xlu0 %2742 }
 0xf60   : > { %7845 = vrcp.f32 %v2743_v13 }
 0xf62   : > { %v7844_v7 = vpop.eup %7843 }
 0xf6a   : > { %v7846_v17 = vpop.eup %7845 }
 0xf84   : > { %v2853_v15 = vpop.xlane.xlu0 %2852 }
 0xf85   : > { %7847 = vrcp.f32 %v2853_v15 }
 0xf86   : > { %7849 = vrcp.f32 %v2523_v29 }
 0xf8f   : > { %v7848_v23 = vpop.eup %7847 }
 0xf90   : > { %v7850_v30 = vpop.eup %7849 }
 0xf9d   : > { %v2567_v3 = vpop.f32.mrb[24].mxu0 }
 0xf9e   : > { %v7144_v4 = vpop.f32.mrb[25].mxu0  ;;  %v2574_v33 = vmul.f32 %v7850_v30, %v2567_v3  ;;  %v3176_v3 = vld [vmem:[#allocation3] sm:$0x1] }
 0xf9f   : > { %v2570_v5 = vpop.f32.mrb[26].mxu0  ;;  %v3175_v4 = vld [vmem:[%s1462_s1] sm:$0xff]  ;;  %s9847_s1 = sld [smem:[#allocation55_spill]] }
 0xfa0   : > { %v7145_v6 = vpop.f32.mrb[27].mxu0  ;;  %v7781_v5 = vld [vmem:[%s9824_s16 + $0x30] sm:$0xff]  }
 0xfa1   : > { %v7782_v6 = vld [vmem:[%s9824_s16 + $0x38] sm:$0xff]  }
 0xfa5   : > { %v2677_v8 = vpop.f32.mrb[28].mxu0 }
 0xfa6   : > { %v2684_v9 = vmul.f32 %v7844_v7, %v2677_v8  ;;  %v7156_v11 = vpop.f32.mrb[29].mxu0  ;;  %v7783_v7 = vld [vmem:[%s9846_s2] sm:$0xff]   ;;  %v7784_v8 = vld [vmem:[%s9846_s2 + $0x8] sm:$0xff]  }
 0xfa7   : > { %v2680_v10 = vpop.f32.mrb[30].mxu0 }
 0xfa8   : > { %v7157_v12 = vpop.f32.mrb[31].mxu0  ;;  %2906 = vrot.lane.b32.xlu0 %v2684_v9, %s9842_s21  ;;  %v6703_v9 = vld [vmem:[%s9827_s10 + $0x1] ss:$0 sm:$0xff]  ;;  %s9851_s10 = sld [smem:[#allocation65_spill]] }
 0xfc2   : > { %v2787_v18 = vpop.f32.mrb[32].mxu0 }
 0xfc3   : > { %v2794_v19 = vmul.f32 %v7846_v17, %v2787_v18  ;;  %v7168_v20 = vpop.f32.mrb[33].mxu0  ;;  %v6715_v17 = vld [vmem:[#allocation5] ss:$0 sm:$0xff] }
 0xfc4   : > { %v2790_v21 = vpop.f32.mrb[34].mxu0 }
 0xfc5   : > { %2910 = vrot.lane.b32.xlu1 %v2794_v19, %s9843_s24  ;;  %v7169_v22 = vpop.f32.mrb[35].mxu0 }
 0xfcb   : > { %v2897_v24 = vpop.f32.mrb[36].mxu0 }
 0xfcc   : > { %v2904_v25 = vmul.f32 %v7848_v23, %v2897_v24  ;;  %v7180_v26 = vpop.f32.mrb[37].mxu0 }
 0xfcd   : > { %v2900_v27 = vpop.f32.mrb[38].mxu0  ;;  %v6718_v26 = vld [vmem:[#allocation7] ss:$0 sm:$0xff] }
 0xfce   : > { %2914 = vrot.lane.b32.xlu1 %v2904_v25, %s9844_s25  ;;  %v7181_v28 = vpop.f32.mrb[39].mxu0 }
0x101a   : > { %v2907_v31 = vpop.permute.xlu0 %2906 }
0x101b   : > { %v2917_v34 = vsel %vm1652_vm4, %v2574_v33, %v2907_v31 }
0x1037   : > { %v2911_v32 = vpop.permute.xlu1 %2910 }
0x1038   : > { %v2918_v35 = vsel %vm2102_vm5, %v2917_v34, %v2911_v32 }
0x1040   : > { %v2915_v36 = vpop.permute.xlu1 %2914 }
0x1041   : > { %v2919_v37 = vsel %vm2104_vm6, %v2918_v35, %v2915_v36 }
0x1042   : > { %v2920_v38 = vpack.c.bf16 %v2919_v37, %v2919_v37 }
0x1044   : > { %7187 = vmatmul.mubr.msk.bf16.vlgmr.msra.gmra.mrb[48].mxu1 %vm1604_vm3, %v2920_v38 }
0x1045   : > { %7206 = vmatprep.mubr.msk.bf16.mxu1 %vm8450_vm0, %v8449_v1 }
0x1117   : > { %v2976_v40 = vpop.f32.mrb[48].mxu1 }
0x1118   : > { %v2977_v41 = vadd.f32 %v6697_v39, %v2976_v40  ;;  %v7188_v42 = vpop.f32.mrb[49].mxu1 }
0x1119   : > { %v2979_v43 = vpop.f32.mrb[50].mxu1 }
0x111a   : > { %v7189_v44 = vpop.f32.mrb[51].mxu1  ;;  %v2982_v45 = vadd.f32 %v2977_v41, %v9107_v55  ;;  %v7779_v55 = vld [vmem:[%s9824_s16 + $0x20] sm:$0xff]   ;;  %s9852_s16 = sld [smem:[#allocation67_spill]] }
0x111b   : > { %7199 = vmatpush3.bf16.msra.mxu1 %v7779_v55 }
0x111c   : > { %v2983_v46 = vsel %vm1604_vm3, %v2982_v45, 0.0  ;;  %7200 = vmatprep.subr.bf16.mxu1 %v8449_v1 }
0x111d   : > { %2984 = vadd.xlane.f32.xlu0 %v2983_v46 }
0x111f   : > { %7201 = vmatpush3.bf16.msra.mxu1 %v7780_v54 }
0x1120   : > { %7202 = vmatprep.subr.bf16.mxu1 %v8449_v1 }
0x1123   : > { %7203 = vmatpush3.bf16.msra.mxu1 %v7781_v5 }
0x1124   : > { %7204 = vmatprep.subr.bf16.mxu1 %v8449_v1 }
0x1127   : > { %7205 = vmatpush3.bf16.msra.mxu1 %v7782_v6 }
0x1128   : > { %7223 = vmatprep.subr.bf16.mxu1 %v8449_v1 }
0x11aa   : > { %v2985_v47 = vpop.xlane.xlu0 %2984 }
0x11ab   : > { %v2986_v48 = vmul.f32 0.03125, %v2985_v47 }
0x11ad   : > { %v2987_v49 = vsub.f32 %v2982_v45, %v2986_v48 }
0x11af   : > { %v2988_v50 = vmul.f32 %v2987_v49, %v2987_v49 }
0x11b1   : > { %v2989_v51 = vsel %vm1604_vm3, %v2988_v50, 0.0 }
0x11b2   : > { %2990 = vadd.xlane.f32.xlu1 %v2989_v51 }
0x123f   : > { %v2991_v56 = vpop.xlane.xlu1 %2990 }
0x1240   : > { %v2992_v57 = vmul.f32 0.03125, %v2991_v56 }
0x1242   : > { %v2993_v58 = vadd.f32 1e-05, %v2992_v57 }
0x1244   : > { %7851 = vrsqrt.f32 %v2993_v58 }
0x124e   : > { %v7852_v59 = vpop.eup %7851 }
0x124f   : > { %v2995_v61 = vmul.f32 %v7852_v59, %v2987_v49 }
0x1251   : > { %v3002_v63 = vmul.f32 %v6701_v60, %v2995_v61 }
0x1253   : > { %v9201_v0 = vadd.f32 %v6702_v62, %v3002_v63 }
0x1255   : > { %v3010_v2 = vpack.c.bf16 %v9201_v0, %v9201_v0 }
0x1257   : > { %7195 = vmatmul.mubr.msk.bf16.vlgmr.msra.gmra.mrb[40].mxu0 %vm1604_vm3, %v3010_v2 }
0x1258   : > { %7211 = vmatpush3.msk.msra.mxu0 %vm3188_vm8, %v3176_v3  ;;  %7212 = vmatprep.mubr.msk.f32.mxu0 %vm8450_vm0, %v8449_v1 }
0x1259   : > { %7215 = vmatprep.subr.bf16.mxu0 %v8449_v1 }
0x125f   : > { %7213 = vmatmul.mubr.msk.f32.vlgmr.msra.gmra.mrb[44].mxu0 %vm3184_vm9, %v3175_v4 }
0x1260   : > { %7219 = vmatprep.mubr.msk.bf16.mxu0 %vm8450_vm0, %v8449_v1  ;;  %7216 = vmatpush3.bf16.msra.mxu0 %v7783_v7 }
0x1261   : > { %7217 = vmatprep.subr.bf16.mxu0 %v8449_v1 }
0x1264   : > { %7218 = vmatpush3.bf16.msra.mxu0 %v7784_v8 }
0x1265   : > { %7229 = vmatprep.subr.bf16.mxu0 %v8449_v1 }
0x132a   : > { %v3066_v11 = vpop.f32.mrb[40].mxu0 }
0x132b   : > { %v3067_v10 = vadd.f32 %v6703_v9, %v3066_v11  ;;  %v7196_v12 = vpop.f32.mrb[41].mxu0 }
0x132c   : > { %v3069_v13 = vpop.f32.mrb[42].mxu0 }
0x132d   : > { %v3072_v14 = vmax.f32 %v3067_v10, 0.0  ;;  %v7197_v15 = vpop.f32.mrb[43].mxu0 }
0x132f   : > { %v3073_v16 = vpack.c.bf16 %v3072_v14, %v3072_v14 }
0x1331   : > { %7207 = vmatmul.mubr.msk.bf16.vlgmr.msra.gmra.mrb[52].mxu1 %vm2291_vm7, %v3073_v16 }
0x1332   : > { %v3258_v18 = vpop.f32.mrb[44].mxu0  ;;  %7225 = vmatprep.mubr.msk.bf16.mxu1 %vm8450_vm0, %v8449_v1 }
0x1333   : > { %v9226_v19 = vadd.f32 %v6715_v17, %v3258_v18  ;;  %v7214_v20 = vpop.f32.mrb[45].mxu0 }
0x1335   : > { %v3307_v21 = vpack.c.bf16 %v9226_v19, %v9226_v19 }
0x1337   : > { %7220 = vmatmul.mubr.msk.bf16.vlgmr.msra.gmra.mrb[48].mxu0 %vm1604_vm3, %v3307_v21 }
0x1338   : > { %7231 = vmatprep.mubr.msk.bf16.mxu0 %vm8450_vm0, %v8449_v1 }
0x1404   : > { %v9233_v22 = vpop.f32.mrb[52].mxu1 }
0x1405   : > { %v7208_v23 = vpop.f32.mrb[53].mxu1 }
0x1406   : > { %v3144_v24 = vpop.f32.mrb[54].mxu1 }
0x1407   : > { %v7209_v25 = vpop.f32.mrb[55].mxu1 }
0x140a   : > { %v3363_v27 = vpop.f32.mrb[48].mxu0 }
0x140b   : > { %v3364_v28 = vadd.f32 %v6718_v26, %v3363_v27  ;;  %v7221_v29 = vpop.f32.mrb[49].mxu0 }
0x140c   : > { %v3366_v30 = vpop.f32.mrb[50].mxu0 }
0x140d   : > { %v3369_v31 = vpack.c.bf16 %v3364_v28, %v3364_v28  ;;  %v7222_v32 = vpop.f32.mrb[51].mxu0 }
0x140f   : > { %3481 = vrot.lane.b32.xlu1 %v3369_v31, %s9831_s3  ;;  %3371 = vrot.lane.b32.xlu0 %v3369_v31, %s9832_s4 }
0x1413   : > { %3591 = vrot.lane.b32.xlu1 %v3369_v31, %s9836_s12  ;;  %3479 = vrot.lane.b32.xlu0 %v3369_v31, %s9834_s6 }
0x1417   : > { %3701 = vrot.lane.b32.xlu1 %v3369_v31, %s9837_s14  ;;  %3589 = vrot.lane.b32.xlu0 %v3369_v31, %s9833_s5 }
0x141b   : > { %3699 = vrot.lane.b32.xlu0 %v3369_v31, %s9835_s11 }
0x1481   : > { %v3372_v33 = vpop.permute.xlu0 %3371  ;;  %v3482_v35 = vpop.permute.xlu1 %3481 }
0x1482   : > { %v3377_v34 = vsel %vm1652_vm4, %v3372_v33, 0  ;;  %v3487_v36 = vsel %vm1652_vm4, %v3482_v35, 0 }
0x1483   : > { %7224 = vmatpush3.bf16.xpose.msra.mxu1 %v3377_v34 }
0x1484   : > { %7235 = vmatprep.subr.bf16.mxu1 %v8449_v1 }
0x1485   : > { %v3592_v37 = vpop.permute.xlu1 %3591  ;;  %v3480_v38 = vpop.permute.xlu0 %3479 }
0x1486   : > { %v3597_v39 = vsel %vm1652_vm4, %v3592_v37, 0 }
0x1489   : > { %v3702_v40 = vpop.permute.xlu1 %3701  ;;  %v3590_v41 = vpop.permute.xlu0 %3589 }
0x148a   : > { %7226 = vmatmul.mubr.msk.bf16.vlgmr.msra.gmra.mrb[56].mxu1 %vm1652_vm4, %v3369_v31  ;;  %v3707_v42 = vsel %vm1652_vm4, %v3702_v40, 0 }
0x148b   : > { %7236 = vmatpush3.bf16.xpose.msra.mxu1 %v3487_v36  ;;  %7237 = vmatprep.mubr.msk.bf16.mxu1 %vm8450_vm0, %v8449_v1 }
0x148c   : > { %7247 = vmatprep.subr.bf16.mxu1 %v8449_v1 }
0x148d   : > { %v3700_v43 = vpop.permute.xlu0 %3699 }
0x1492   : > { %7238 = vmatmul.mubr.msk.bf16.vlgmr.msra.gmra.mrb[60].mxu1 %vm1652_vm4, %v3480_v38 }
0x1493   : > { %7248 = vmatpush3.bf16.xpose.msra.mxu1 %v3597_v39  ;;  %7249 = vmatprep.mubr.msk.bf16.mxu1 %vm8450_vm0, %v8449_v1 }
0x1494   : > { %7259 = vmatprep.subr.bf16.mxu1 %v8449_v1 }
0x149a   : > { %7250 = vmatmul.mubr.msk.bf16.vlgmr.msra.gmra.mrb[64].mxu1 %vm1652_vm4, %v3590_v41 }
0x149b   : > { %7260 = vmatpush3.bf16.xpose.msra.mxu1 %v3707_v42  ;;  %7261 = vmatprep.mubr.msk.bf16.mxu1 %vm8450_vm0, %v8449_v1 }
0x149c   : > { %7271 = vmatprep.subr.bf16.mxu1 %v8449_v1 }
0x14a2   : > { %7262 = vmatmul.mubr.msk.bf16.vlgmr.msra.gmra.mrb[68].mxu1 %vm1652_vm4, %v3700_v43 }
0x14a3   : > { %7275 = vmatprep.mubr.msk.bf16.mxu1 %vm8450_vm0, %v8449_v1 }
0x155d   : > { %v3413_v44 = vpop.f32.mrb[56].mxu1 }
0x155e   : > { %v7227_v45 = vpop.f32.mrb[57].mxu1  ;;  %v3419_v46 = vsel %vm1652_vm4, %v3413_v44, -inf }
0x155f   : > { %3420 = vmax.xlane.f32.xlu1 %v3419_v46  ;;  %v3416_v47 = vpop.f32.mrb[58].mxu1 }
0x1560   : > { %v7228_v48 = vpop.f32.mrb[59].mxu1 }
0x1561   : > { %v7785_v48 = vld [vmem:[%s9847_s1] sm:$0xff]  }
0x1562   : > { %7272 = vmatpush3.bf16.msra.mxu1 %v7785_v48 }
0x1563   : > { %7273 = vmatprep.subr.bf16.mxu1 %v8449_v1 }
0x1565   : > { %v3523_v49 = vpop.f32.mrb[60].mxu1 }
0x1566   : > { %v7239_v50 = vpop.f32.mrb[61].mxu1  ;;  %v3529_v51 = vsel %vm1652_vm4, %v3523_v49, -inf }
0x1567   : > { %3530 = vmax.xlane.f32.xlu0 %v3529_v51  ;;  %v3526_v52 = vpop.f32.mrb[62].mxu1 }
0x1568   : > { %v7240_v53 = vpop.f32.mrb[63].mxu1  ;;  %v7786_v52 = vld [vmem:[%s9847_s1 + $0x8] sm:$0xff]  }
0x1569   : > { %7274 = vmatpush3.bf16.msra.mxu1 %v7786_v52 }
0x156a   : > { %7287 = vmatprep.subr.bf16.mxu1 %v8449_v1 }
0x156d   : > { %v3633_v55 = vpop.f32.mrb[64].mxu1 }
0x156e   : > { %v7251_v54 = vpop.f32.mrb[65].mxu1  ;;  %v3639_v56 = vsel %vm1652_vm4, %v3633_v55, -inf }
0x156f   : > { %3640 = vmax.xlane.f32.xlu0 %v3639_v56  ;;  %v3636_v57 = vpop.f32.mrb[66].mxu1 }
0x1570   : > { %3539 = vrot.lane.b32.xlu1 %v3369_v31, %s9838_s15  ;;  %v7252_v58 = vpop.f32.mrb[67].mxu1 }
0x1575   : > { %v3743_v59 = vpop.f32.mrb[68].mxu1 }
0x1576   : > { %v7263_v60 = vpop.f32.mrb[69].mxu1  ;;  %v3749_v63 = vsel %vm1652_vm4, %v3743_v59, -inf }
0x1577   : > { %v3746_v61 = vpop.f32.mrb[70].mxu1 }
0x1578   : > { %v7264_v62 = vpop.f32.mrb[71].mxu1 }
0x1585   : > { %3429 = vrot.lane.b32.xlu0 %v3369_v31, %s9839_s17 }
0x1589   : > { %3759 = vrot.lane.b32.xlu0 %v3369_v31, %s9840_s19 }
0x1594   : > { %3750 = vmax.xlane.f32.xlu1 %v3749_v63 }
0x15a5   : > { %3649 = vrot.lane.b32.xlu1 %v3369_v31, %s9841_s20 }
0x15ec   : > { %v3421_v2 = vpop.xlane.xlu1 %3420 }
0x15ed   : > { %v3422_v3 = vsub.f32 %v3413_v44, %v3421_v2 }
0x15ef   : > { %v3423_v4 = vmul.f32 1.442695, %v3422_v3 }
0x15f0   : > { %v3540_v14 = vpop.permute.xlu1 %3539 }
0x15f1   : > { %7853 = vpow2.f32 %v3423_v4  ;;  %v3545_v18 = vsel %vm1481_vm1, %v3540_v14, 0 }
0x15f4   : > { %v3531_v5 = vpop.xlane.xlu0 %3530 }
0x15f5   : > { %v3532_v6 = vsub.f32 %v3523_v49, %v3531_v5  ;;  %v6707_v49 = vld [vmem:[%s9828_s18 + $0x1] ss:$0 sm:$0xff] }
0x15f6   : > { %v3142_v50 = vadd.f32 %v6707_v49, %v9233_v22 }
0x15f7   : > { %v3533_v7 = vmul.f32 1.442695, %v3532_v6 }
0x15f8   : > { %v3147_v54 = vadd.f32 %v3142_v50, %v9201_v0 }
0x15f9   : > { %7855 = vpow2.f32 %v3533_v7 }
0x15fa   : > { %v3148_v60 = vsel %vm1604_vm3, %v3147_v54, 0.0 }
0x15fb   : > { %v7854_v10 = vpop.eup %7853 }
0x15fc   : > { %v3641_v8 = vpop.xlane.xlu0 %3640  ;;  %v3428_v16 = vpack.c.bf16 %v7854_v10, %v7854_v10  ;;  %v3425_v20 = vsel %vm1652_vm4, %v7854_v10, 0.0 }
0x15fd   : > { %v3642_v9 = vsub.f32 %v3633_v55, %v3641_v8 }
0x15ff   : > { %v3643_v11 = vmul.f32 1.442695, %v3642_v9 }
0x1600   : > { %v3430_v12 = vpop.permute.xlu0 %3429 }
0x1601   : > { %7857 = vpow2.f32 %v3643_v11  ;;  %v3435_v13 = vsel %vm1481_vm1, %v3430_v12, 0 }
0x1602   : > { %7230 = vmatpush3.bf16.msra.mxu0 %v3435_v13 }
0x1603   : > { %v7856_v15 = vpop.eup %7855  ;;  %7241 = vmatprep.subr.bf16.mxu0 %v8449_v1 }
0x1604   : > { %v3535_v17 = vsel %vm1652_vm4, %v7856_v15, 0.0  ;;  %v3538_v23 = vpack.c.bf16 %v7856_v15, %v7856_v15  ;;  %v3760_v30 = vpop.permute.xlu0 %3759 }
0x1605   : > { %7232 = vmatmul.mubr.msk.bf16.vlgmr.msra.gmra.mrb[52].mxu0 %vm1652_vm4, %v3428_v16  ;;  %3536 = vadd.xlane.f32.xlu1 %v3535_v17  ;;  %v3765_v32 = vsel %vm1481_vm1, %v3760_v30, 0 }
0x1606   : > { %7242 = vmatpush3.bf16.msra.mxu0 %v3545_v18  ;;  %7243 = vmatprep.mubr.msk.bf16.mxu0 %vm8450_vm0, %v8449_v1  ;;  %v7787_v18 = vld [vmem:[%s9848_s0] sm:$0xff]  }
0x1607   : > { %7253 = vmatprep.subr.bf16.mxu0 %v8449_v1 }
0x1609   : > { %3426 = vadd.xlane.f32.xlu1 %v3425_v20  ;;  %v7788_v20 = vld [vmem:[%s9848_s0 + $0x8] sm:$0xff]  }
0x160b   : > { %v7858_v21 = vpop.eup %7857 }
0x160c   : > { %v3645_v24 = vsel %vm1652_vm4, %v7858_v21, 0.0  ;;  %v3648_v31 = vpack.c.bf16 %v7858_v21, %v7858_v21 }
0x160d   : > { %3646 = vadd.xlane.f32.xlu0 %v3645_v24  ;;  %7244 = vmatmul.mubr.msk.bf16.vlgmr.msra.gmra.mrb[56].mxu0 %vm1652_vm4, %v3538_v23 }
0x160e   : > { %7255 = vmatprep.mubr.msk.bf16.mxu0 %vm8450_vm0, %v8449_v1 }
0x1621   : > { %v3751_v25 = vpop.xlane.xlu1 %3750 }
0x1622   : > { %v3752_v26 = vsub.f32 %v3743_v59, %v3751_v25 }
0x1624   : > { %v3753_v27 = vmul.f32 1.442695, %v3752_v26  ;;  %v6713_v26 = vld [vmem:[%s9829_s26 + $0x1] ss:$0 sm:$0xff] }
0x1625   : > { %v3650_v28 = vpop.permute.xlu1 %3649 }
0x1626   : > { %7859 = vpow2.f32 %v3753_v27  ;;  %v3655_v29 = vsel %vm1481_vm1, %v3650_v28, 0  ;;  %v6714_v28 = vld [vmem:[%s9830_s9 + $0x1] ss:$0 sm:$0xff]  ;;  %s9850_s9 = sld [smem:[#allocation62_spill]] }
0x1627   : > { %7254 = vmatpush3.bf16.msra.mxu0 %v3655_v29 }
0x1628   : > { %7265 = vmatprep.subr.bf16.mxu0 %v8449_v1 }
0x162a   : > { %7256 = vmatmul.mubr.msk.bf16.vlgmr.msra.gmra.mrb[60].mxu0 %vm1652_vm4, %v3648_v31 }
0x162b   : > { %7266 = vmatpush3.bf16.msra.mxu0 %v3765_v32  ;;  %7267 = vmatprep.mubr.msk.bf16.mxu0 %vm8450_vm0, %v8449_v1  ;;  %v6730_v32 = vld [vmem:[#allocation8] ss:$0 sm:$0xff] }
0x162c   : > { %7279 = vmatprep.subr.bf16.mxu0 %v8449_v1 }
0x1630   : > { %v7860_v33 = vpop.eup %7859 }
0x1631   : > { %v3755_v34 = vsel %vm1652_vm4, %v7860_v33, 0.0  ;;  %v3758_v35 = vpack.c.bf16 %v7860_v33, %v7860_v33 }
0x1632   : > { %3756 = vadd.xlane.f32.xlu0 %v3755_v34 }
0x1633   : > { %7268 = vmatmul.mubr.msk.bf16.vlgmr.msra.gmra.mrb[64].mxu0 %vm1652_vm4, %v3758_v35 }
0x1634   : > { %7283 = vmatprep.mubr.msk.bf16.mxu0 %vm8450_vm0, %v8449_v1 }
0x1692   : > { %v3537_v36 = vpop.xlane.xlu1 %3536 }
0x1693   : > { %7861 = vrcp.f32 %v3537_v36 }
0x1696   : > { %v3427_v0 = vpop.xlane.xlu1 %3426 }
0x169a   : > { %v3647_v47 = vpop.xlane.xlu0 %3646 }
0x169b   : > { %7863 = vrcp.f32 %v3647_v47  ;;  %v6740_v47 = vld [vmem:[#allocation14] ss:$0 sm:$0xff] }
0x169d   : > { %v7862_v41 = vpop.eup %7861 }
0x16a5   : > { %v7864_v53 = vpop.eup %7863 }
0x16bf   : > { %v3757_v51 = vpop.xlane.xlu0 %3756 }
0x16c0   : > { %7865 = vrcp.f32 %v3757_v51 }
0x16c1   : > { %7867 = vrcp.f32 %v3427_v0 }
0x16ca   : > { %v7866_v22 = vpop.eup %7865 }
0x16cb   : > { %v7868_v4 = vpop.eup %7867 }
0x16d8   : > { %v3471_v37 = vpop.f32.mrb[52].mxu0 }
0x16d9   : > { %v7233_v38 = vpop.f32.mrb[53].mxu0  ;;  %v3478_v7 = vmul.f32 %v7868_v4, %v3471_v37 }
0x16da   : > { %v3474_v39 = vpop.f32.mrb[54].mxu0 }
0x16db   : > { %v7234_v40 = vpop.f32.mrb[55].mxu0 }
0x16e0   : > { %v3581_v42 = vpop.f32.mrb[56].mxu0 }
0x16e1   : > { %v3588_v43 = vmul.f32 %v7862_v41, %v3581_v42  ;;  %v7245_v44 = vpop.f32.mrb[57].mxu0 }
0x16e2   : > { %v3584_v45 = vpop.f32.mrb[58].mxu0 }
0x16e3   : > { %v7246_v46 = vpop.f32.mrb[59].mxu0  ;;  %3810 = vrot.lane.b32.xlu0 %v3588_v43, %s9842_s21  ;;  %v7789_v45 = vld [vmem:[%s9849_s7] sm:$0xff]  }
0x16e4   : > { %7280 = vmatpush3.bf16.msra.mxu0 %v7789_v45  ;;  %v7790_v46 = vld [vmem:[%s9849_s7 + $0x8] sm:$0xff]  }
0x16e5   : > { %7281 = vmatprep.subr.bf16.mxu0 %v8449_v1 }
0x16e8   : > { %7282 = vmatpush3.bf16.msra.mxu0 %v7790_v46 }
0x16e9   : > { %7295 = vmatprep.subr.bf16.mxu0 %v8449_v1 }
0x16fd   : > { %v3691_v55 = vpop.f32.mrb[60].mxu0 }
0x16fe   : > { %v3698_v56 = vmul.f32 %v7864_v53, %v3691_v55  ;;  %v7257_v57 = vpop.f32.mrb[61].mxu0 }
0x16ff   : > { %v3694_v58 = vpop.f32.mrb[62].mxu0  ;;  %v6734_v57 = vld [vmem:[#allocation10] ss:$0 sm:$0xff] }
0x1700   : > { %3814 = vrot.lane.b32.xlu1 %v3698_v56, %s9843_s24  ;;  %v7258_v59 = vpop.f32.mrb[63].mxu0 }
0x1701   : > { %v6735_v59 = vld [vmem:[#allocation11] ss:$0 sm:$0xff] }
0x1702   : > { %3149 = vadd.xlane.f32.xlu0 %v3148_v60 }
0x1706   : > { %v3801_v61 = vpop.f32.mrb[64].mxu0 }
0x1707   : > { %v3808_v62 = vmul.f32 %v7866_v22, %v3801_v61  ;;  %v7269_v63 = vpop.f32.mrb[65].mxu0 }
0x1708   : > { %v3804_v2 = vpop.f32.mrb[66].mxu0  ;;  %v6736_v63 = vld [vmem:[#allocation13] ss:$0 sm:$0xff] }
0x1709   : > { %3818 = vrot.lane.b32.xlu1 %v3808_v62, %s9844_s25  ;;  %v7270_v3 = vpop.f32.mrb[67].mxu0 }
0x1755   : > { %v3811_v5 = vpop.permute.xlu0 %3810 }
0x1756   : > { %v3821_v8 = vsel %vm1652_vm4, %v3478_v7, %v3811_v5 }
0x1772   : > { %v3815_v6 = vpop.permute.xlu1 %3814 }
0x1773   : > { %v3822_v9 = vsel %vm2102_vm5, %v3821_v8, %v3815_v6 }
0x177b   : > { %v3819_v11 = vpop.permute.xlu1 %3818 }
0x177c   : > { %v3823_v10 = vsel %vm2104_vm6, %v3822_v9, %v3819_v11 }
0x177d   : > { %v3824_v12 = vpack.c.bf16 %v3823_v10, %v3823_v10 }
0x177f   : > { %7276 = vmatmul.mubr.msk.bf16.vlgmr.msra.gmra.mrb[72].mxu1 %vm1604_vm3, %v3824_v12 }
0x1780   : > { %7291 = vmatprep.mubr.msk.bf16.mxu1 %vm8450_vm0, %v8449_v1  ;;  %7288 = vmatpush3.bf16.msra.mxu1 %v7787_v18 }
0x1781   : > { %7289 = vmatprep.subr.bf16.mxu1 %v8449_v1 }
0x1784   : > { %7290 = vmatpush3.bf16.msra.mxu1 %v7788_v20 }
0x1785   : > { %7301 = vmatprep.subr.bf16.mxu1 %v8449_v1 }
0x178f   : > { %v3150_v13 = vpop.xlane.xlu0 %3149 }
0x1790   : > { %v3151_v14 = vmul.f32 0.03125, %v3150_v13 }
0x1792   : > { %v3152_v15 = vsub.f32 %v3147_v54, %v3151_v14 }
0x1794   : > { %v3153_v16 = vmul.f32 %v3152_v15, %v3152_v15 }
0x1796   : > { %v3154_v17 = vsel %vm1604_vm3, %v3153_v16, 0.0 }
0x1797   : > { %3155 = vadd.xlane.f32.xlu0 %v3154_v17 }
0x1824   : > { %v3156_v21 = vpop.xlane.xlu0 %3155 }
0x1825   : > { %v3157_v23 = vmul.f32 0.03125, %v3156_v21 }
0x1827   : > { %v3158_v24 = vadd.f32 1e-05, %v3157_v23 }
0x1829   : > { %7869 = vrsqrt.f32 %v3158_v24 }
0x1833   : > { %v7870_v25 = vpop.eup %7869 }
0x1834   : > { %v3160_v27 = vmul.f32 %v7870_v25, %v3152_v15 }
0x1836   : > { %v3167_v29 = vmul.f32 %v6713_v26, %v3160_v27 }
0x1838   : > { %v3174_v30 = vadd.f32 %v6714_v28, %v3167_v29 }
0x183a   : > { %v9318_v31 = vpack.c.bf16 %v3174_v30, %v3174_v30 }
0x183c   : > { %7292 = vmatmul.mubr.msk.bf16.vlgmr.msra.gmra.mrb[76].mxu1 %vm1604_vm3, %v9318_v31 }
0x183d   : > { %7303 = vmatprep.mubr.msk.bf16.mxu1 %vm8450_vm0, %v8449_v1 }
0x1852   : > { %v3880_v33 = vpop.f32.mrb[72].mxu1 }
0x1853   : > { %v3881_v34 = vadd.f32 %v6730_v32, %v3880_v33  ;;  %v7277_v35 = vpop.f32.mrb[73].mxu1 }
0x1854   : > { %v3883_v36 = vpop.f32.mrb[74].mxu1 }
0x1855   : > { %v7278_v37 = vpop.f32.mrb[75].mxu1  ;;  %v3886_v38 = vadd.f32 %v3881_v34, %v9226_v19 }
0x1857   : > { %v3887_v39 = vsel %vm1604_vm3, %v3886_v38, 0.0 }
0x1858   : > { %3888 = vadd.xlane.f32.xlu1 %v3887_v39 }
0x18e5   : > { %v3889_v40 = vpop.xlane.xlu1 %3888 }
0x18e6   : > { %v3890_v41 = vmul.f32 0.03125, %v3889_v40 }
0x18e8   : > { %v3891_v42 = vsub.f32 %v3886_v38, %v3890_v41 }
0x18ea   : > { %v3892_v43 = vmul.f32 %v3891_v42, %v3891_v42 }
0x18ec   : > { %v3893_v44 = vsel %vm1604_vm3, %v3892_v43, 0.0 }
0x18ed   : > { %3894 = vadd.xlane.f32.xlu0 %v3893_v44 }
0x190f   : > { %v4032_v19 = vpop.f32.mrb[76].mxu1 }
0x1910   : > { %v4033_v48 = vadd.f32 %v6740_v47, %v4032_v19  ;;  %v7293_v49 = vpop.f32.mrb[77].mxu1 }
0x1911   : > { %v4035_v50 = vpop.f32.mrb[78].mxu1 }
0x1912   : > { %v9331_v51 = vpack.c.bf16 %v4033_v48, %v4033_v48  ;;  %v7294_v52 = vpop.f32.mrb[79].mxu1 }
0x1914   : > { %4150 = vrot.lane.b32.xlu1 %v9331_v51, %s9834_s6  ;;  %v4044_v62 = vsel %vm1652_vm4, %v9331_v51, 0 }
0x1918   : > { %4260 = vrot.lane.b32.xlu1 %v9331_v51, %s9833_s5 }
0x197a   : > { %v3895_v53 = vpop.xlane.xlu0 %3894 }
0x197b   : > { %v3896_v55 = vmul.f32 0.03125, %v3895_v53 }
0x197d   : > { %v3897_v54 = vadd.f32 1e-05, %v3896_v55 }
0x197f   : > { %7871 = vrsqrt.f32 %v3897_v54 }
0x1986   : > { %v4151_v5 = vpop.permute.xlu1 %4150 }
0x1987   : > { %v4156_v8 = vsel %vm1652_vm4, %v4151_v5, 0 }
0x1989   : > { %v7872_v56 = vpop.eup %7871 }
0x198a   : > { %v3899_v58 = vmul.f32 %v7872_v56, %v3891_v42  ;;  %v4261_v9 = vpop.permute.xlu1 %4260 }
0x198b   : > { %v4266_v12 = vsel %vm1652_vm4, %v4261_v9, 0 }
0x198c   : > { %v3906_v60 = vmul.f32 %v6734_v57, %v3899_v58 }
0x198e   : > { %v9337_v22 = vadd.f32 %v6735_v59, %v3906_v60 }
0x1990   : > { %v3914_v61 = vpack.c.bf16 %v9337_v22, %v9337_v22 }
0x1992   : > { %7284 = vmatmul.mubr.msk.bf16.vlgmr.msra.gmra.mrb[68].mxu0 %vm1604_vm3, %v3914_v61 }
0x1993   : > { %7296 = vmatpush3.bf16.xpose.msra.mxu0 %v4044_v62  ;;  %7297 = vmatprep.mubr.msk.bf16.mxu0 %vm8450_vm0, %v8449_v1 }
0x1994   : > { %7307 = vmatprep.subr.bf16.mxu0 %v8449_v1 }
0x1a65   : > { %v3970_v2 = vpop.f32.mrb[68].mxu0 }
0x1a66   : > { %v3971_v3 = vadd.f32 %v6736_v63, %v3970_v2  ;;  %v7285_v0 = vpop.f32.mrb[69].mxu0 }
0x1a67   : > { %v3973_v4 = vpop.f32.mrb[70].mxu0 }
0x1a68   : > { %v4038_v6 = vpack.c.bf16 %v3971_v3, %v3971_v3  ;;  %v7286_v7 = vpop.f32.mrb[71].mxu0 }
0x1a6a   : > { %4148 = vrot.lane.b32.xlu0 %v4038_v6, %s9834_s6  ;;  %4258 = vrot.lane.b32.xlu1 %v4038_v6, %s9833_s5 }
0x1a6b   : > { %7298 = vmatmul.mubr.msk.bf16.vlgmr.msra.gmra.mrb[72].mxu0 %vm1652_vm4, %v4038_v6 }
0x1a6c   : > { %7308 = vmatpush3.bf16.xpose.msra.mxu0 %v4156_v8  ;;  %7309 = vmatprep.mubr.msk.bf16.mxu0 %vm8450_vm0, %v8449_v1 }
0x1a6d   : > { %7319 = vmatprep.subr.bf16.mxu0 %v8449_v1 }
0x1a6e   : > { %4370 = vrot.lane.b32.xlu0 %v9331_v51, %s9835_s11  ;;  %4368 = vrot.lane.b32.xlu1 %v4038_v6, %s9835_s11 }
0x1a72   : > { %4097 = vrot.lane.b32.xlu1 %v9331_v51, %s9832_s4 }
0x1adc   : > { %v4149_v11 = vpop.permute.xlu0 %4148  ;;  %v4259_v10 = vpop.permute.xlu1 %4258 }
0x1add   : > { %7310 = vmatmul.mubr.msk.bf16.vlgmr.msra.gmra.mrb[76].mxu0 %vm1652_vm4, %v4149_v11 }
0x1ade   : > { %7320 = vmatpush3.bf16.xpose.msra.mxu0 %v4266_v12  ;;  %7321 = vmatprep.mubr.msk.bf16.mxu0 %vm8450_vm0, %v8449_v1 }
0x1adf   : > { %7331 = vmatprep.subr.bf16.mxu0 %v8449_v1 }
0x1ae0   : > { %v4369_v13 = vpop.permute.xlu1 %4368  ;;  %v4371_v14 = vpop.permute.xlu0 %4370 }
0x1ae1   : > { %v4376_v16 = vsel %vm1652_vm4, %v4371_v14, 0 }
0x1ae4   : > { %v4098_v15 = vpop.permute.xlu1 %4097 }
0x1ae5   : > { %v4103_v17 = vsel %vm1481_vm1, %v4098_v15, 0  ;;  %7322 = vmatmul.mubr.msk.bf16.vlgmr.msra.gmra.mrb[80].mxu0 %vm1652_vm4, %v4259_v10 }
0x1ae6   : > { %7332 = vmatpush3.bf16.xpose.msra.mxu0 %v4376_v16  ;;  %7302 = vmatpush3.bf16.msra.mxu1 %v4103_v17 }
0x1ae7   : > { %7333 = vmatprep.mubr.msk.bf16.mxu0 %vm8450_vm0, %v8449_v1  ;;  %7313 = vmatprep.subr.bf16.mxu1 %v8449_v1 }
0x1ae8   : > { %7343 = vmatprep.subr.bf16.mxu0 %v8449_v1 }
0x1aed   : > { %7334 = vmatmul.mubr.msk.bf16.vlgmr.msra.gmra.mrb[84].mxu0 %vm1652_vm4, %v4369_v13  ;;  %v7791_v13 = vld [vmem:[%s9850_s9] sm:$0xff]  }
0x1aee   : > { %7347 = vmatprep.mubr.msk.bf16.mxu0 %vm8450_vm0, %v8449_v1  ;;  %7344 = vmatpush3.bf16.msra.mxu0 %v7791_v13 }
0x1aef   : > { %7345 = vmatprep.subr.bf16.mxu0 %v8449_v1 }
0x1b3e   : > { %v4080_v18 = vpop.f32.mrb[72].mxu0 }
0x1b3f   : > { %v7299_v20 = vpop.f32.mrb[73].mxu0  ;;  %v4086_v21 = vsel %vm1652_vm4, %v4080_v18, -inf }
0x1b40   : > { %4087 = vmax.xlane.f32.xlu0 %v4086_v21  ;;  %v4083_v23 = vpop.f32.mrb[74].mxu0 }
0x1b41   : > { %v7300_v24 = vpop.f32.mrb[75].mxu0  ;;  %v7792_v23 = vld [vmem:[%s9850_s9 + $0x8] sm:$0xff]  }
0x1b42   : > { %7346 = vmatpush3.bf16.msra.mxu0 %v7792_v23 }
0x1b43   : > { %7359 = vmatprep.subr.bf16.mxu0 %v8449_v1 }
0x1bb0   : > { %v4192_v25 = vpop.f32.mrb[76].mxu0 }
0x1bb1   : > { %v7311_v26 = vpop.f32.mrb[77].mxu0  ;;  %v4198_v27 = vsel %vm1652_vm4, %v4192_v25, -inf }
0x1bb2   : > { %4199 = vmax.xlane.f32.xlu1 %v4198_v27  ;;  %v4195_v28 = vpop.f32.mrb[78].mxu0 }
0x1bb3   : > { %v7312_v29 = vpop.f32.mrb[79].mxu0 }
0x1bb8   : > { %v4302_v30 = vpop.f32.mrb[80].mxu0 }
0x1bb9   : > { %v7323_v32 = vpop.f32.mrb[81].mxu0  ;;  %v4308_v33 = vsel %vm1652_vm4, %v4302_v30, -inf }
0x1bba   : > { %4309 = vmax.xlane.f32.xlu0 %v4308_v33  ;;  %v4305_v34 = vpop.f32.mrb[82].mxu0 }
0x1bbb   : > { %v7324_v35 = vpop.f32.mrb[83].mxu0 }
0x1bc0   : > { %v4412_v36 = vpop.f32.mrb[84].mxu0 }
0x1bc1   : > { %v7335_v37 = vpop.f32.mrb[85].mxu0  ;;  %v4418_v38 = vsel %vm1652_vm4, %v4412_v36, -inf }
0x1bc2   : > { %4419 = vmax.xlane.f32.xlu0 %v4418_v38  ;;  %v4415_v39 = vpop.f32.mrb[86].mxu0 }
0x1bc3   : > { %4318 = vrot.lane.b32.xlu1 %v9331_v51, %s9836_s12  ;;  %v7336_v40 = vpop.f32.mrb[87].mxu0 }
0x1bc7   : > { %4428 = vrot.lane.b32.xlu1 %v9331_v51, %s9837_s14 }
0x1bcd   : > { %v4088_v41 = vpop.xlane.xlu0 %4087 }
0x1bce   : > { %v4089_v42 = vsub.f32 %v4080_v18, %v4088_v41 }
0x1bd0   : > { %v4090_v43 = vmul.f32 1.442695, %v4089_v42 }
0x1bd2   : > { %7873 = vpow2.f32 %v4090_v43 }
0x1bd8   : > { %4208 = vrot.lane.b32.xlu0 %v9331_v51, %s9831_s3 }
0x1bdc   : > { %v7874_v44 = vpop.eup %7873 }
0x1bdd   : > { %v4095_v45 = vpack.c.bf16 %v7874_v44, %v7874_v44  ;;  %v4092_v5 = vsel %vm1652_vm4, %v7874_v44, 0.0 }
0x1bdf   : > { %7304 = vmatmul.mubr.msk.bf16.vlgmr.msra.gmra.mrb[80].mxu1 %vm1652_vm4, %v4095_v45 }
0x1be0   : > { %7315 = vmatprep.mubr.msk.bf16.mxu1 %vm8450_vm0, %v8449_v1 }
0x1c3f   : > { %v4200_v46 = vpop.xlane.xlu1 %4199 }
0x1c40   : > { %v4201_v47 = vsub.f32 %v4192_v25, %v4200_v46 }
0x1c42   : > { %v4202_v19 = vmul.f32 1.442695, %v4201_v47  ;;  %v6752_v47 = vld [vmem:[#allocation16] ss:$0 sm:$0xff] }
0x1c43   : > { %v4319_v58 = vpop.permute.xlu1 %4318 }
0x1c44   : > { %7875 = vpow2.f32 %v4202_v19  ;;  %v4324_v62 = vsel %vm1481_vm1, %v4319_v58, 0 }
0x1c47   : > { %v4310_v48 = vpop.xlane.xlu0 %4309  ;;  %v4429_v63 = vpop.permute.xlu1 %4428 }
0x1c48   : > { %v4311_v49 = vsub.f32 %v4302_v30, %v4310_v48  ;;  %v4434_v4 = vsel %vm1481_vm1, %v4429_v63, 0 }
0x1c4a   : > { %v4312_v50 = vmul.f32 1.442695, %v4311_v49 }
0x1c4c   : > { %7877 = vpow2.f32 %v4312_v50 }
0x1c4e   : > { %v7876_v52 = vpop.eup %7875 }
0x1c4f   : > { %v4420_v53 = vpop.xlane.xlu0 %4419  ;;  %v4204_v55 = vsel %vm1652_vm4, %v7876_v52, 0.0  ;;  %v4207_v60 = vpack.c.bf16 %v7876_v52, %v7876_v52 }
0x1c50   : > { %v4421_v51 = vsub.f32 %v4412_v36, %v4420_v53  ;;  %4205 = vadd.xlane.f32.xlu0 %v4204_v55 }
0x1c52   : > { %v4422_v54 = vmul.f32 1.442695, %v4421_v51 }
0x1c53   : > { %v4209_v56 = vpop.permute.xlu0 %4208 }
0x1c54   : > { %7879 = vpow2.f32 %v4422_v54  ;;  %v4214_v57 = vsel %vm1481_vm1, %v4209_v56, 0 }
0x1c55   : > { %7314 = vmatpush3.bf16.msra.mxu1 %v4214_v57 }
0x1c56   : > { %v7878_v59 = vpop.eup %7877  ;;  %7325 = vmatprep.subr.bf16.mxu1 %v8449_v1 }
0x1c57   : > { %v4314_v61 = vsel %vm1652_vm4, %v7878_v59, 0.0  ;;  %v4317_v3 = vpack.c.bf16 %v7878_v59, %v7878_v59  ;;  %v7793_v59 = vld [vmem:[%s9851_s10] sm:$0xff]  }
0x1c58   : > { %4315 = vadd.xlane.f32.xlu1 %v4314_v61  ;;  %7316 = vmatmul.mubr.msk.bf16.vlgmr.msra.gmra.mrb[84].mxu1 %vm1652_vm4, %v4207_v60  ;;  %v7794_v60 = vld [vmem:[%s9851_s10 + $0x8] sm:$0xff]   ;;  %v7795_v61 = vld [vmem:[%s9852_s16] sm:$0xff]  }
0x1c59   : > { %7326 = vmatpush3.bf16.msra.mxu1 %v4324_v62  ;;  %7327 = vmatprep.mubr.msk.bf16.mxu1 %vm8450_vm0, %v8449_v1 }
0x1c5a   : > { %7337 = vmatprep.subr.bf16.mxu1 %v8449_v1 }
0x1c5e   : > { %v7880_v2 = vpop.eup %7879 }
0x1c5f   : > { %v4424_v0 = vsel %vm1652_vm4, %v7880_v2, 0.0  ;;  %v4427_v6 = vpack.c.bf16 %v7880_v2, %v7880_v2 }
0x1c60   : > { %4425 = vadd.xlane.f32.xlu0 %v4424_v0  ;;  %7328 = vmatmul.mubr.msk.bf16.vlgmr.msra.gmra.mrb[88].mxu1 %vm1652_vm4, %v4317_v3  ;;  %v6756_v0 = vld [vmem:[#allocation17] ss:$0 sm:$0xff] }
0x1c61   : > { %7338 = vmatpush3.bf16.msra.mxu1 %v4434_v4  ;;  %7339 = vmatprep.mubr.msk.bf16.mxu1 %vm8450_vm0, %v8449_v1 }
0x1c62   : > { %7351 = vmatprep.subr.bf16.mxu1 %v8449_v1 }
0x1c64   : > { %4093 = vadd.xlane.f32.xlu0 %v4092_v5  ;;  %v6757_v5 = vld [vmem:[#allocation19] ss:$0 sm:$0xff] }
0x1c68   : > { %7340 = vmatmul.mubr.msk.bf16.vlgmr.msra.gmra.mrb[92].mxu1 %vm1652_vm4, %v4427_v6 }
0x1c69   : > { %7355 = vmatprep.mubr.msk.bf16.mxu1 %vm8450_vm0, %v8449_v1  ;;  %7352 = vmatpush3.bf16.msra.mxu1 %v7793_v59 }
0x1c6a   : > { %7353 = vmatprep.subr.bf16.mxu1 %v8449_v1 }
0x1c6d   : > { %7354 = vmatpush3.bf16.msra.mxu1 %v7794_v60 }
0x1c6e   : > { %7371 = vmatprep.subr.bf16.mxu1 %v8449_v1 }
0x1cb2   : > { %v4139_v7 = vpop.f32.mrb[80].mxu1 }
0x1cb3   : > { %v7305_v8 = vpop.f32.mrb[81].mxu1 }
0x1cb4   : > { %v4142_v9 = vpop.f32.mrb[82].mxu1 }
0x1cb5   : > { %v7306_v11 = vpop.f32.mrb[83].mxu1  ;;  %v7797_v9 = vld [vmem:[%s9852_s16 + $0x10] sm:$0xff]  }
0x1cb6   : > { %v7798_v11 = vld [vmem:[%s9852_s16 + $0x18] sm:$0xff]  }
0x1cdd   : > { %v4206_v10 = vpop.xlane.xlu0 %4205 }
0x1cde   : > { %7881 = vrcp.f32 %v4206_v10  ;;  %v6758_v10 = vld [vmem:[#allocation20] ss:$0 sm:$0xff] }
0x1ce5   : > { %v4316_v12 = vpop.xlane.xlu1 %4315 }
0x1ce6   : > { %7883 = vrcp.f32 %v4316_v12 }
0x1ce8   : > { %v7882_v14 = vpop.eup %7881 }
0x1ced   : > { %v4426_v20 = vpop.xlane.xlu0 %4425 }
0x1cee   : > { %7885 = vrcp.f32 %v4426_v20  ;;  %v6762_v20 = vld [vmem:[#allocation22] ss:$0 sm:$0xff] }
0x1cf0   : > { %v7884_v24 = vpop.eup %7883 }
0x1cf1   : > { %v4094_v37 = vpop.xlane.xlu0 %4093 }
0x1cf2   : > { %7887 = vrcp.f32 %v4094_v37 }
0x1cf8   : > { %v7886_v30 = vpop.eup %7885 }
0x1cfc   : > { %v7888_v38 = vpop.eup %7887 }
0x1cfd   : > { %v4146_v40 = vmul.f32 %v7888_v38, %v4139_v7 }
0x1d2b   : > { %v4250_v15 = vpop.f32.mrb[84].mxu1 }
0x1d2c   : > { %v4257_v16 = vmul.f32 %v7882_v14, %v4250_v15  ;;  %v7317_v17 = vpop.f32.mrb[85].mxu1 }
0x1d2d   : > { %v4253_v18 = vpop.f32.mrb[86].mxu1 }
0x1d2e   : > { %4479 = vrot.lane.b32.xlu1 %v4257_v16, %s9842_s21  ;;  %v7318_v21 = vpop.f32.mrb[87].mxu1 }
0x1d33   : > { %v4360_v25 = vpop.f32.mrb[88].mxu1 }
0x1d34   : > { %v4367_v26 = vmul.f32 %v7884_v24, %v4360_v25  ;;  %v7329_v27 = vpop.f32.mrb[89].mxu1 }
0x1d35   : > { %v4363_v28 = vpop.f32.mrb[90].mxu1 }
0x1d36   : > { %4483 = vrot.lane.b32.xlu0 %v4367_v26, %s9843_s24  ;;  %v7330_v29 = vpop.f32.mrb[91].mxu1 }
0x1d3b   : > { %v4470_v32 = vpop.f32.mrb[92].mxu1 }
0x1d3c   : > { %v4477_v33 = vmul.f32 %v7886_v30, %v4470_v32  ;;  %v7341_v34 = vpop.f32.mrb[93].mxu1 }
0x1d3d   : > { %v4473_v35 = vpop.f32.mrb[94].mxu1 }
0x1d3e   : > { %4487 = vrot.lane.b32.xlu1 %v4477_v33, %s9844_s25  ;;  %v7342_v36 = vpop.f32.mrb[95].mxu1  ;;  %v7799_v35 = vld [vmem:[%s9846_s2 + $0x10] sm:$0xff]  }
0x1d3f   : > { %v7800_v36 = vld [vmem:[%s9846_s2 + $0x18] sm:$0xff]  }
0x1da0   : > { %v4480_v39 = vpop.permute.xlu1 %4479 }
0x1da1   : > { %v4490_v42 = vsel %vm1652_vm4, %v4146_v40, %v4480_v39 }
0x1da8   : > { %v4484_v41 = vpop.permute.xlu0 %4483 }
0x1da9   : > { %v4491_v43 = vsel %vm2102_vm5, %v4490_v42, %v4484_v41  ;;  %v6768_v41 = vld [vmem:[#allocation23] ss:$0 sm:$0xff] }
0x1db0   : > { %v4488_v44 = vpop.permute.xlu1 %4487 }
0x1db1   : > { %v4492_v45 = vsel %vm2104_vm6, %v4491_v43, %v4488_v44  ;;  %v6769_v43 = vld [vmem:[#allocation25] ss:$0 sm:$0xff] }
0x1db2   : > { %v4493_v46 = vpack.c.bf16 %v4492_v45, %v4492_v45 }
0x1db4   : > { %7348 = vmatmul.mubr.msk.bf16.vlgmr.msra.gmra.mrb[88].mxu0 %vm1604_vm3, %v4493_v46 }
0x1db5   : > { %7367 = vmatprep.mubr.msk.bf16.mxu0 %vm8450_vm0, %v8449_v1  ;;  %7360 = vmatpush3.bf16.msra.mxu0 %v7795_v61 }
0x1db6   : > { %7361 = vmatprep.subr.bf16.mxu0 %v8449_v1 }
0x1e87   : > { %v4549_v19 = vpop.f32.mrb[88].mxu0 }
0x1e88   : > { %v4550_v48 = vadd.f32 %v6752_v47, %v4549_v19  ;;  %v7349_v49 = vpop.f32.mrb[89].mxu0  ;;  %v6802_v47 = vld [vmem:[#allocation7 + $0x1] ss:$0 sm:$0xff] }
0x1e89   : > { %v4552_v50 = vpop.f32.mrb[90].mxu0 }
0x1e8a   : > { %v7350_v52 = vpop.f32.mrb[91].mxu0  ;;  %v4555_v53 = vadd.f32 %v4550_v48, %v9337_v22  ;;  %v7796_v22 = vld [vmem:[%s9852_s16 + $0x8] sm:$0xff]  }
0x1e8b   : > { %7362 = vmatpush3.bf16.msra.mxu0 %v7796_v22 }
0x1e8c   : > { %v4556_v55 = vsel %vm1604_vm3, %v4555_v53, 0.0  ;;  %7363 = vmatprep.subr.bf16.mxu0 %v8449_v1 }
0x1e8d   : > { %4557 = vadd.xlane.f32.xlu1 %v4556_v55 }
0x1e8f   : > { %7364 = vmatpush3.bf16.msra.mxu0 %v7797_v9 }
0x1e90   : > { %7365 = vmatprep.subr.bf16.mxu0 %v8449_v1 }
0x1e93   : > { %7366 = vmatpush3.bf16.msra.mxu0 %v7798_v11 }
0x1e94   : > { %7385 = vmatprep.subr.bf16.mxu0 %v8449_v1 }
0x1f1a   : > { %v4558_v51 = vpop.xlane.xlu1 %4557 }
0x1f1b   : > { %v4559_v54 = vmul.f32 0.03125, %v4558_v51 }
0x1f1d   : > { %v4560_v56 = vsub.f32 %v4555_v53, %v4559_v54 }
0x1f1f   : > { %v4561_v57 = vmul.f32 %v4560_v56, %v4560_v56 }
0x1f21   : > { %v4562_v58 = vsel %vm1604_vm3, %v4561_v57, 0.0 }
0x1f22   : > { %4563 = vadd.xlane.f32.xlu0 %v4562_v58 }
0x1faf   : > { %v4564_v62 = vpop.xlane.xlu0 %4563 }
0x1fb0   : > { %v4565_v63 = vmul.f32 0.03125, %v4564_v62 }
0x1fb2   : > { %v4566_v2 = vadd.f32 1e-05, %v4565_v63 }
0x1fb4   : > { %7889 = vrsqrt.f32 %v4566_v2 }
0x1fbe   : > { %v7890_v3 = vpop.eup %7889 }
0x1fbf   : > { %v4568_v4 = vmul.f32 %v7890_v3, %v4560_v56 }
0x1fc1   : > { %v4575_v6 = vmul.f32 %v6756_v0, %v4568_v4 }
0x1fc3   : > { %v4582_v7 = vadd.f32 %v6757_v5, %v4575_v6 }
0x1fc5   : > { %v4583_v8 = vpack.c.bf16 %v4582_v7, %v4582_v7 }
0x1fc7   : > { %7356 = vmatmul.mubr.msk.bf16.vlgmr.msra.gmra.mrb[96].mxu1 %vm1604_vm3, %v4583_v8 }
0x1fc8   : > { %7375 = vmatprep.mubr.msk.bf16.mxu1 %vm8450_vm0, %v8449_v1  ;;  %7372 = vmatpush3.bf16.msra.mxu1 %v7799_v35 }
0x1fc9   : > { %7373 = vmatprep.subr.bf16.mxu1 %v8449_v1 }
0x1fcc   : > { %7374 = vmatpush3.bf16.msra.mxu1 %v7800_v36 }
0x1fcd   : > { %7379 = vmatprep.subr.bf16.mxu1 %v8449_v1 }
0x209a   : > { %v4639_v12 = vpop.f32.mrb[96].mxu1 }
0x209b   : > { %v4640_v13 = vadd.f32 %v6758_v10, %v4639_v12  ;;  %v7357_v14 = vpop.f32.mrb[97].mxu1 }
0x209c   : > { %v4642_v15 = vpop.f32.mrb[98].mxu1 }
0x209d   : > { %v4645_v16 = vmax.f32 %v4640_v13, 0.0  ;;  %v7358_v17 = vpop.f32.mrb[99].mxu1 }
0x209f   : > { %v4646_v18 = vpack.c.bf16 %v4645_v16, %v4645_v16 }
0x20a1   : > { %7368 = vmatmul.mubr.msk.bf16.vlgmr.msra.gmra.mrb[92].mxu0 %vm2291_vm7, %v4646_v18 }
0x20a2   : > { %7387 = vmatprep.mubr.msk.bf16.mxu0 %vm8450_vm0, %v8449_v1 }
0x2174   : > { %v4714_v21 = vpop.f32.mrb[92].mxu0 }
0x2175   : > { %v4715_v23 = vadd.f32 %v6762_v20, %v4714_v21  ;;  %v7369_v24 = vpop.f32.mrb[93].mxu0 }
0x2176   : > { %v4717_v25 = vpop.f32.mrb[94].mxu0 }
0x2177   : > { %v4720_v26 = vadd.f32 %v4715_v23, %v4582_v7  ;;  %v7370_v27 = vpop.f32.mrb[95].mxu0 }
0x2179   : > { %v4721_v28 = vsel %vm1604_vm3, %v4720_v26, 0.0 }
0x217a   : > { %4722 = vadd.xlane.f32.xlu0 %v4721_v28 }
0x2207   : > { %v4723_v29 = vpop.xlane.xlu0 %4722 }
0x2208   : > { %v4724_v30 = vmul.f32 0.03125, %v4723_v29 }
0x220a   : > { %v4725_v32 = vsub.f32 %v4720_v26, %v4724_v30 }
0x220c   : > { %v4726_v33 = vmul.f32 %v4725_v32, %v4725_v32 }
0x220e   : > { %v4727_v34 = vsel %vm1604_vm3, %v4726_v33, 0.0 }
0x220f   : > { %4728 = vadd.xlane.f32.xlu1 %v4727_v34 }
0x229c   : > { %v4729_v37 = vpop.xlane.xlu1 %4728 }
0x229d   : > { %v4730_v38 = vmul.f32 0.03125, %v4729_v37 }
0x229f   : > { %v4731_v39 = vadd.f32 1e-05, %v4730_v38 }
0x22a1   : > { %7891 = vrsqrt.f32 %v4731_v39 }
0x22ab   : > { %v7892_v40 = vpop.eup %7891 }
0x22ac   : > { %v4733_v42 = vmul.f32 %v7892_v40, %v4725_v32 }
0x22ae   : > { %v4740_v44 = vmul.f32 %v6768_v41, %v4733_v42 }
0x22b0   : > { %v9446_v45 = vadd.f32 %v6769_v43, %v4740_v44 }
0x22b2   : > { %v4813_v46 = vpack.c.bf16 %v9446_v45, %v9446_v45 }
0x22b4   : > { %7376 = vmatmul.mubr.msk.bf16.vlgmr.msra.gmra.mrb[100].mxu1 %vm1604_vm3, %v4813_v46 }
0x22b5   : > { %7381 = vmatprep.mubr.msk.bf16.mxu1 %vm8450_vm0, %v8449_v1 }
0x2387   : > { %v4869_v19 = vpop.f32.mrb[100].mxu1 }
0x2388   : > { %v4870_v48 = vadd.f32 %v6802_v47, %v4869_v19  ;;  %v7377_v49 = vpop.f32.mrb[101].mxu1 }
0x2389   : > { %v4872_v50 = vpop.f32.mrb[102].mxu1 }
0x238a   : > { %v9453_v52 = vpack.c.bf16 %v4870_v48, %v4870_v48  ;;  %v7378_v53 = vpop.f32.mrb[103].mxu1 }
0x238c   : > { %4987 = vrot.lane.b32.xlu1 %v9453_v52, %s9831_s3  ;;  %4877 = vrot.lane.b32.xlu0 %v9453_v52, %s9832_s4 }
0x2390   : > { %4985 = vrot.lane.b32.xlu1 %v9453_v52, %s9834_s6  ;;  %5097 = vrot.lane.b32.xlu0 %v9453_v52, %s9836_s12 }
0x2394   : > { %5095 = vrot.lane.b32.xlu1 %v9453_v52, %s9833_s5  ;;  %5207 = vrot.lane.b32.xlu0 %v9453_v52, %s9837_s14 }
0x2398   : > { %5205 = vrot.lane.b32.xlu1 %v9453_v52, %s9835_s11 }
0x239c   : > { %4935 = vrot.lane.b32.xlu1 %v9453_v52, %s9839_s17  ;;  %s1466_s17 = scalar_lea.vmem %s8677_s13, %s8964_s22 }
0x23fe   : > { %v4988_v55 = vpop.permute.xlu1 %4987  ;;  %v4878_v51 = vpop.permute.xlu0 %4877 }
0x23ff   : > { %v4883_v54 = vsel %vm1652_vm4, %v4878_v51, 0  ;;  %v4993_v58 = vsel %vm1652_vm4, %v4988_v55, 0 }
0x2400   : > { %7380 = vmatpush3.bf16.xpose.msra.mxu1 %v4883_v54 }
0x2401   : > { %7391 = vmatprep.subr.bf16.mxu1 %v8449_v1 }
0x2402   : > { %v4986_v56 = vpop.permute.xlu1 %4985  ;;  %v5098_v60 = vpop.permute.xlu0 %5097 }
0x2403   : > { %v5103_v22 = vsel %vm1652_vm4, %v5098_v60, 0 }
0x2406   : > { %v5096_v57 = vpop.permute.xlu1 %5095  ;;  %v5208_v63 = vpop.permute.xlu0 %5207 }
0x2407   : > { %7382 = vmatmul.mubr.msk.bf16.vlgmr.msra.gmra.mrb[104].mxu1 %vm1652_vm4, %v9453_v52  ;;  %v5213_v2 = vsel %vm1652_vm4, %v5208_v63, 0 }
0x2408   : > { %7392 = vmatpush3.bf16.xpose.msra.mxu1 %v4993_v58  ;;  %7393 = vmatprep.mubr.msk.bf16.mxu1 %vm8450_vm0, %v8449_v1 }
0x2409   : > { %7403 = vmatprep.subr.bf16.mxu1 %v8449_v1 }
0x240a   : > { %v5206_v59 = vpop.permute.xlu1 %5205 }
0x240e   : > { %v4936_v61 = vpop.permute.xlu1 %4935 }
0x240f   : > { %v4941_v62 = vsel %vm1481_vm1, %v4936_v61, 0  ;;  %7394 = vmatmul.mubr.msk.bf16.vlgmr.msra.gmra.mrb[108].mxu1 %vm1652_vm4, %v4986_v56  ;;  %v7801_v61 = vld [vmem:[%s9847_s1 + $0x10] sm:$0xff]  }
0x2410   : > { %7386 = vmatpush3.bf16.msra.mxu0 %v4941_v62  ;;  %7404 = vmatpush3.bf16.xpose.msra.mxu1 %v5103_v22 }
0x2411   : > { %7405 = vmatprep.mubr.msk.bf16.mxu1 %vm8450_vm0, %v8449_v1  ;;  %7415 = vmatprep.subr.bf16.mxu1 %v8449_v1 }
0x2412   : > { %7397 = vmatprep.subr.bf16.mxu0 %v8449_v1 }
0x2417   : > { %7406 = vmatmul.mubr.msk.bf16.vlgmr.msra.gmra.mrb[112].mxu1 %vm1652_vm4, %v5096_v57 }
0x2418   : > { %7416 = vmatpush3.bf16.xpose.msra.mxu1 %v5213_v2  ;;  %7417 = vmatprep.mubr.msk.bf16.mxu1 %vm8450_vm0, %v8449_v1 }
0x2419   : > { %7427 = vmatprep.subr.bf16.mxu1 %v8449_v1 }
0x241f   : > { %7418 = vmatmul.mubr.msk.bf16.vlgmr.msra.gmra.mrb[116].mxu1 %vm1652_vm4, %v5206_v59 }
0x2420   : > { %7431 = vmatprep.mubr.msk.bf16.mxu1 %vm8450_vm0, %v8449_v1  ;;  %7428 = vmatpush3.bf16.msra.mxu1 %v7801_v61 }
0x2421   : > { %7429 = vmatprep.subr.bf16.mxu1 %v8449_v1 }
0x24da   : > { %v4919_v3 = vpop.f32.mrb[104].mxu1 }
0x24db   : > { %v7383_v0 = vpop.f32.mrb[105].mxu1  ;;  %v4925_v4 = vsel %vm1652_vm4, %v4919_v3, -inf }
0x24dc   : > { %4926 = vmax.xlane.f32.xlu0 %v4925_v4  ;;  %v4922_v5 = vpop.f32.mrb[106].mxu1 }
0x24dd   : > { %v7384_v6 = vpop.f32.mrb[107].mxu1  ;;  %v7802_v5 = vld [vmem:[%s9847_s1 + $0x18] sm:$0xff]  }
0x24de   : > { %7430 = vmatpush3.bf16.msra.mxu1 %v7802_v5 }
0x24df   : > { %7443 = vmatprep.subr.bf16.mxu1 %v8449_v1 }
0x24e2   : > { %v5029_v7 = vpop.f32.mrb[108].mxu1 }
0x24e3   : > { %v7395_v8 = vpop.f32.mrb[109].mxu1  ;;  %v5035_v9 = vsel %vm1652_vm4, %v5029_v7, -inf }
0x24e4   : > { %5036 = vmax.xlane.f32.xlu1 %v5035_v9  ;;  %v5032_v11 = vpop.f32.mrb[110].mxu1 }
0x24e5   : > { %v7396_v10 = vpop.f32.mrb[111].mxu1 }
0x24ea   : > { %v5139_v12 = vpop.f32.mrb[112].mxu1 }
0x24eb   : > { %v7407_v13 = vpop.f32.mrb[113].mxu1  ;;  %v5145_v14 = vsel %vm1652_vm4, %v5139_v12, -inf }
0x24ec   : > { %5146 = vmax.xlane.f32.xlu0 %v5145_v14  ;;  %v5142_v15 = vpop.f32.mrb[114].mxu1 }
0x24ed   : > { %v7408_v16 = vpop.f32.mrb[115].mxu1 }
0x24f2   : > { %v5249_v17 = vpop.f32.mrb[116].mxu1 }
0x24f3   : > { %v7419_v18 = vpop.f32.mrb[117].mxu1  ;;  %v5255_v20 = vsel %vm1652_vm4, %v5249_v17, -inf }
0x24f4   : > { %5256 = vmax.xlane.f32.xlu0 %v5255_v20  ;;  %v5252_v21 = vpop.f32.mrb[118].mxu1 }
0x24f5   : > { %5155 = vrot.lane.b32.xlu1 %v9453_v52, %s9841_s20  ;;  %v7420_v23 = vpop.f32.mrb[119].mxu1 }
0x24f9   : > { %5265 = vrot.lane.b32.xlu1 %v9453_v52, %s9840_s19 }
0x250a   : > { %5045 = vrot.lane.b32.xlu0 %v9453_v52, %s9838_s15 }
0x2569   : > { %v4927_v24 = vpop.xlane.xlu0 %4926 }
0x256a   : > { %v4928_v25 = vsub.f32 %v4919_v3, %v4927_v24 }
0x256c   : > { %v4929_v26 = vmul.f32 1.442695, %v4928_v25 }
0x256e   : > { %7893 = vpow2.f32 %v4929_v26 }
0x2571   : > { %v5037_v27 = vpop.xlane.xlu1 %5036 }
0x2572   : > { %v5038_v28 = vsub.f32 %v5029_v7, %v5037_v27 }
0x2574   : > { %v5039_v29 = vmul.f32 1.442695, %v5038_v28 }
0x2575   : > { %v5156_v43 = vpop.permute.xlu1 %5155 }
0x2576   : > { %7895 = vpow2.f32 %v5039_v29  ;;  %v5161_v19 = vsel %vm1481_vm1, %v5156_v43, 0  ;;  %v7803_v29 = vld [vmem:[%s9848_s0 + $0x10] sm:$0xff]  }
0x2578   : > { %v7894_v30 = vpop.eup %7893 }
0x2579   : > { %v5147_v32 = vpop.xlane.xlu0 %5146  ;;  %v4934_v33 = vpack.c.bf16 %v7894_v30, %v7894_v30  ;;  %v5266_v48 = vpop.permute.xlu1 %5265  ;;  %v4931_v55 = vsel %vm1652_vm4, %v7894_v30, 0.0 }
0x257a   : > { %v5148_v34 = vsub.f32 %v5139_v12, %v5147_v32  ;;  %v5271_v53 = vsel %vm1481_vm1, %v5266_v48, 0  ;;  %v7804_v32 = vld [vmem:[%s9848_s0 + $0x18] sm:$0xff]  }
0x257b   : > { %7388 = vmatmul.mubr.msk.bf16.vlgmr.msra.gmra.mrb[96].mxu0 %vm1652_vm4, %v4934_v33  ;;  %v6814_v33 = vld [vmem:[#allocation8 + $0x1] ss:$0 sm:$0xff] }
0x257c   : > { %v5149_v35 = vmul.f32 1.442695, %v5148_v34  ;;  %7399 = vmatprep.mubr.msk.bf16.mxu0 %vm8450_vm0, %v8449_v1 }
0x257e   : > { %7897 = vpow2.f32 %v5149_v35 }
0x2580   : > { %v7896_v36 = vpop.eup %7895 }
0x2581   : > { %v5257_v37 = vpop.xlane.xlu0 %5256  ;;  %v5041_v38 = vsel %vm1652_vm4, %v7896_v36, 0.0  ;;  %v5044_v46 = vpack.c.bf16 %v7896_v36, %v7896_v36 }
0x2582   : > { %v5258_v39 = vsub.f32 %v5249_v17, %v5257_v37  ;;  %5042 = vadd.xlane.f32.xlu0 %v5041_v38 }
0x2584   : > { %v5259_v40 = vmul.f32 1.442695, %v5258_v39 }
0x2585   : > { %v5046_v41 = vpop.permute.xlu0 %5045 }
0x2586   : > { %7899 = vpow2.f32 %v5259_v40  ;;  %v5051_v42 = vsel %vm1481_vm1, %v5046_v41, 0 }
0x2587   : > { %7398 = vmatpush3.bf16.msra.mxu0 %v5051_v42 }
0x2588   : > { %v7898_v44 = vpop.eup %7897  ;;  %7409 = vmatprep.subr.bf16.mxu0 %v8449_v1 }
0x2589   : > { %v5151_v47 = vsel %vm1652_vm4, %v7898_v44, 0.0  ;;  %v5154_v50 = vpack.c.bf16 %v7898_v44, %v7898_v44 }
0x258a   : > { %5152 = vadd.xlane.f32.xlu1 %v5151_v47  ;;  %7400 = vmatmul.mubr.msk.bf16.vlgmr.msra.gmra.mrb[100].mxu0 %vm1652_vm4, %v5044_v46 }
0x258b   : > { %7410 = vmatpush3.bf16.msra.mxu0 %v5161_v19  ;;  %7411 = vmatprep.mubr.msk.bf16.mxu0 %vm8450_vm0, %v8449_v1 }
0x258c   : > { %7421 = vmatprep.subr.bf16.mxu0 %v8449_v1 }
0x2590   : > { %v7900_v49 = vpop.eup %7899 }
0x2591   : > { %v5261_v52 = vsel %vm1652_vm4, %v7900_v49, 0.0  ;;  %v5264_v51 = vpack.c.bf16 %v7900_v49, %v7900_v49  ;;  %v6824_v49 = vld [vmem:[#allocation14 + $0x1] ss:$0 sm:$0xff] }
0x2592   : > { %5262 = vadd.xlane.f32.xlu0 %v5261_v52  ;;  %7412 = vmatmul.mubr.msk.bf16.vlgmr.msra.gmra.mrb[104].mxu0 %vm1652_vm4, %v5154_v50  ;;  %v7805_v52 = vld [vmem:[%s9849_s7 + $0x10] sm:$0xff]  }
0x2593   : > { %7422 = vmatpush3.bf16.msra.mxu0 %v5271_v53  ;;  %7423 = vmatprep.mubr.msk.bf16.mxu0 %vm8450_vm0, %v8449_v1  ;;  %v7806_v53 = vld [vmem:[%s9849_s7 + $0x18] sm:$0xff]  }
0x2594   : > { %7435 = vmatprep.subr.bf16.mxu0 %v8449_v1 }
0x2596   : > { %4932 = vadd.xlane.f32.xlu0 %v4931_v55 }
0x259a   : > { %7424 = vmatmul.mubr.msk.bf16.vlgmr.msra.gmra.mrb[108].mxu0 %vm1652_vm4, %v5264_v51 }
0x259b   : > { %7439 = vmatprep.mubr.msk.bf16.mxu0 %vm8450_vm0, %v8449_v1  ;;  %7436 = vmatpush3.bf16.msra.mxu0 %v7805_v52 }
0x259c   : > { %7437 = vmatprep.subr.bf16.mxu0 %v8449_v1 }
0x259f   : > { %7438 = vmatpush3.bf16.msra.mxu0 %v7806_v53 }
0x25a0   : > { %7451 = vmatprep.subr.bf16.mxu0 %v8449_v1 }
0x260f   : > { %v5043_v57 = vpop.xlane.xlu0 %5042 }
0x2610   : > { %7901 = vrcp.f32 %v5043_v57  ;;  %v6818_v57 = vld [vmem:[#allocation10 + $0x1] ss:$0 sm:$0xff] }
0x2617   : > { %v5153_v60 = vpop.xlane.xlu1 %5152 }
0x2618   : > { %7903 = vrcp.f32 %v5153_v60 }
0x261a   : > { %v7902_v22 = vpop.eup %7901 }
0x261f   : > { %v5263_v0 = vpop.xlane.xlu0 %5262 }
0x2620   : > { %7905 = vrcp.f32 %v5263_v0 }
0x2622   : > { %v7904_v6 = vpop.eup %7903 }
0x2623   : > { %v4933_v18 = vpop.xlane.xlu0 %4932 }
0x2624   : > { %7907 = vrcp.f32 %v4933_v18 }
0x262a   : > { %v7906_v12 = vpop.eup %7905 }
0x262e   : > { %v7908_v20 = vpop.eup %7907 }
0x264e   : > { %v4977_v54 = vpop.f32.mrb[96].mxu0 }
0x264f   : > { %v7389_v56 = vpop.f32.mrb[97].mxu0  ;;  %v4984_v23 = vmul.f32 %v7908_v20, %v4977_v54 }
0x2650   : > { %v4980_v58 = vpop.f32.mrb[98].mxu0 }
0x2651   : > { %v7390_v59 = vpop.f32.mrb[99].mxu0 }
0x2652   : > { %v6819_v59 = vld [vmem:[#allocation11 + $0x1] ss:$0 sm:$0xff] }
0x265d   : > { %v5087_v62 = vpop.f32.mrb[100].mxu0 }
0x265e   : > { %v5094_v63 = vmul.f32 %v7902_v22, %v5087_v62  ;;  %v7401_v2 = vpop.f32.mrb[101].mxu0 }
0x265f   : > { %v5090_v3 = vpop.f32.mrb[102].mxu0 }
0x2660   : > { %v7402_v4 = vpop.f32.mrb[103].mxu0  ;;  %5316 = vrot.lane.b32.xlu1 %v5094_v63, %s9842_s21  ;;  %v6820_v63 = vld [vmem:[#allocation13 + $0x1] ss:$0 sm:$0xff] }
0x2665   : > { %v5197_v7 = vpop.f32.mrb[104].mxu0 }
0x2666   : > { %v5204_v8 = vmul.f32 %v7904_v6, %v5197_v7  ;;  %v7413_v9 = vpop.f32.mrb[105].mxu0 }
0x2667   : > { %v5200_v11 = vpop.f32.mrb[106].mxu0 }
0x2668   : > { %5320 = vrot.lane.b32.xlu0 %v5204_v8, %s9843_s24  ;;  %v7414_v10 = vpop.f32.mrb[107].mxu0 }
0x266d   : > { %v5307_v13 = vpop.f32.mrb[108].mxu0 }
0x266e   : > { %v5314_v14 = vmul.f32 %v7906_v12, %v5307_v13  ;;  %v7425_v15 = vpop.f32.mrb[109].mxu0 }
0x266f   : > { %v5310_v16 = vpop.f32.mrb[110].mxu0 }
0x2670   : > { %v7426_v17 = vpop.f32.mrb[111].mxu0  ;;  %5324 = vrot.lane.b32.xlu1 %v5314_v14, %s9844_s25 }
0x26d2   : > { %v5317_v21 = vpop.permute.xlu1 %5316 }
0x26d3   : > { %v5327_v25 = vsel %vm1652_vm4, %v4984_v23, %v5317_v21 }
0x26da   : > { %v5321_v24 = vpop.permute.xlu0 %5320 }
0x26db   : > { %v5328_v26 = vsel %vm2102_vm5, %v5327_v25, %v5321_v24 }
0x26e2   : > { %v5325_v27 = vpop.permute.xlu1 %5324 }
0x26e3   : > { %v5329_v28 = vsel %vm2104_vm6, %v5328_v26, %v5325_v27 }
0x26e4   : > { %v5330_v30 = vpack.c.bf16 %v5329_v28, %v5329_v28 }
0x26e6   : > { %7432 = vmatmul.mubr.msk.bf16.vlgmr.msra.gmra.mrb[120].mxu1 %vm1604_vm3, %v5330_v30 }
0x26e7   : > { %7444 = vmatpush3.bf16.msra.mxu1 %v7803_v29  ;;  %7447 = vmatprep.mubr.msk.bf16.mxu1 %vm8450_vm0, %v8449_v1 }
0x26e8   : > { %7445 = vmatprep.subr.bf16.mxu1 %v8449_v1 }
0x26eb   : > { %7446 = vmatpush3.bf16.msra.mxu1 %v7804_v32 }
0x26ec   : > { %7457 = vmatprep.subr.bf16.mxu1 %v8449_v1 }
0x26ee   : > { %7448 = vmatmul.mubr.msk.bf16.vlgmr.msra.gmra.mrb[124].mxu1 %vm1604_vm3, %v9318_v31 }
0x26ef   : > { %7459 = vmatprep.mubr.msk.bf16.mxu1 %vm8450_vm0, %v8449_v1 }
0x27b9   : > { %v5386_v34 = vpop.f32.mrb[120].mxu1 }
0x27ba   : > { %v5387_v35 = vadd.f32 %v6814_v33, %v5386_v34  ;;  %v7433_v36 = vpop.f32.mrb[121].mxu1 }
0x27bb   : > { %v5389_v37 = vpop.f32.mrb[122].mxu1 }
0x27bc   : > { %v5392_v38 = vadd.f32 %v5387_v35, %v9446_v45  ;;  %v7434_v39 = vpop.f32.mrb[123].mxu1 }
0x27be   : > { %v5393_v40 = vsel %vm1604_vm3, %v5392_v38, 0.0 }
0x27bf   : > { %5394 = vadd.xlane.f32.xlu1 %v5393_v40 }
0x27c1   : > { %v5534_v41 = vpop.f32.mrb[124].mxu1 }
0x27c2   : > { %v7449_v42 = vpop.f32.mrb[125].mxu1  ;;  %v5535_v50 = vadd.f32 %v6824_v49, %v5534_v41 }
0x27c3   : > { %v5537_v43 = vpop.f32.mrb[126].mxu1 }
0x27c4   : > { %v7450_v31 = vpop.f32.mrb[127].mxu1  ;;  %v9550_v45 = vpack.c.bf16 %v5535_v50, %v5535_v50 }
0x27c6   : > { %v5546_v62 = vsel %vm1652_vm4, %v9550_v45, 0 }
0x284c   : > { %v5395_v44 = vpop.xlane.xlu1 %5394 }
0x284d   : > { %v5396_v46 = vmul.f32 0.03125, %v5395_v44 }
0x284f   : > { %v5397_v47 = vsub.f32 %v5392_v38, %v5396_v46 }
0x2851   : > { %v5398_v19 = vmul.f32 %v5397_v47, %v5397_v47 }
0x2853   : > { %v5399_v48 = vsel %vm1604_vm3, %v5398_v19, 0.0 }
0x2854   : > { %5400 = vadd.xlane.f32.xlu0 %v5399_v48 }
0x286a   : > { %5652 = vrot.lane.b32.xlu0 %v9550_v45, %s9834_s6 }
0x28e1   : > { %v5401_v55 = vpop.xlane.xlu0 %5400 }
0x28e2   : > { %v5402_v51 = vmul.f32 0.03125, %v5401_v55 }
0x28e4   : > { %v5403_v54 = vadd.f32 1e-05, %v5402_v51 }
0x28e5   : > { %v5653_v5 = vpop.permute.xlu0 %5652 }
0x28e6   : > { %7909 = vrsqrt.f32 %v5403_v54  ;;  %v5658_v8 = vsel %vm1652_vm4, %v5653_v5, 0 }
0x28f0   : > { %v7910_v56 = vpop.eup %7909 }
0x28f1   : > { %v5405_v58 = vmul.f32 %v7910_v56, %v5397_v47 }
0x28f3   : > { %v5412_v60 = vmul.f32 %v6818_v57, %v5405_v58 }
0x28f5   : > { %v9558_v61 = vadd.f32 %v6819_v59, %v5412_v60 }
0x28f7   : > { %v5420_v22 = vpack.c.bf16 %v9558_v61, %v9558_v61 }
0x28f9   : > { %7440 = vmatmul.mubr.msk.bf16.vlgmr.msra.gmra.mrb[112].mxu0 %vm1604_vm3, %v5420_v22 }
0x28fa   : > { %7452 = vmatpush3.bf16.xpose.msra.mxu0 %v5546_v62  ;;  %7453 = vmatprep.mubr.msk.bf16.mxu0 %vm8450_vm0, %v8449_v1 }
0x28fb   : > { %7463 = vmatprep.subr.bf16.mxu0 %v8449_v1 }
0x29cc   : > { %v5476_v2 = vpop.f32.mrb[112].mxu0 }
0x29cd   : > { %v5477_v3 = vadd.f32 %v6820_v63, %v5476_v2  ;;  %v7441_v0 = vpop.f32.mrb[113].mxu0 }
0x29ce   : > { %v5479_v4 = vpop.f32.mrb[114].mxu0 }
0x29cf   : > { %v5540_v6 = vpack.c.bf16 %v5477_v3, %v5477_v3  ;;  %v7442_v7 = vpop.f32.mrb[115].mxu0 }
0x29d1   : > { %5650 = vrot.lane.b32.xlu1 %v5540_v6, %s9834_s6  ;;  %5760 = vrot.lane.b32.xlu0 %v5540_v6, %s9833_s5 }
0x29d2   : > { %7454 = vmatmul.mubr.msk.bf16.vlgmr.msra.gmra.mrb[116].mxu0 %vm1652_vm4, %v5540_v6 }
0x29d3   : > { %7464 = vmatpush3.bf16.xpose.msra.mxu0 %v5658_v8  ;;  %7465 = vmatprep.mubr.msk.bf16.mxu0 %vm8450_vm0, %v8449_v1 }
0x29d4   : > { %7475 = vmatprep.subr.bf16.mxu0 %v8449_v1 }
0x29d5   : > { %5762 = vrot.lane.b32.xlu1 %v9550_v45, %s9833_s5  ;;  %5870 = vrot.lane.b32.xlu0 %v5540_v6, %s9835_s11  ;;  %s9853_s5 = sld [smem:[#allocation40_spill]] }
0x29d9   : > { %5872 = vrot.lane.b32.xlu1 %v9550_v45, %s9835_s11 }
0x2a43   : > { %v5651_v9 = vpop.permute.xlu1 %5650  ;;  %v5761_v13 = vpop.permute.xlu0 %5760 }
0x2a44   : > { %7466 = vmatmul.mubr.msk.bf16.vlgmr.msra.gmra.mrb[120].mxu0 %vm1652_vm4, %v5651_v9 }
0x2a45   : > { %7477 = vmatprep.mubr.msk.bf16.mxu0 %vm8450_vm0, %v8449_v1 }
0x2a47   : > { %v5763_v11 = vpop.permute.xlu1 %5762  ;;  %v5871_v15 = vpop.permute.xlu0 %5870 }
0x2a48   : > { %v5768_v10 = vsel %vm1652_vm4, %v5763_v11, 0 }
0x2a49   : > { %7476 = vmatpush3.bf16.xpose.msra.mxu0 %v5768_v10 }
0x2a4a   : > { %7487 = vmatprep.subr.bf16.mxu0 %v8449_v1 }
0x2a4b   : > { %v5873_v12 = vpop.permute.xlu1 %5872 }
0x2a4c   : > { %v5878_v14 = vsel %vm1652_vm4, %v5873_v12, 0  ;;  %v7807_v12 = vld [vmem:[%s9850_s9 + $0x10] sm:$0xff]  }
0x2a50   : > { %7478 = vmatmul.mubr.msk.bf16.vlgmr.msra.gmra.mrb[124].mxu0 %vm1652_vm4, %v5761_v13 }
0x2a51   : > { %7488 = vmatpush3.bf16.xpose.msra.mxu0 %v5878_v14  ;;  %7489 = vmatprep.mubr.msk.bf16.mxu0 %vm8450_vm0, %v8449_v1 }
0x2a52   : > { %7499 = vmatprep.subr.bf16.mxu0 %v8449_v1 }
0x2a58   : > { %7490 = vmatmul.mubr.msk.bf16.vlgmr.msra.gmra.mrb[128].mxu0 %vm1652_vm4, %v5871_v15 }
0x2a59   : > { %7503 = vmatprep.mubr.msk.bf16.mxu0 %vm8450_vm0, %v8449_v1  ;;  %7500 = vmatpush3.bf16.msra.mxu0 %v7807_v12 }
0x2a5a   : > { %7501 = vmatprep.subr.bf16.mxu0 %v8449_v1 }
0x2aa5   : > { %v5582_v16 = vpop.f32.mrb[116].mxu0 }
0x2aa6   : > { %v7455_v17 = vpop.f32.mrb[117].mxu0  ;;  %v5588_v18 = vsel %vm1652_vm4, %v5582_v16, -inf }
0x2aa7   : > { %5589 = vmax.xlane.f32.xlu1 %v5588_v18  ;;  %v5585_v20 = vpop.f32.mrb[118].mxu0 }
0x2aa8   : > { %v7456_v21 = vpop.f32.mrb[119].mxu0 }
0x2aa9   : > { %v7808_v21 = vld [vmem:[%s9850_s9 + $0x18] sm:$0xff]  }
0x2aaa   : > { %7502 = vmatpush3.bf16.msra.mxu0 %v7808_v21 }
0x2aab   : > { %7515 = vmatprep.subr.bf16.mxu0 %v8449_v1 }
0x2ab8   : > { %5710 = vrot.lane.b32.xlu1 %v9550_v45, %s9831_s3 }
0x2b17   : > { %v5694_v23 = vpop.f32.mrb[120].mxu0 }
0x2b18   : > { %v7467_v24 = vpop.f32.mrb[121].mxu0  ;;  %v5700_v25 = vsel %vm1652_vm4, %v5694_v23, -inf }
0x2b19   : > { %5701 = vmax.xlane.f32.xlu0 %v5700_v25  ;;  %v5697_v26 = vpop.f32.mrb[122].mxu0 }
0x2b1a   : > { %v7468_v27 = vpop.f32.mrb[123].mxu0 }
0x2b23   : > { %v5804_v28 = vpop.f32.mrb[124].mxu0 }
0x2b24   : > { %v7479_v29 = vpop.f32.mrb[125].mxu0  ;;  %v5810_v30 = vsel %vm1652_vm4, %v5804_v28, -inf }
0x2b25   : > { %5811 = vmax.xlane.f32.xlu0 %v5810_v30  ;;  %v5807_v32 = vpop.f32.mrb[126].mxu0 }
0x2b26   : > { %v7480_v33 = vpop.f32.mrb[127].mxu0 }
0x2b2b   : > { %v5914_v34 = vpop.f32.mrb[128].mxu0 }
0x2b2c   : > { %v7491_v35 = vpop.f32.mrb[129].mxu0  ;;  %v5920_v36 = vsel %vm1652_vm4, %v5914_v34, -inf }
0x2b2d   : > { %5921 = vmax.xlane.f32.xlu1 %v5920_v36  ;;  %v5917_v37 = vpop.f32.mrb[130].mxu0 }
0x2b2e   : > { %v7492_v38 = vpop.f32.mrb[131].mxu0 }
0x2b34   : > { %v5590_v39 = vpop.xlane.xlu1 %5589 }
0x2b35   : > { %v5591_v40 = vsub.f32 %v5582_v16, %v5590_v39 }
0x2b37   : > { %v5592_v43 = vmul.f32 1.442695, %v5591_v40 }
0x2b38   : > { %v5711_v49 = vpop.permute.xlu1 %5710 }
0x2b39   : > { %v5716_v54 = vsel %vm1481_vm1, %v5711_v49, 0 }
0x2b3b   : > { %5599 = vrot.lane.b32.xlu0 %v9550_v45, %s9832_s4 }
0x2b3e   : > { %5820 = vrot.lane.b32.xlu1 %v9550_v45, %s9836_s12 }
0x2b3f   : > { %5930 = vrot.lane.b32.xlu0 %v9550_v45, %s9837_s14 }
0x2ba6   : > { %v5702_v41 = vpop.xlane.xlu0 %5701 }
0x2ba7   : > { %v5703_v42 = vsub.f32 %v5694_v23, %v5702_v41 }
0x2ba9   : > { %v5704_v31 = vmul.f32 1.442695, %v5703_v42 }
0x2bab   : > { %7911 = vpow2.f32 %v5704_v31 }
0x2bac   : > { %7913 = vpow2.f32 %v5592_v43 }
0x2bb2   : > { %v5812_v44 = vpop.xlane.xlu0 %5811 }
0x2bb3   : > { %v5813_v46 = vsub.f32 %v5804_v28, %v5812_v44 }
0x2bb5   : > { %v7912_v47 = vpop.eup %7911  ;;  %v5814_v19 = vmul.f32 1.442695, %v5813_v46  ;;  %v6836_v46 = vld [vmem:[#allocation16 + $0x1] ss:$0 sm:$0xff] }
0x2bb6   : > { %v7914_v48 = vpop.eup %7913  ;;  %v5600_v50 = vpop.permute.xlu0 %5599  ;;  %v5706_v52 = vsel %vm1652_vm4, %v7912_v47, 0.0  ;;  %v5709_v60 = vpack.c.bf16 %v7912_v47, %v7912_v47 }
0x2bb7   : > { %7915 = vpow2.f32 %v5814_v19  ;;  %v5605_v45 = vsel %vm1481_vm1, %v5600_v50, 0  ;;  %5707 = vadd.xlane.f32.xlu1 %v5706_v52  ;;  %v5597_v53 = vpack.c.bf16 %v7914_v48, %v7914_v48  ;;  %v5594_v51 = vsel %vm1652_vm4, %v7914_v48, 0.0 }
0x2bb8   : > { %7458 = vmatpush3.bf16.msra.mxu1 %v5605_v45 }
0x2bb9   : > { %7469 = vmatprep.subr.bf16.mxu1 %v8449_v1 }
0x2bba   : > { %v5922_v55 = vpop.xlane.xlu1 %5921  ;;  %v5931_v63 = vpop.permute.xlu0 %5930 }
0x2bbb   : > { %v5923_v56 = vsub.f32 %v5914_v34, %v5922_v55  ;;  %7460 = vmatmul.mubr.msk.bf16.vlgmr.msra.gmra.mrb[128].mxu1 %vm1652_vm4, %v5597_v53  ;;  %5595 = vadd.xlane.f32.xlu1 %v5594_v51  ;;  %v5936_v4 = vsel %vm1481_vm1, %v5931_v63, 0 }
0x2bbc   : > { %7470 = vmatpush3.bf16.msra.mxu1 %v5716_v54  ;;  %7471 = vmatprep.mubr.msk.bf16.mxu1 %vm8450_vm0, %v8449_v1 }
0x2bbd   : > { %v5924_v57 = vmul.f32 1.442695, %v5923_v56  ;;  %7481 = vmatprep.subr.bf16.mxu1 %v8449_v1 }
0x2bbe   : > { %v5821_v58 = vpop.permute.xlu1 %5820 }
0x2bbf   : > { %7917 = vpow2.f32 %v5924_v57  ;;  %v5826_v62 = vsel %vm1481_vm1, %v5821_v58, 0  ;;  %v7809_v57 = vld [vmem:[%s9851_s10 + $0x10] sm:$0xff]   ;;  %v7810_v58 = vld [vmem:[%s9851_s10 + $0x18] sm:$0xff]  }
0x2bc1   : > { %v7916_v59 = vpop.eup %7915 }
0x2bc2   : > { %v5816_v22 = vsel %vm1652_vm4, %v7916_v59, 0.0  ;;  %v5819_v3 = vpack.c.bf16 %v7916_v59, %v7916_v59  ;;  %v7811_v59 = vld [vmem:[%s9852_s16 + $0x20] sm:$0xff]  }
0x2bc3   : > { %5817 = vadd.xlane.f32.xlu0 %v5816_v22  ;;  %7472 = vmatmul.mubr.msk.bf16.vlgmr.msra.gmra.mrb[132].mxu1 %vm1652_vm4, %v5709_v60 }
0x2bc4   : > { %7482 = vmatpush3.bf16.msra.mxu1 %v5826_v62  ;;  %7483 = vmatprep.mubr.msk.bf16.mxu1 %vm8450_vm0, %v8449_v1 }
0x2bc5   : > { %7493 = vmatprep.subr.bf16.mxu1 %v8449_v1 }
0x2bc9   : > { %v7918_v2 = vpop.eup %7917 }
0x2bca   : > { %v5926_v0 = vsel %vm1652_vm4, %v7918_v2, 0.0  ;;  %v5929_v5 = vpack.c.bf16 %v7918_v2, %v7918_v2  ;;  %v6840_v2 = vld [vmem:[#allocation17 + $0x1] ss:$0 sm:$0xff] }
0x2bcb   : > { %5927 = vadd.xlane.f32.xlu0 %v5926_v0  ;;  %7484 = vmatmul.mubr.msk.bf16.vlgmr.msra.gmra.mrb[136].mxu1 %vm1652_vm4, %v5819_v3  ;;  %v6841_v0 = vld [vmem:[#allocation19 + $0x1] ss:$0 sm:$0xff] }
0x2bcc   : > { %7494 = vmatpush3.bf16.msra.mxu1 %v5936_v4  ;;  %7495 = vmatprep.mubr.msk.bf16.mxu1 %vm8450_vm0, %v8449_v1 }
0x2bcd   : > { %7507 = vmatprep.subr.bf16.mxu1 %v8449_v1 }
0x2bd3   : > { %7496 = vmatmul.mubr.msk.bf16.vlgmr.msra.gmra.mrb[140].mxu1 %vm1652_vm4, %v5929_v5 }
0x2bd4   : > { %7511 = vmatprep.mubr.msk.bf16.mxu1 %vm8450_vm0, %v8449_v1  ;;  %7508 = vmatpush3.bf16.msra.mxu1 %v7809_v57 }
0x2bd5   : > { %7509 = vmatprep.subr.bf16.mxu1 %v8449_v1 }
0x2bd8   : > { %7510 = vmatpush3.bf16.msra.mxu1 %v7810_v58 }
0x2c44   : > { %v5708_v6 = vpop.xlane.xlu1 %5707 }
0x2c45   : > { %7919 = vrcp.f32 %v5708_v6 }
0x2c48   : > { %v5596_v36 = vpop.xlane.xlu1 %5595 }
0x2c4f   : > { %v7920_v13 = vpop.eup %7919 }
0x2c50   : > { %v5818_v11 = vpop.xlane.xlu0 %5817 }
0x2c51   : > { %7921 = vrcp.f32 %v5818_v11 }
0x2c58   : > { %v5928_v18 = vpop.xlane.xlu0 %5927 }
0x2c59   : > { %7923 = vrcp.f32 %v5928_v18 }
0x2c5a   : > { %7925 = vrcp.f32 %v5596_v36  ;;  %v6252_v36 = vld [vmem:[%s9853_s5 + $0x10] sm:$0xff] }
0x2c5b   : > { %v7922_v23 = vpop.eup %7921 }
0x2c63   : > { %v7924_v29 = vpop.eup %7923 }
0x2c64   : > { %v7926_v37 = vpop.eup %7925 }
0x2c8e   : > { %v5641_v7 = vpop.f32.mrb[128].mxu1 }
0x2c8f   : > { %v7461_v8 = vpop.f32.mrb[129].mxu1  ;;  %v5648_v40 = vmul.f32 %v7926_v37, %v5641_v7  ;;  %v7813_v7 = vld [vmem:[%s9852_s16 + $0x30] sm:$0xff]   ;;  %v6253_v37 = vld [vmem:[%s9853_s5 + $0x18] sm:$0xff] }
0x2c90   : > { %v5644_v9 = vpop.f32.mrb[130].mxu1  ;;  %v7814_v8 = vld [vmem:[%s9852_s16 + $0x38] sm:$0xff]  }
0x2c91   : > { %v7462_v10 = vpop.f32.mrb[131].mxu1  ;;  %v6842_v9 = vld [vmem:[#allocation20 + $0x1] ss:$0 sm:$0xff] }
0x2c96   : > { %v5752_v14 = vpop.f32.mrb[132].mxu1 }
0x2c97   : > { %v5759_v15 = vmul.f32 %v7920_v13, %v5752_v14  ;;  %v7473_v16 = vpop.f32.mrb[133].mxu1 }
0x2c98   : > { %v5755_v17 = vpop.f32.mrb[134].mxu1 }
0x2c99   : > { %5981 = vrot.lane.b32.xlu0 %v5759_v15, %s9842_s21  ;;  %v7474_v20 = vpop.f32.mrb[135].mxu1  ;;  %v6846_v17 = vld [vmem:[#allocation22 + $0x1] ss:$0 sm:$0xff] }
0x2c9e   : > { %v5862_v24 = vpop.f32.mrb[136].mxu1 }
0x2c9f   : > { %v5869_v25 = vmul.f32 %v7922_v23, %v5862_v24  ;;  %v7485_v26 = vpop.f32.mrb[137].mxu1 }
0x2ca0   : > { %v5865_v27 = vpop.f32.mrb[138].mxu1 }
0x2ca1   : > { %5985 = vrot.lane.b32.xlu1 %v5869_v25, %s9843_s24  ;;  %v7486_v28 = vpop.f32.mrb[139].mxu1 }
0x2ca6   : > { %v5972_v30 = vpop.f32.mrb[140].mxu1 }
0x2ca7   : > { %v5979_v32 = vmul.f32 %v7924_v29, %v5972_v30  ;;  %v7497_v33 = vpop.f32.mrb[141].mxu1 }
0x2ca8   : > { %v5975_v34 = vpop.f32.mrb[142].mxu1  ;;  %v6251_v33 = vld [vmem:[%s9853_s5 + $0x8] sm:$0xff] }
0x2ca9   : > { %5989 = vrot.lane.b32.xlu1 %v5979_v32, %s9844_s25  ;;  %v7498_v35 = vpop.f32.mrb[143].mxu1  ;;  %v6250_v32 = vld [vmem:[%s9853_s5] sm:$0xff] }
0x2caa   : > { %v7539_v34 = vpack.c.bf16 %v6251_v33, %v6250_v32  ;;  %v8465_v35 = vmov 0.0|0.0  }
0x2cab   : > { %7538 = vmatprep.subr.bf16.mxu1 %v8465_v35 }
0x2d0b   : > { %v5982_v38 = vpop.permute.xlu0 %5981 }
0x2d0c   : > { %v5992_v41 = vsel %vm1652_vm4, %v5648_v40, %v5982_v38  ;;  %v7542_v38 = vpack.c.bf16 %v6253_v37, %v6252_v36 }
0x2d13   : > { %v5986_v39 = vpop.permute.xlu1 %5985 }
0x2d14   : > { %v5993_v42 = vsel %vm2102_vm5, %v5992_v41, %v5986_v39 }
0x2d1b   : > { %v5990_v43 = vpop.permute.xlu1 %5989 }
0x2d1c   : > { %v5994_v31 = vsel %vm2104_vm6, %v5993_v42, %v5990_v43  ;;  %v6852_v43 = vld [vmem:[#allocation23 + $0x1] ss:$0 sm:$0xff] }
0x2d1d   : > { %v5995_v44 = vpack.c.bf16 %v5994_v31, %v5994_v31 }
0x2d1f   : > { %7504 = vmatmul.mubr.msk.bf16.vlgmr.msra.gmra.mrb[132].mxu0 %vm1604_vm3, %v5995_v44  ;;  %v6853_v44 = vld [vmem:[#allocation25 + $0x1] ss:$0 sm:$0xff] }
0x2d20   : > { %7523 = vmatprep.mubr.msk.bf16.mxu0 %vm8450_vm0, %v8449_v1  ;;  %7516 = vmatpush3.bf16.msra.mxu0 %v7811_v59 }
0x2d21   : > { %7517 = vmatprep.subr.bf16.mxu0 %v8449_v1 }
0x2df2   : > { %v6051_v47 = vpop.f32.mrb[132].mxu0 }
0x2df3   : > { %v6052_v19 = vadd.f32 %v6836_v46, %v6051_v47  ;;  %v7505_v48 = vpop.f32.mrb[133].mxu0 }
0x2df4   : > { %v6054_v49 = vpop.f32.mrb[134].mxu0 }
0x2df5   : > { %v6057_v50 = vadd.f32 %v6052_v19, %v9558_v61  ;;  %v7506_v52 = vpop.f32.mrb[135].mxu0  ;;  %v7812_v61 = vld [vmem:[%s9852_s16 + $0x28] sm:$0xff]   ;;  %v6854_v19 = vld [vmem:[#allocation2] ss:$0 sm:$0xff] }
0x2df6   : > { %7518 = vmatpush3.bf16.msra.mxu0 %v7812_v61 }
0x2df7   : > { %v6058_v45 = vsel %vm1604_vm3, %v6057_v50, 0.0  ;;  %7519 = vmatprep.subr.bf16.mxu0 %v8449_v1 }
0x2df8   : > { %6059 = vadd.xlane.f32.xlu0 %v6058_v45 }
0x2dfa   : > { %7520 = vmatpush3.bf16.msra.mxu0 %v7813_v7 }
0x2dfb   : > { %7521 = vmatprep.subr.bf16.mxu0 %v8449_v1 }
0x2dfe   : > { %7522 = vmatpush3.bf16.msra.mxu0 %v7814_v8 }
0x2e85   : > { %v6060_v53 = vpop.xlane.xlu0 %6059 }
0x2e86   : > { %v6061_v55 = vmul.f32 0.03125, %v6060_v53 }
0x2e88   : > { %v6062_v51 = vsub.f32 %v6057_v50, %v6061_v55 }
0x2e8a   : > { %v6063_v54 = vmul.f32 %v6062_v51, %v6062_v51 }
0x2e8c   : > { %v6064_v56 = vsel %vm1604_vm3, %v6063_v54, 0.0 }
0x2e8d   : > { %6065 = vadd.xlane.f32.xlu1 %v6064_v56 }
0x2f1a   : > { %v6066_v60 = vpop.xlane.xlu1 %6065 }
0x2f1b   : > { %v6067_v22 = vmul.f32 0.03125, %v6066_v60 }
0x2f1d   : > { %v6068_v62 = vadd.f32 1e-05, %v6067_v22 }
0x2f1f   : > { %7927 = vrsqrt.f32 %v6068_v62 }
0x2f29   : > { %v7928_v63 = vpop.eup %7927 }
0x2f2a   : > { %v6070_v3 = vmul.f32 %v7928_v63, %v6062_v51 }
0x2f2c   : > { %v6077_v4 = vmul.f32 %v6840_v2, %v6070_v3 }
0x2f2e   : > { %v6084_v5 = vadd.f32 %v6841_v0, %v6077_v4 }
0x2f30   : > { %v6085_v6 = vpack.c.bf16 %v6084_v5, %v6084_v5 }
0x2f32   : > { %7512 = vmatmul.mubr.msk.bf16.vlgmr.msra.gmra.mrb[144].mxu1 %vm1604_vm3, %v6085_v6 }
0x2f33   : > { %7535 = vmatprep.mubr.msk.f32.mxu1 %vm8450_vm0, %v8449_v1  ;;  %7540 = vmatpush3.bf16.msra.mxu1 %v7539_v34 }
0x2f34   : > { %7541 = vmatprep.subr.bf16.mxu1 %v8465_v35 }
0x2f37   : > { %7543 = vmatpush3.bf16.msra.mxu1 %v7542_v38 }
0x3005   : > { %v6141_v11 = vpop.f32.mrb[144].mxu1 }
0x3006   : > { %v6142_v10 = vadd.f32 %v6842_v9, %v6141_v11  ;;  %v7513_v12 = vpop.f32.mrb[145].mxu1 }
0x3007   : > { %v6144_v13 = vpop.f32.mrb[146].mxu1 }
0x3008   : > { %v6147_v14 = vmax.f32 %v6142_v10, 0.0  ;;  %v7514_v15 = vpop.f32.mrb[147].mxu1 }
0x300a   : > { %v6148_v16 = vpack.c.bf16 %v6147_v14, %v6147_v14 }
0x300c   : > { %7524 = vmatmul.mubr.msk.bf16.vlgmr.msra.gmra.mrb[136].mxu0 %vm2291_vm7, %v6148_v16 }
0x30df   : > { %v6216_v18 = vpop.f32.mrb[136].mxu0 }
0x30e0   : > { %v6217_v20 = vadd.f32 %v6846_v17, %v6216_v18  ;;  %v7525_v21 = vpop.f32.mrb[137].mxu0 }
0x30e1   : > { %v6219_v23 = vpop.f32.mrb[138].mxu0 }
0x30e2   : > { %v6222_v1 = vadd.f32 %v6217_v20, %v6084_v5  ;;  %v7526_v24 = vpop.f32.mrb[139].mxu0 }
0x30e4   : > { %v6223_v25 = vsel %vm1604_vm3, %v6222_v1, 0.0 }
0x30e5   : > { %6224 = vadd.xlane.f32.xlu0 %v6223_v25 }
0x3172   : > { %v6225_v26 = vpop.xlane.xlu0 %6224 }
0x3173   : > { %v6226_v27 = vmul.f32 0.03125, %v6225_v26 }
0x3175   : > { %v6227_v28 = vsub.f32 %v6222_v1, %v6226_v27 }
0x3177   : > { %v6228_v29 = vmul.f32 %v6227_v28, %v6227_v28 }
0x3179   : > { %v6229_v30 = vsel %vm1604_vm3, %v6228_v29, 0.0 }
0x317a   : > { %6230 = vadd.xlane.f32.xlu0 %v6229_v30 }
0x3207   : > { %v6231_v39 = vpop.xlane.xlu0 %6230 }
0x3208   : > { %v6232_v40 = vmul.f32 0.03125, %v6231_v39 }
0x320a   : > { %v6233_v41 = vadd.f32 1e-05, %v6232_v40 }
0x320c   : > { %7929 = vrsqrt.f32 %v6233_v41 }
0x3216   : > { %v7930_v42 = vpop.eup %7929 }
0x3217   : > { %v6235_v31 = vmul.f32 %v7930_v42, %v6227_v28 }
0x3219   : > { %v6242_v46 = vmul.f32 %v6852_v43, %v6235_v31 }
0x321b   : > { %v6249_v47 = vadd.f32 %v6853_v44, %v6242_v46 }
0x321d   : > { %7536 = vmatmul.mubr.msk.f32.vlgmr.msra.gmra.mrb[2].mxu1 %vm1604_vm3, %v6249_v47 }
0x32f0   : > { %v6330_v48 = vpop.f32.mrb[2].mxu1 }
0x32f1   : > { %v6331_v49 = vadd.f32 %v6854_v19, %v6330_v48  ;;  %v7537_v50 = vpop.f32.mrb[3].mxu1 }
0x32f3   : > { %6334 = vst.msk [vmem:[%s1466_s17] sm:$0xff] %vm3184_vm9, %v6331_v49 }
0x32f4 PF: > { %s103_s8 = sadd.s32 1, %s8389_s8  }
0x32f5   : > { %p100_p3 = scmp.ge.s32.totalorder %s103_s8, 4  }
0x32f7   :  { %102 = sbr.rel (!%p100_p3) target bundleno = 92 (0x5c), region = 351 }
0x32fe   :  { %6354 = vsyncpa [#allocation4], 1 }
0x32ff   :  { %6356 = vsyncpa [#allocation4 + $0x1], 1 }
0x3300   :  { %6357 = vsyncpa [#allocation6], 1 }
0x3301   :  { %6358 = vsyncpa [#allocation9], 1 }
0x3302   :  { %6359 = vsyncpa [#allocation12], 1 }
0x3303   :  { %6360 = vsyncpa [#allocation15], 1 }
0x3304   :  { %6361 = vsyncpa [#allocation18], 1 }
0x3305   :  { %6362 = vsyncpa [#allocation21], 1 }
0x3306   :  { %6363 = vsyncpa [#allocation24], 1 }

</bundles_post_ra>
